<compile_context>
chip_gen: v6e
topology: v6e:2x2x1
jax: 0.10.0
libtpu: 0.0.40
codegen_flags: <defaults>
</compile_context>

<pallas_src>
import functools

import jax
import jax.numpy as jnp
from jax import lax
from jax.experimental import pallas as pl
from jax.experimental.pallas import tpu as pltpu


class Config:
    word_num = 50
    embedding_dim = 32
    category_num = 10
    subcategory_num = 12
    category_embedding_dim = 16
    num_filters = 32
    window_size = 3
    attention_dim = 16
    max_title_len = 8
    max_abstract_len = 16
    dropout = 0.2  # treated as identity (see TODO above)


# ----------------------------------------------------------------------------
# Pallas kernel: one grid step per batch TILE (Bt rows).
# ----------------------------------------------------------------------------
def news_encoder_kernel(
    title_ref, abstract_ref, catsub_ref,
    rep_ref, expand_ref, gsum_ref,
    conv_t_ref, cbias_t_ref, w1_t_ref, b1_t_ref, w2_t_ref,
    conv_a_ref, cbias_a_ref, w1_a_ref, b1_a_ref, w2_a_ref,
    dtab_ref, dbias_ref,
    w1_v_ref, b1_v_ref, w2_v_ref,
    out_ref,
    *, bt, vocab, t_len, a_len, nf, cat_num, subcat_num):
    f32 = jnp.float32

    def gather_conv_relu(enc_ref, conv_ref, cbias_ref, length):
        # enc_ref: [bt, length+2] position-encoded word ids
        # (enc = padded_pos * vocab + id; -1 marks the Conv2d zero-padding
        # positions -> all-zero one-hot row -> exact zero contribution).
        # Embedding gather AND the window_size-tap convolution are ONE matmul
        # against the precomposed [P*vocab, L*F] table (word_emb folded into
        # the conv filters in the wrapper).
        npos = length + 2
        width = npos * vocab
        enc = enc_ref[...].astype(f32)                                # [bt, P]
        rep = rep_ref[...][:npos, :width]                             # [P, P*V]
        enc_rep = jnp.dot(enc, rep, preferred_element_type=f32)       # [bt, P*V]
        col = lax.broadcasted_iota(jnp.int32, (1, width), 1).astype(f32)
        onehot = (enc_rep == col).astype(f32)                         # [bt, P*V]
        y = jnp.dot(onehot, conv_ref[...], preferred_element_type=f32)
        return jnp.maximum(y + cbias_ref[...], 0.0)                   # [bt, L*F]

    def attention_wide(xw, w1_ref, b1_ref, w2_ref, g):
        # xw: [bt, g*F] -- g positions/views packed along lanes.  Additive
        # attention with block-diagonal weights + softmax over the g groups.
        # Alpha expansion and the final per-group reduction are tiny 0/1
        # matmuls, so the whole epilogue stays lane-dense 2-D (no [N,1]
        # lane-sparse exp chains, no sublane<->lane relayouts).
        h = jnp.tanh(jnp.dot(xw, w1_ref[...], preferred_element_type=f32)
                     + b1_ref[...])                                   # [bt, g*Ad]
        s = jnp.dot(h, w2_ref[...], preferred_element_type=f32)       # [bt, g]
        s = s - jnp.max(s, axis=-1, keepdims=True)
        e = jnp.exp(s)
        alpha = e / jnp.sum(e, axis=-1, keepdims=True)                # [bt, g]
        expand = expand_ref[...][:g, :g * nf]                         # [g, g*F]
        gsum = gsum_ref[...][:g * nf, :]                              # [g*F, F]
        aw = jnp.dot(alpha, expand, preferred_element_type=f32)       # [bt, g*F]
        return jnp.dot(aw * xw, gsum, preferred_element_type=f32)     # [bt, F]

    title_att = attention_wide(
        gather_conv_relu(title_ref, conv_t_ref, cbias_t_ref, t_len),
        w1_t_ref, b1_t_ref, w2_t_ref, t_len)                          # [bt, F]
    abstract_att = attention_wide(
        gather_conv_relu(abstract_ref, conv_a_ref, cbias_a_ref, a_len),
        w1_a_ref, b1_a_ref, w2_a_ref, a_len)                          # [bt, F]

    # category / subcategory: embedding gather + Linear + ReLU fused into one
    # one-hot matmul against a [CN+SN, 2F] block table.
    cs = catsub_ref[...]                                              # [bt, 2]
    oh_cat = (cs[:, 0:1] ==
              lax.broadcasted_iota(jnp.int32, (1, cat_num), 1)).astype(f32)
    oh_sub = (cs[:, 1:2] ==
              lax.broadcasted_iota(jnp.int32, (1, subcat_num), 1)).astype(f32)
    oh = jnp.concatenate([oh_cat, oh_sub], axis=-1)                   # [bt, CN+SN]
    dense = jnp.maximum(
        jnp.dot(oh, dtab_ref[...], preferred_element_type=f32)
        + dbias_ref[...], 0.0)                                        # [bt, 2F]

    # view attention over the lane-packed [bt, 4F] views
    packed = jnp.concatenate([title_att, abstract_att, dense], axis=-1)
    news_r = attention_wide(packed, w1_v_ref, b1_v_ref, w2_v_ref, 4)  # [bt, F]
    out_ref[...] = news_r.astype(out_ref.dtype)


# ----------------------------------------------------------------------------
# Wrapper: ids + folded weight tables only; everything else inside the kernel.
# ----------------------------------------------------------------------------
def _round_up(x, m):
    return (x + m - 1) // m * m


def _cdiv(a, b):
    return (a + b - 1) // b


def news_encoder_forward(news, params, cfg, *, batch_tile=512):
    """NAML NewsEncoder forward pass.  Dropout == identity (inference)."""
    B = news.shape[0]
    T, A = cfg.max_title_len, cfg.max_abstract_len
    F_, Ad, W = cfg.num_filters, cfg.attention_dim, cfg.window_size
    V, CN, SN = cfg.word_num, cfg.category_num, cfg.subcategory_num
    Tp, Ap = T + 2, A + 2                      # Conv2d padding = 1 per side
    hi = jax.lax.Precision.HIGHEST

    # ---- batch tiling: Bt rows per grid step, grid axis marked "parallel" ----
    nb = _cdiv(B, batch_tile)
    if B >= 128:
        nb = max(nb, 2)     # keep >= 2 tiles so v7x's two TensorCores get work
    Bt = _round_up(max(_cdiv(B, nb), 1), 8)
    nb = _cdiv(B, Bt)
    B_pad = Bt * nb

    def pad_batch(x, fill):
        if B_pad == B:
            return x
        pad = jnp.full((B_pad - B,) + x.shape[1:], fill, x.dtype)
        return jnp.concatenate([x, pad], axis=0)

    # ---- position-encoded word ids (the ONLY per-row data sent to the kernel)
    def encode(ids, L):
        ids = ids.astype(jnp.int32)
        pos = jnp.arange(1, L + 1, dtype=jnp.int32)[None, :]
        enc = pos * V + ids                                    # [B, L]
        pad_col = jnp.full((ids.shape[0], 1), -1, jnp.int32)   # conv zero-pad
        return jnp.concatenate([pad_col, enc, pad_col], axis=1)  # [B, L+2]

    title_enc = pad_batch(encode(news[:, :T], T), -1)
    abstract_enc = pad_batch(encode(news[:, T:T + A], A), -1)
    catsub = pad_batch(
        jnp.stack([news[:, -2], news[:, -1]], axis=1).astype(jnp.int32), 0)

    # ---- fold the embedding tables into the conv / dense weight matrices ----
    word_emb = params['word_emb']                              # [V, E]

    def conv_matrix(conv_w, L):
        # [P*V, L*F]: block (padded position p, output position t) carries
        # word_emb @ conv_w[k] wherever p == t + k.
        P = L + 2
        mat = jnp.zeros((P * V, L * F_), jnp.float32)
        for kk in range(W):
            band = jnp.eye(P, L, k=-kk, dtype=jnp.float32)     # 1 at p == t+kk
            tab = jnp.dot(word_emb, conv_w[kk], precision=hi)  # [V, F]
            mat = mat + jnp.kron(band, tab)
        return mat

    conv_t = conv_matrix(params['title_cnn_w'], T)             # [Tp*V, T*F]
    conv_a = conv_matrix(params['abstract_cnn_w'], A)          # [Ap*V, A*F]
    cbias_t = jnp.tile(params['title_cnn_b'], (1, T))          # [1, T*F]
    cbias_a = jnp.tile(params['abstract_cnn_b'], (1, A))       # [1, A*F]

    def att_blocks(w1, b1, w2, g):
        eye = jnp.eye(g, dtype=jnp.float32)
        return (jnp.kron(eye, w1),            # [g*F, g*Ad]   block-diag
                jnp.tile(b1, (1, g)),         # [1, g*Ad]
                jnp.kron(eye, w2))            # [g*Ad, g]

    w1_t, b1_t, w2_t = att_blocks(params['title_att_w1'],
                                  params['title_att_b1'],
                                  params['title_att_w2'], T)
    w1_a, b1_a, w2_a = att_blocks(params['abstract_att_w1'],
                                  params['abstract_att_b1'],
                                  params['abstract_att_w2'], A)
    w1_v, b1_v, w2_v = att_blocks(params['view_att_w1'],
                                  params['view_att_b1'],
                                  params['view_att_w2'], 4)

    dtab = jnp.zeros((CN + SN, 2 * F_), jnp.float32)
    dtab = dtab.at[:CN, :F_].set(
        jnp.dot(params['cat_emb'], params['cat_w'], precision=hi))
    dtab = dtab.at[CN:, F_:].set(
        jnp.dot(params['subcat_emb'], params['subcat_w'], precision=hi))
    dbias = jnp.concatenate([params['cat_b'], params['subcat_b']], axis=1)

    # ---- shared 0/1 helper matrices (sliced per stream inside the kernel) ----
    P_max = max(Tp, Ap)
    G_max = max(T, A, 4)
    rep = (jnp.arange(P_max * V)[None, :] // V
           == jnp.arange(P_max)[:, None]).astype(jnp.float32)     # [P, P*V]
    expand = (jnp.arange(G_max * F_)[None, :] // F_
              == jnp.arange(G_max)[:, None]).astype(jnp.float32)  # [G, G*F]
    gsum = (jnp.arange(G_max * F_)[:, None] % F_
            == jnp.arange(F_)[None, :]).astype(jnp.float32)       # [G*F, F]

    consts = (rep, expand, gsum,
              conv_t, cbias_t, w1_t, b1_t, w2_t,
              conv_a, cbias_a, w1_a, b1_a, w2_a,
              dtab, dbias, w1_v, b1_v, w2_v)

    def full_spec(arr):
        n = arr.ndim
        return pl.BlockSpec(arr.shape, lambda i, _n=n: (0,) * _n)

    grid_spec = pltpu.PrefetchScalarGridSpec(
        num_scalar_prefetch=0,
        grid=(nb,),
        in_specs=[
            pl.BlockSpec((Bt, Tp), lambda i: (i, 0)),
            pl.BlockSpec((Bt, Ap), lambda i: (i, 0)),
            pl.BlockSpec((Bt, 2), lambda i: (i, 0)),
        ] + [full_spec(c) for c in consts],
        out_specs=pl.BlockSpec((Bt, F_), lambda i: (i, 0)),
    )

    kernel = functools.partial(
        news_encoder_kernel, bt=Bt, vocab=V, t_len=T, a_len=A, nf=F_,
        cat_num=CN, subcat_num=SN)

    out = pl.pallas_call(
        kernel,
        grid_spec=grid_spec,
        out_shape=jax.ShapeDtypeStruct((B_pad, F_), jnp.float32),
        compiler_params=pltpu.CompilerParams(
            dimension_semantics=("parallel",),      # independent batch tiles
            vmem_limit_bytes=48 * 1024 * 1024),
    )(title_enc, abstract_enc, catsub, *consts)
    return out[:B]


# ----------------------------------------------------------------------------
# Pure-JAX reference (same math) for validation.
# ----------------------------------------------------------------------------
def reference_forward(news, params, cfg):
    T, A = cfg.max_title_len, cfg.max_abstract_len
    E, W = cfg.embedding_dim, cfg.window_size
    B = news.shape[0]
    pad = 1

    def conv_relu(emb, w, b):
        L = emb.shape[1]
        out_len = L + 2 * pad - W + 1
        zp = jnp.zeros((B, pad, E), jnp.float32)
        ep = jnp.concatenate([zp, emb, zp], axis=1)
        acc = b[None, :, :]
        for k in range(W):
            acc = acc + jnp.einsum('ble,ef->blf', ep[:, k:k + out_len, :], w[k])
        return jnp.maximum(acc, 0.0)

    def attention(x, w1, b1, w2):
        h = jnp.tanh(jnp.einsum('blf,fa->bla', x, w1) + b1[None])
        s = jnp.einsum('bla,ao->blo', h, w2)
        alpha = jax.nn.softmax(s, axis=1)
        return jnp.sum(alpha * x, axis=1)

    title_emb = params['word_emb'][news[:, :T]]
    abstract_emb = params['word_emb'][news[:, T:T + A]]
    cat_emb = params['cat_emb'][news[:, -2]]
    subcat_emb = params['subcat_emb'][news[:, -1]]

    t_cnn = conv_relu(title_emb, params['title_cnn_w'], params['title_cnn_b'])
    a_cnn = conv_relu(abstract_emb, params['abstract_cnn_w'], params['abstract_cnn_b'])
    t_att = attention(t_cnn, params['title_att_w1'], params['title_att_b1'],
                      params['title_att_w2'])
    a_att = attention(a_cnn, params['abstract_att_w1'], params['abstract_att_b1'],
                      params['abstract_att_w2'])
    c_d = jnp.maximum(cat_emb @ params['cat_w'] + params['cat_b'], 0.0)
    s_d = jnp.maximum(subcat_emb @ params['subcat_w'] + params['subcat_b'], 0.0)
    view = jnp.stack([t_att, a_att, c_d, s_d], axis=1)          # [B, 4, F]
    return attention(view, params['view_att_w1'], params['view_att_b1'],
                     params['view_att_w2'])


def init_params(cfg, key):
    keys = jax.random.split(key, 24)
    ki = iter(keys)

    def init(shape, scale=0.1):
        return jax.random.normal(next(ki), shape, jnp.float32) * scale

    word_emb = init((cfg.word_num, cfg.embedding_dim)).at[0].set(0.0)      # padding_idx=0
    cat_emb = init((cfg.category_num, cfg.category_embedding_dim)).at[0].set(0.0)
    subcat_emb = init((cfg.subcategory_num, cfg.category_embedding_dim)).at[0].set(0.0)

    W, E, F_, Ad, Cd = (cfg.window_size, cfg.embedding_dim, cfg.num_filters,
                        cfg.attention_dim, cfg.category_embedding_dim)
    return dict(
        word_emb=word_emb, cat_emb=cat_emb, subcat_emb=subcat_emb,
        title_cnn_w=init((W, E, F_)), title_cnn_b=init((1, F_)),
        abstract_cnn_w=init((W, E, F_)), abstract_cnn_b=init((1, F_)),
        title_att_w1=init((F_, Ad)), title_att_b1=init((1, Ad)), title_att_w2=init((Ad, 1)),
        abstract_att_w1=init((F_, Ad)), abstract_att_b1=init((1, Ad)), abstract_att_w2=init((Ad, 1)),
        cat_w=init((Cd, F_)), cat_b=init((1, F_)),
        subcat_w=init((Cd, F_)), subcat_b=init((1, F_)),
        view_att_w1=init((F_, Ad)), view_att_b1=init((1, Ad)), view_att_w2=init((Ad, 1)),
    )


if __name__ == "__main__":
    cfg = Config()
    key = jax.random.PRNGKey(0)
    k_params, k_title, k_abs, k_cat, k_sub = jax.random.split(key, 5)

    params = init_params(cfg, k_params)

    B = 2
    title_ids = jax.random.randint(k_title, (B, cfg.max_title_len), 0, cfg.word_num)
    abstract_ids = jax.random.randint(k_abs, (B, cfg.max_abstract_len), 0, cfg.word_num)
    cat_ids = jax.random.randint(k_cat, (B, 1), 1, cfg.category_num)
    subcat_ids = jax.random.randint(k_sub, (B, 1), 1, cfg.subcategory_num)
    news = jnp.concatenate([title_ids, abstract_ids, cat_ids, subcat_ids],
                           axis=1).astype(jnp.int32)   # [B, T + A + 2]

    out = news_encoder_forward(news, params, cfg)
    out = jax.block_until_ready(out)

    ref = reference_forward(news, params, cfg)
    assert out.shape == (B, cfg.num_filters), out.shape
    err = jnp.max(jnp.abs(out - ref))
    assert jnp.allclose(out, ref, rtol=1e-3, atol=1e-3), f"max abs err {err}"

    print("KERNEL_OK")
</pallas_src>

<mosaic_0001>
module attributes {stable_mosaic.version = 11 : i64} {
  func.func @news_encoder_kernel(%arg0: i32, %arg1: memref<8x10xi32, #tpu.memory_space<vmem>>, %arg2: memref<8x18xi32, #tpu.memory_space<vmem>>, %arg3: memref<8x2xi32, #tpu.memory_space<vmem>>, %arg4: memref<18x900xf32, #tpu.memory_space<vmem>>, %arg5: memref<16x512xf32, #tpu.memory_space<vmem>>, %arg6: memref<512x32xf32, #tpu.memory_space<vmem>>, %arg7: memref<500x256xf32, #tpu.memory_space<vmem>>, %arg8: memref<1x256xf32, #tpu.memory_space<vmem>>, %arg9: memref<256x128xf32, #tpu.memory_space<vmem>>, %arg10: memref<1x128xf32, #tpu.memory_space<vmem>>, %arg11: memref<128x8xf32, #tpu.memory_space<vmem>>, %arg12: memref<900x512xf32, #tpu.memory_space<vmem>>, %arg13: memref<1x512xf32, #tpu.memory_space<vmem>>, %arg14: memref<512x256xf32, #tpu.memory_space<vmem>>, %arg15: memref<1x256xf32, #tpu.memory_space<vmem>>, %arg16: memref<256x16xf32, #tpu.memory_space<vmem>>, %arg17: memref<22x64xf32, #tpu.memory_space<vmem>>, %arg18: memref<1x64xf32, #tpu.memory_space<vmem>>, %arg19: memref<128x64xf32, #tpu.memory_space<vmem>>, %arg20: memref<1x64xf32, #tpu.memory_space<vmem>>, %arg21: memref<64x4xf32, #tpu.memory_space<vmem>>, %arg22: memref<8x32xf32, #tpu.memory_space<vmem>>) attributes {dimension_semantics = [#tpu.dimension_semantics<parallel>], iteration_bounds = array<i64: 1>, scalar_prefetch = 0 : i64, scratch_operands = 0 : i64, tpu.core_type = #tpu.core_type<tc>, window_params = [{transform_indices = @transform_0, window_bounds = array<i64: 8, 10>}, {transform_indices = @transform_1, window_bounds = array<i64: 8, 18>}, {transform_indices = @transform_2, window_bounds = array<i64: 8, 2>}, {pipeline_mode = #tpu.pipeline_mode<synchronous>, transform_indices = @transform_3, window_bounds = array<i64: 18, 900>}, {pipeline_mode = #tpu.pipeline_mode<synchronous>, transform_indices = @transform_4, window_bounds = array<i64: 16, 512>}, {pipeline_mode = #tpu.pipeline_mode<synchronous>, transform_indices = @transform_5, window_bounds = array<i64: 512, 32>}, {pipeline_mode = #tpu.pipeline_mode<synchronous>, transform_indices = @transform_6, window_bounds = array<i64: 500, 256>}, {pipeline_mode = #tpu.pipeline_mode<synchronous>, transform_indices = @transform_7, window_bounds = array<i64: 1, 256>}, {pipeline_mode = #tpu.pipeline_mode<synchronous>, transform_indices = @transform_8, window_bounds = array<i64: 256, 128>}, {pipeline_mode = #tpu.pipeline_mode<synchronous>, transform_indices = @transform_9, window_bounds = array<i64: 1, 128>}, {pipeline_mode = #tpu.pipeline_mode<synchronous>, transform_indices = @transform_10, window_bounds = array<i64: 128, 8>}, {pipeline_mode = #tpu.pipeline_mode<synchronous>, transform_indices = @transform_11, window_bounds = array<i64: 900, 512>}, {pipeline_mode = #tpu.pipeline_mode<synchronous>, transform_indices = @transform_12, window_bounds = array<i64: 1, 512>}, {pipeline_mode = #tpu.pipeline_mode<synchronous>, transform_indices = @transform_13, window_bounds = array<i64: 512, 256>}, {pipeline_mode = #tpu.pipeline_mode<synchronous>, transform_indices = @transform_14, window_bounds = array<i64: 1, 256>}, {pipeline_mode = #tpu.pipeline_mode<synchronous>, transform_indices = @transform_15, window_bounds = array<i64: 256, 16>}, {pipeline_mode = #tpu.pipeline_mode<synchronous>, transform_indices = @transform_16, window_bounds = array<i64: 22, 64>}, {pipeline_mode = #tpu.pipeline_mode<synchronous>, transform_indices = @transform_17, window_bounds = array<i64: 1, 64>}, {pipeline_mode = #tpu.pipeline_mode<synchronous>, transform_indices = @transform_18, window_bounds = array<i64: 128, 64>}, {pipeline_mode = #tpu.pipeline_mode<synchronous>, transform_indices = @transform_19, window_bounds = array<i64: 1, 64>}, {pipeline_mode = #tpu.pipeline_mode<synchronous>, transform_indices = @transform_20, window_bounds = array<i64: 64, 4>}, {transform_indices = @transform_21, window_bounds = array<i64: 8, 32>}]} {
    %c0 = arith.constant 0 : index
    %c0_0 = arith.constant 0 : index
    %0 = vector.load %arg1[%c0, %c0_0] : memref<8x10xi32, #tpu.memory_space<vmem>>, vector<8x10xi32>
    %1 = arith.sitofp %0 : vector<8x10xi32> to vector<8x10xf32>
    %c0_1 = arith.constant 0 : index
    %c0_2 = arith.constant 0 : index
    %2 = vector.load %arg4[%c0_1, %c0_2] : memref<18x900xf32, #tpu.memory_space<vmem>>, vector<18x900xf32>
    %3 = vector.extract_strided_slice %2 {offsets = [0, 0], sizes = [10, 500], strides = [1, 1]} : vector<18x900xf32> to vector<10x500xf32>
    %cst = arith.constant dense<0.000000e+00> : vector<8x500xf32>
    %4 = tpu.matmul %1, %3, %cst {dimension_numbers = #tpu.dot_dimension_numbers<[1], [0], [0], [1], [0, 0, 1, 1], [], []>} : vector<8x10xf32>, vector<10x500xf32>, vector<8x500xf32> -> vector<8x500xf32>
    %5 = tpu.iota {dimensions = array<i32: 1>} : vector<1x500xi32>
    %6 = arith.sitofp %5 : vector<1x500xi32> to vector<1x500xf32>
    %7 = vector.broadcast %6 : vector<1x500xf32> to vector<8x500xf32>
    %8 = arith.cmpf oeq, %4, %7 : vector<8x500xf32>
    %9 = arith.extui %8 : vector<8x500xi1> to vector<8x500xi32>
    %10 = arith.sitofp %9 : vector<8x500xi32> to vector<8x500xf32>
    %c0_3 = arith.constant 0 : index
    %c0_4 = arith.constant 0 : index
    %11 = vector.load %arg7[%c0_3, %c0_4] : memref<500x256xf32, #tpu.memory_space<vmem>>, vector<500x256xf32>
    %cst_5 = arith.constant dense<0.000000e+00> : vector<8x256xf32>
    %12 = tpu.matmul %10, %11, %cst_5 {dimension_numbers = #tpu.dot_dimension_numbers<[1], [0], [0], [1], [0, 0, 1, 1], [], []>} : vector<8x500xf32>, vector<500x256xf32>, vector<8x256xf32> -> vector<8x256xf32>
    %c0_6 = arith.constant 0 : index
    %c0_7 = arith.constant 0 : index
    %13 = vector.load %arg8[%c0_6, %c0_7] : memref<1x256xf32, #tpu.memory_space<vmem>>, vector<1x256xf32>
    %14 = vector.broadcast %13 : vector<1x256xf32> to vector<8x256xf32>
    %15 = arith.addf %12, %14 : vector<8x256xf32>
    %cst_8 = arith.constant 0.000000e+00 : f32
    %16 = vector.broadcast %cst_8 : f32 to vector<8x256xf32>
    %17 = arith.maximumf %15, %16 : vector<8x256xf32>
    %c0_9 = arith.constant 0 : index
    %c0_10 = arith.constant 0 : index
    %18 = vector.load %arg9[%c0_9, %c0_10] : memref<256x128xf32, #tpu.memory_space<vmem>>, vector<256x128xf32>
    %cst_11 = arith.constant dense<0.000000e+00> : vector<8x128xf32>
    %19 = tpu.matmul %17, %18, %cst_11 {dimension_numbers = #tpu.dot_dimension_numbers<[1], [0], [0], [1], [0, 0, 1, 1], [], []>} : vector<8x256xf32>, vector<256x128xf32>, vector<8x128xf32> -> vector<8x128xf32>
    %c0_12 = arith.constant 0 : index
    %c0_13 = arith.constant 0 : index
    %20 = vector.load %arg10[%c0_12, %c0_13] : memref<1x128xf32, #tpu.memory_space<vmem>>, vector<1x128xf32>
    %21 = vector.broadcast %20 : vector<1x128xf32> to vector<8x128xf32>
    %22 = arith.addf %19, %21 : vector<8x128xf32>
    %23 = math.tanh %22 : vector<8x128xf32>
    %c0_14 = arith.constant 0 : index
    %c0_15 = arith.constant 0 : index
    %24 = vector.load %arg11[%c0_14, %c0_15] : memref<128x8xf32, #tpu.memory_space<vmem>>, vector<128x8xf32>
    %cst_16 = arith.constant dense<0.000000e+00> : vector<8x8xf32>
    %25 = tpu.matmul %23, %24, %cst_16 {dimension_numbers = #tpu.dot_dimension_numbers<[1], [0], [0], [1], [0, 0, 1, 1], [], []>} : vector<8x128xf32>, vector<128x8xf32>, vector<8x8xf32> -> vector<8x8xf32>
    %cst_17 = arith.constant dense<0xFF800000> : vector<8xf32>
    %26 = vector.multi_reduction <maximumf>, %25, %cst_17 [1] : vector<8x8xf32> to vector<8xf32>
    %27 = vector.shape_cast %26 : vector<8xf32> to vector<8x1xf32>
    %28 = vector.broadcast %27 : vector<8x1xf32> to vector<8x8xf32>
    %29 = arith.subf %25, %28 : vector<8x8xf32>
    %30 = math.exp %29 : vector<8x8xf32>
    %cst_18 = arith.constant dense<0.000000e+00> : vector<8xf32>
    %31 = vector.multi_reduction <add>, %30, %cst_18 [1] : vector<8x8xf32> to vector<8xf32>
    %32 = vector.shape_cast %31 : vector<8xf32> to vector<8x1xf32>
    %33 = vector.broadcast %32 : vector<8x1xf32> to vector<8x8xf32>
    %34 = arith.divf %30, %33 : vector<8x8xf32>
    %c0_19 = arith.constant 0 : index
    %c0_20 = arith.constant 0 : index
    %35 = vector.load %arg5[%c0_19, %c0_20] : memref<16x512xf32, #tpu.memory_space<vmem>>, vector<16x512xf32>
    %36 = vector.extract_strided_slice %35 {offsets = [0, 0], sizes = [8, 256], strides = [1, 1]} : vector<16x512xf32> to vector<8x256xf32>
    %c0_21 = arith.constant 0 : index
    %c0_22 = arith.constant 0 : index
    %37 = vector.load %arg6[%c0_21, %c0_22] : memref<512x32xf32, #tpu.memory_space<vmem>>, vector<512x32xf32>
    %38 = vector.extract_strided_slice %37 {offsets = [0, 0], sizes = [256, 32], strides = [1, 1]} : vector<512x32xf32> to vector<256x32xf32>
    %cst_23 = arith.constant dense<0.000000e+00> : vector<8x256xf32>
    %39 = tpu.matmul %34, %36, %cst_23 {dimension_numbers = #tpu.dot_dimension_numbers<[1], [0], [0], [1], [0, 0, 1, 1], [], []>} : vector<8x8xf32>, vector<8x256xf32>, vector<8x256xf32> -> vector<8x256xf32>
    %40 = arith.mulf %39, %17 : vector<8x256xf32>
    %cst_24 = arith.constant dense<0.000000e+00> : vector<8x32xf32>
    %41 = tpu.matmul %40, %38, %cst_24 {dimension_numbers = #tpu.dot_dimension_numbers<[1], [0], [0], [1], [0, 0, 1, 1], [], []>} : vector<8x256xf32>, vector<256x32xf32>, vector<8x32xf32> -> vector<8x32xf32>
    %c0_25 = arith.constant 0 : index
    %c0_26 = arith.constant 0 : index
    %42 = vector.load %arg2[%c0_25, %c0_26] : memref<8x18xi32, #tpu.memory_space<vmem>>, vector<8x18xi32>
    %43 = arith.sitofp %42 : vector<8x18xi32> to vector<8x18xf32>
    %c0_27 = arith.constant 0 : index
    %c0_28 = arith.constant 0 : index
    %44 = vector.load %arg4[%c0_27, %c0_28] : memref<18x900xf32, #tpu.memory_space<vmem>>, vector<18x900xf32>
    %cst_29 = arith.constant dense<0.000000e+00> : vector<8x900xf32>
    %45 = tpu.matmul %43, %44, %cst_29 {dimension_numbers = #tpu.dot_dimension_numbers<[1], [0], [0], [1], [0, 0, 1, 1], [], []>} : vector<8x18xf32>, vector<18x900xf32>, vector<8x900xf32> -> vector<8x900xf32>
    %46 = tpu.iota {dimensions = array<i32: 1>} : vector<1x900xi32>
    %47 = arith.sitofp %46 : vector<1x900xi32> to vector<1x900xf32>
    %48 = vector.broadcast %47 : vector<1x900xf32> to vector<8x900xf32>
    %49 = arith.cmpf oeq, %45, %48 : vector<8x900xf32>
    %50 = arith.extui %49 : vector<8x900xi1> to vector<8x900xi32>
    %51 = arith.sitofp %50 : vector<8x900xi32> to vector<8x900xf32>
    %c0_30 = arith.constant 0 : index
    %c0_31 = arith.constant 0 : index
    %52 = vector.load %arg12[%c0_30, %c0_31] : memref<900x512xf32, #tpu.memory_space<vmem>>, vector<900x512xf32>
    %cst_32 = arith.constant dense<0.000000e+00> : vector<8x512xf32>
    %53 = tpu.matmul %51, %52, %cst_32 {dimension_numbers = #tpu.dot_dimension_numbers<[1], [0], [0], [1], [0, 0, 1, 1], [], []>} : vector<8x900xf32>, vector<900x512xf32>, vector<8x512xf32> -> vector<8x512xf32>
    %c0_33 = arith.constant 0 : index
    %c0_34 = arith.constant 0 : index
    %54 = vector.load %arg13[%c0_33, %c0_34] : memref<1x512xf32, #tpu.memory_space<vmem>>, vector<1x512xf32>
    %55 = vector.broadcast %54 : vector<1x512xf32> to vector<8x512xf32>
    %56 = arith.addf %53, %55 : vector<8x512xf32>
    %cst_35 = arith.constant 0.000000e+00 : f32
    %57 = vector.broadcast %cst_35 : f32 to vector<8x512xf32>
    %58 = arith.maximumf %56, %57 : vector<8x512xf32>
    %c0_36 = arith.constant 0 : index
    %c0_37 = arith.constant 0 : index
    %59 = vector.load %arg14[%c0_36, %c0_37] : memref<512x256xf32, #tpu.memory_space<vmem>>, vector<512x256xf32>
    %cst_38 = arith.constant dense<0.000000e+00> : vector<8x256xf32>
    %60 = tpu.matmul %58, %59, %cst_38 {dimension_numbers = #tpu.dot_dimension_numbers<[1], [0], [0], [1], [0, 0, 1, 1], [], []>} : vector<8x512xf32>, vector<512x256xf32>, vector<8x256xf32> -> vector<8x256xf32>
    %c0_39 = arith.constant 0 : index
    %c0_40 = arith.constant 0 : index
    %61 = vector.load %arg15[%c0_39, %c0_40] : memref<1x256xf32, #tpu.memory_space<vmem>>, vector<1x256xf32>
    %62 = vector.broadcast %61 : vector<1x256xf32> to vector<8x256xf32>
    %63 = arith.addf %60, %62 : vector<8x256xf32>
    %64 = math.tanh %63 : vector<8x256xf32>
    %c0_41 = arith.constant 0 : index
    %c0_42 = arith.constant 0 : index
    %65 = vector.load %arg16[%c0_41, %c0_42] : memref<256x16xf32, #tpu.memory_space<vmem>>, vector<256x16xf32>
    %cst_43 = arith.constant dense<0.000000e+00> : vector<8x16xf32>
    %66 = tpu.matmul %64, %65, %cst_43 {dimension_numbers = #tpu.dot_dimension_numbers<[1], [0], [0], [1], [0, 0, 1, 1], [], []>} : vector<8x256xf32>, vector<256x16xf32>, vector<8x16xf32> -> vector<8x16xf32>
    %cst_44 = arith.constant dense<0xFF800000> : vector<8xf32>
    %67 = vector.multi_reduction <maximumf>, %66, %cst_44 [1] : vector<8x16xf32> to vector<8xf32>
    %68 = vector.shape_cast %67 : vector<8xf32> to vector<8x1xf32>
    %69 = vector.broadcast %68 : vector<8x1xf32> to vector<8x16xf32>
    %70 = arith.subf %66, %69 : vector<8x16xf32>
    %71 = math.exp %70 : vector<8x16xf32>
    %cst_45 = arith.constant dense<0.000000e+00> : vector<8xf32>
    %72 = vector.multi_reduction <add>, %71, %cst_45 [1] : vector<8x16xf32> to vector<8xf32>
    %73 = vector.shape_cast %72 : vector<8xf32> to vector<8x1xf32>
    %74 = vector.broadcast %73 : vector<8x1xf32> to vector<8x16xf32>
    %75 = arith.divf %71, %74 : vector<8x16xf32>
    %c0_46 = arith.constant 0 : index
    %c0_47 = arith.constant 0 : index
    %76 = vector.load %arg5[%c0_46, %c0_47] : memref<16x512xf32, #tpu.memory_space<vmem>>, vector<16x512xf32>
    %c0_48 = arith.constant 0 : index
    %c0_49 = arith.constant 0 : index
    %77 = vector.load %arg6[%c0_48, %c0_49] : memref<512x32xf32, #tpu.memory_space<vmem>>, vector<512x32xf32>
    %cst_50 = arith.constant dense<0.000000e+00> : vector<8x512xf32>
    %78 = tpu.matmul %75, %76, %cst_50 {dimension_numbers = #tpu.dot_dimension_numbers<[1], [0], [0], [1], [0, 0, 1, 1], [], []>} : vector<8x16xf32>, vector<16x512xf32>, vector<8x512xf32> -> vector<8x512xf32>
    %79 = arith.mulf %78, %58 : vector<8x512xf32>
    %cst_51 = arith.constant dense<0.000000e+00> : vector<8x32xf32>
    %80 = tpu.matmul %79, %77, %cst_51 {dimension_numbers = #tpu.dot_dimension_numbers<[1], [0], [0], [1], [0, 0, 1, 1], [], []>} : vector<8x512xf32>, vector<512x32xf32>, vector<8x32xf32> -> vector<8x32xf32>
    %c0_52 = arith.constant 0 : index
    %c0_53 = arith.constant 0 : index
    %81 = vector.load %arg3[%c0_52, %c0_53] : memref<8x2xi32, #tpu.memory_space<vmem>>, vector<8x2xi32>
    %82 = vector.extract_strided_slice %81 {offsets = [0, 0], sizes = [8, 1], strides = [1, 1]} : vector<8x2xi32> to vector<8x1xi32>
    %83 = tpu.iota {dimensions = array<i32: 1>} : vector<1x10xi32>
    %84 = vector.broadcast %82 : vector<8x1xi32> to vector<8x10xi32>
    %85 = vector.broadcast %83 : vector<1x10xi32> to vector<8x10xi32>
    %86 = arith.cmpi eq, %84, %85 : vector<8x10xi32>
    %87 = arith.extui %86 : vector<8x10xi1> to vector<8x10xi32>
    %88 = arith.sitofp %87 : vector<8x10xi32> to vector<8x10xf32>
    %89 = vector.extract_strided_slice %81 {offsets = [0, 1], sizes = [8, 1], strides = [1, 1]} : vector<8x2xi32> to vector<8x1xi32>
    %90 = tpu.iota {dimensions = array<i32: 1>} : vector<1x12xi32>
    %91 = vector.broadcast %89 : vector<8x1xi32> to vector<8x12xi32>
    %92 = vector.broadcast %90 : vector<1x12xi32> to vector<8x12xi32>
    %93 = arith.cmpi eq, %91, %92 : vector<8x12xi32>
    %94 = arith.extui %93 : vector<8x12xi1> to vector<8x12xi32>
    %95 = arith.sitofp %94 : vector<8x12xi32> to vector<8x12xf32>
    %96 = tpu.concatenate %88, %95 in 1 : vector<8x10xf32>, vector<8x12xf32> -> vector<8x22xf32>
    %c0_54 = arith.constant 0 : index
    %c0_55 = arith.constant 0 : index
    %97 = vector.load %arg17[%c0_54, %c0_55] : memref<22x64xf32, #tpu.memory_space<vmem>>, vector<22x64xf32>
    %cst_56 = arith.constant dense<0.000000e+00> : vector<8x64xf32>
    %98 = tpu.matmul %96, %97, %cst_56 {dimension_numbers = #tpu.dot_dimension_numbers<[1], [0], [0], [1], [0, 0, 1, 1], [], []>} : vector<8x22xf32>, vector<22x64xf32>, vector<8x64xf32> -> vector<8x64xf32>
    %c0_57 = arith.constant 0 : index
    %c0_58 = arith.constant 0 : index
    %99 = vector.load %arg18[%c0_57, %c0_58] : memref<1x64xf32, #tpu.memory_space<vmem>>, vector<1x64xf32>
    %100 = vector.broadcast %99 : vector<1x64xf32> to vector<8x64xf32>
    %101 = arith.addf %98, %100 : vector<8x64xf32>
    %cst_59 = arith.constant 0.000000e+00 : f32
    %102 = vector.broadcast %cst_59 : f32 to vector<8x64xf32>
    %103 = arith.maximumf %101, %102 : vector<8x64xf32>
    %104 = tpu.concatenate %41, %80, %103 in 1 : vector<8x32xf32>, vector<8x32xf32>, vector<8x64xf32> -> vector<8x128xf32>
    %c0_60 = arith.constant 0 : index
    %c0_61 = arith.constant 0 : index
    %105 = vector.load %arg19[%c0_60, %c0_61] : memref<128x64xf32, #tpu.memory_space<vmem>>, vector<128x64xf32>
    %cst_62 = arith.constant dense<0.000000e+00> : vector<8x64xf32>
    %106 = tpu.matmul %104, %105, %cst_62 {dimension_numbers = #tpu.dot_dimension_numbers<[1], [0], [0], [1], [0, 0, 1, 1], [], []>} : vector<8x128xf32>, vector<128x64xf32>, vector<8x64xf32> -> vector<8x64xf32>
    %c0_63 = arith.constant 0 : index
    %c0_64 = arith.constant 0 : index
    %107 = vector.load %arg20[%c0_63, %c0_64] : memref<1x64xf32, #tpu.memory_space<vmem>>, vector<1x64xf32>
    %108 = vector.broadcast %107 : vector<1x64xf32> to vector<8x64xf32>
    %109 = arith.addf %106, %108 : vector<8x64xf32>
    %110 = math.tanh %109 : vector<8x64xf32>
    %c0_65 = arith.constant 0 : index
    %c0_66 = arith.constant 0 : index
    %111 = vector.load %arg21[%c0_65, %c0_66] : memref<64x4xf32, #tpu.memory_space<vmem>>, vector<64x4xf32>
    %cst_67 = arith.constant dense<0.000000e+00> : vector<8x4xf32>
    %112 = tpu.matmul %110, %111, %cst_67 {dimension_numbers = #tpu.dot_dimension_numbers<[1], [0], [0], [1], [0, 0, 1, 1], [], []>} : vector<8x64xf32>, vector<64x4xf32>, vector<8x4xf32> -> vector<8x4xf32>
    %cst_68 = arith.constant dense<0xFF800000> : vector<8xf32>
    %113 = vector.multi_reduction <maximumf>, %112, %cst_68 [1] : vector<8x4xf32> to vector<8xf32>
    %114 = vector.shape_cast %113 : vector<8xf32> to vector<8x1xf32>
    %115 = vector.broadcast %114 : vector<8x1xf32> to vector<8x4xf32>
    %116 = arith.subf %112, %115 : vector<8x4xf32>
    %117 = math.exp %116 : vector<8x4xf32>
    %cst_69 = arith.constant dense<0.000000e+00> : vector<8xf32>
    %118 = vector.multi_reduction <add>, %117, %cst_69 [1] : vector<8x4xf32> to vector<8xf32>
    %119 = vector.shape_cast %118 : vector<8xf32> to vector<8x1xf32>
    %120 = vector.broadcast %119 : vector<8x1xf32> to vector<8x4xf32>
    %121 = arith.divf %117, %120 : vector<8x4xf32>
    %c0_70 = arith.constant 0 : index
    %c0_71 = arith.constant 0 : index
    %122 = vector.load %arg5[%c0_70, %c0_71] : memref<16x512xf32, #tpu.memory_space<vmem>>, vector<16x512xf32>
    %123 = vector.extract_strided_slice %122 {offsets = [0, 0], sizes = [4, 128], strides = [1, 1]} : vector<16x512xf32> to vector<4x128xf32>
    %c0_72 = arith.constant 0 : index
    %c0_73 = arith.constant 0 : index
    %124 = vector.load %arg6[%c0_72, %c0_73] : memref<512x32xf32, #tpu.memory_space<vmem>>, vector<512x32xf32>
    %125 = vector.extract_strided_slice %124 {offsets = [0, 0], sizes = [128, 32], strides = [1, 1]} : vector<512x32xf32> to vector<128x32xf32>
    %cst_74 = arith.constant dense<0.000000e+00> : vector<8x128xf32>
    %126 = tpu.matmul %121, %123, %cst_74 {dimension_numbers = #tpu.dot_dimension_numbers<[1], [0], [0], [1], [0, 0, 1, 1], [], []>} : vector<8x4xf32>, vector<4x128xf32>, vector<8x128xf32> -> vector<8x128xf32>
    %127 = arith.mulf %126, %104 : vector<8x128xf32>
    %cst_75 = arith.constant dense<0.000000e+00> : vector<8x32xf32>
    %128 = tpu.matmul %127, %125, %cst_75 {dimension_numbers = #tpu.dot_dimension_numbers<[1], [0], [0], [1], [0, 0, 1, 1], [], []>} : vector<8x128xf32>, vector<128x32xf32>, vector<8x32xf32> -> vector<8x32xf32>
    %c0_76 = arith.constant 0 : index
    %c0_77 = arith.constant 0 : index
    %129 = vector.load %arg22[%c0_76, %c0_77] : memref<8x32xf32, #tpu.memory_space<vmem>>, vector<8x32xf32>
    tpu.vector_store %arg22[%c0_76, %c0_77], %128 {strides = array<i32>} : memref<8x32xf32, #tpu.memory_space<vmem>>, vector<8x32xf32>,
    return
  }
  func.func @transform_0(%arg0: i32) -> (i32, i32) {
    %c0_i32 = arith.constant 0 : i32
    %c0_i32_0 = arith.constant 0 : i32
    return %arg0, %c0_i32 : i32, i32
  }
  func.func @transform_1(%arg0: i32) -> (i32, i32) {
    %c0_i32 = arith.constant 0 : i32
    %c0_i32_0 = arith.constant 0 : i32
    return %arg0, %c0_i32 : i32, i32
  }
  func.func @transform_2(%arg0: i32) -> (i32, i32) {
    %c0_i32 = arith.constant 0 : i32
    %c0_i32_0 = arith.constant 0 : i32
    return %arg0, %c0_i32 : i32, i32
  }
  func.func @transform_3(%arg0: i32) -> (i32, i32) {
    %c0_i32 = arith.constant 0 : i32
    %c0_i32_0 = arith.constant 0 : i32
    %c0_i32_1 = arith.constant 0 : i32
    return %c0_i32, %c0_i32_0 : i32, i32
  }
  func.func @transform_4(%arg0: i32) -> (i32, i32) {
    %c0_i32 = arith.constant 0 : i32
    %c0_i32_0 = arith.constant 0 : i32
    %c0_i32_1 = arith.constant 0 : i32
    return %c0_i32, %c0_i32_0 : i32, i32
  }
  func.func @transform_5(%arg0: i32) -> (i32, i32) {
    %c0_i32 = arith.constant 0 : i32
    %c0_i32_0 = arith.constant 0 : i32
    %c0_i32_1 = arith.constant 0 : i32
    return %c0_i32, %c0_i32_0 : i32, i32
  }
  func.func @transform_6(%arg0: i32) -> (i32, i32) {
    %c0_i32 = arith.constant 0 : i32
    %c0_i32_0 = arith.constant 0 : i32
    %c0_i32_1 = arith.constant 0 : i32
    return %c0_i32, %c0_i32_0 : i32, i32
  }
  func.func @transform_7(%arg0: i32) -> (i32, i32) {
    %c0_i32 = arith.constant 0 : i32
    %c0_i32_0 = arith.constant 0 : i32
    %c0_i32_1 = arith.constant 0 : i32
    return %c0_i32, %c0_i32_0 : i32, i32
  }
  func.func @transform_8(%arg0: i32) -> (i32, i32) {
    %c0_i32 = arith.constant 0 : i32
    %c0_i32_0 = arith.constant 0 : i32
    %c0_i32_1 = arith.constant 0 : i32
    return %c0_i32, %c0_i32_0 : i32, i32
  }
  func.func @transform_9(%arg0: i32) -> (i32, i32) {
    %c0_i32 = arith.constant 0 : i32
    %c0_i32_0 = arith.constant 0 : i32
    %c0_i32_1 = arith.constant 0 : i32
    return %c0_i32, %c0_i32_0 : i32, i32
  }
  func.func @transform_10(%arg0: i32) -> (i32, i32) {
    %c0_i32 = arith.constant 0 : i32
    %c0_i32_0 = arith.constant 0 : i32
    %c0_i32_1 = arith.constant 0 : i32
    return %c0_i32, %c0_i32_0 : i32, i32
  }
  func.func @transform_11(%arg0: i32) -> (i32, i32) {
    %c0_i32 = arith.constant 0 : i32
    %c0_i32_0 = arith.constant 0 : i32
    %c0_i32_1 = arith.constant 0 : i32
    return %c0_i32, %c0_i32_0 : i32, i32
  }
  func.func @transform_12(%arg0: i32) -> (i32, i32) {
    %c0_i32 = arith.constant 0 : i32
    %c0_i32_0 = arith.constant 0 : i32
    %c0_i32_1 = arith.constant 0 : i32
    return %c0_i32, %c0_i32_0 : i32, i32
  }
  func.func @transform_13(%arg0: i32) -> (i32, i32) {
    %c0_i32 = arith.constant 0 : i32
    %c0_i32_0 = arith.constant 0 : i32
    %c0_i32_1 = arith.constant 0 : i32
    return %c0_i32, %c0_i32_0 : i32, i32
  }
  func.func @transform_14(%arg0: i32) -> (i32, i32) {
    %c0_i32 = arith.constant 0 : i32
    %c0_i32_0 = arith.constant 0 : i32
    %c0_i32_1 = arith.constant 0 : i32
    return %c0_i32, %c0_i32_0 : i32, i32
  }
  func.func @transform_15(%arg0: i32) -> (i32, i32) {
    %c0_i32 = arith.constant 0 : i32
    %c0_i32_0 = arith.constant 0 : i32
    %c0_i32_1 = arith.constant 0 : i32
    return %c0_i32, %c0_i32_0 : i32, i32
  }
  func.func @transform_16(%arg0: i32) -> (i32, i32) {
    %c0_i32 = arith.constant 0 : i32
    %c0_i32_0 = arith.constant 0 : i32
    %c0_i32_1 = arith.constant 0 : i32
    return %c0_i32, %c0_i32_0 : i32, i32
  }
  func.func @transform_17(%arg0: i32) -> (i32, i32) {
    %c0_i32 = arith.constant 0 : i32
    %c0_i32_0 = arith.constant 0 : i32
    %c0_i32_1 = arith.constant 0 : i32
    return %c0_i32, %c0_i32_0 : i32, i32
  }
  func.func @transform_18(%arg0: i32) -> (i32, i32) {
    %c0_i32 = arith.constant 0 : i32
    %c0_i32_0 = arith.constant 0 : i32
    %c0_i32_1 = arith.constant 0 : i32
    return %c0_i32, %c0_i32_0 : i32, i32
  }
  func.func @transform_19(%arg0: i32) -> (i32, i32) {
    %c0_i32 = arith.constant 0 : i32
    %c0_i32_0 = arith.constant 0 : i32
    %c0_i32_1 = arith.constant 0 : i32
    return %c0_i32, %c0_i32_0 : i32, i32
  }
  func.func @transform_20(%arg0: i32) -> (i32, i32) {
    %c0_i32 = arith.constant 0 : i32
    %c0_i32_0 = arith.constant 0 : i32
    %c0_i32_1 = arith.constant 0 : i32
    return %c0_i32, %c0_i32_0 : i32, i32
  }
  func.func @transform_21(%arg0: i32) -> (i32, i32) {
    %c0_i32 = arith.constant 0 : i32
    %c0_i32_0 = arith.constant 0 : i32
    return %arg0, %c0_i32 : i32, i32
  }
}

</mosaic_0001>

<bundles_post_ra>
// kernel: tpu_custom_call.1
= control target key start
LH: loop header
LB: loop body
LE: loop exit
PB: predicated region body
PF: predicated region fallthrough
CT: control target
= control target key end

     0   :  { %s5733_s0 = inlined_call_operand.hbm [shape: s32[8,10], index: 0, kind: input, shape index: {}]   ;;  %s5734_s1 = inlined_call_operand.hbm [shape: s32[8,18], index: 1, kind: input, shape index: {}]   ;;  %s5735_s2 = inlined_call_operand.vmem [shape: s32[8,2], index: 2, kind: input, shape index: {}]   ;;  %s5736_s3 = inlined_call_operand.hbm [shape: f32[18,900], index: 3, kind: input, shape index: {}]   ;;  %s5737_s4 = inlined_call_operand.hbm [shape: f32[16,512], index: 4, kind: input, shape index: {}]   ;;  %s5738_s5 = inlined_call_operand.vmem [shape: f32[512,32], index: 5, kind: input, shape index: {}]   ;;  %s5739_s6 = inlined_call_operand.hbm [shape: f32[500,256], index: 6, kind: input, shape index: {}]   ;;  %s5740_s7 = inlined_call_operand.hbm [shape: f32[1,256], index: 7, kind: input, shape index: {}]   ;;  %s5741_s8 = inlined_call_operand.hbm [shape: f32[256,128], index: 8, kind: input, shape index: {}]   ;;  %s5742_s9 = inlined_call_operand.hbm [shape: f32[1,128], index: 9, kind: input, shape index: {}]   ;;  %s5743_s10 = inlined_call_operand.vmem [shape: f32[128,8], index: 10, kind: input, shape index: {}]   ;;  %s5744_s11 = inlined_call_operand.hbm [shape: f32[900,512], index: 11, kind: input, shape index: {}]   ;;  %s5745_s12 = inlined_call_operand.hbm [shape: f32[1,512], index: 12, kind: input, shape index: {}]   ;;  %s5746_s13 = inlined_call_operand.hbm [shape: f32[512,256], index: 13, kind: input, shape index: {}]   ;;  %s5747_s14 = inlined_call_operand.hbm [shape: f32[1,256], index: 14, kind: input, shape index: {}]   ;;  %s5748_s15 = inlined_call_operand.vmem [shape: f32[256,16], index: 15, kind: input, shape index: {}]   ;;  %s5749_s16 = inlined_call_operand.hbm [shape: f32[22,64], index: 16, kind: input, shape index: {}]   ;;  %s5750_s17 = inlined_call_operand.hbm [shape: f32[1,64], index: 17, kind: input, shape index: {}]   ;;  %s5751_s18 = inlined_call_operand.vmem [shape: f32[128,64], index: 18, kind: input, shape index: {}]   ;;  %s5752_s19 = inlined_call_operand.hbm [shape: f32[1,64], index: 19, kind: input, shape index: {}]   ;;  %s5753_s20 = inlined_call_operand.vmem [shape: f32[64,4], index: 20, kind: input, shape index: {}]   ;;  %s5754_s21 = inlined_call_operand.hbm [shape: f32[8,32], index: 21, kind: output, shape index: {}]  }
   0x1   :  { %5756 = sst [smem:[#allocation36_spill]] %s5733_s0 }
   0x2   :  { %5757 = sst [smem:[#allocation37_spill]] %s5734_s1 }
   0x3   :  { %5758 = sst [smem:[#allocation38_spill]] %s5735_s2 }
   0x4   :  { %5759 = sst [smem:[#allocation39_spill]] %s5736_s3 }
   0x5   :  { %5760 = sst [smem:[#allocation40_spill]] %s5737_s4 }
   0x6   :  { %5761 = sst [smem:[#allocation41_spill]] %s5738_s5 }
   0x7   :  { %26 = vsyncpa [#allocation3], 0 }
   0x8   :  { %27 = vsyncpa [#allocation6], 0 }
   0x9   :  { %28 = vsyncpa [#allocation9], 0 }
   0xa   :  { %29 = vsyncpa [#allocation12], 0 }
   0xb   :  { %30 = vsyncpa [#allocation15], 0 }
   0xc   :  { %31 = vsyncpa [#allocation18], 0 }
   0xd   :  { %32 = vsyncpa [#allocation21], 0 }
   0xe   :  { %33 = vsyncpa [#allocation24], 0 }
   0xf   :  { %34 = vsyncpa [#allocation4], 0  ;;  %s4631_s2 = smov [#allocation5]   ;;  %s4632_s26 = smov [#allocation8]  }
  0x10   :  { %s51_s25 = sshll.u32 %s4631_s2, 4  ;;  %s74_s27 = sshll.u32 %s4632_s26, 4  ;;  %s52_s25 = int_to_ptr.vmem [resolvable:$true] %s51_s25  ;;  %s75_s27 = int_to_ptr.vmem [resolvable:$true] %s74_s27 }
  0x11   :  { %s4301_s3 = scalar_lea.vmem %s52_s25, 128  ;;  %p4306_p1 = scmp.lt.s32.totalorder %s52_s25, %s52_s25 }
  0x12   :  { %p4302_p0 = scmp.ne.s32.totalorder %s52_s25, %s4301_s3  ;;  %p4307_p2 = scmp.lt.s32.totalorder %s4301_s3, %s4301_s3 }
  0x14   :  { %p4308_p3 = por %p4307_p2, %p4306_p1 }
  0x16   :  { %p4309_p4 = pnand %p4308_p3, %p4302_p0 }
  0x18   :  { %4312 = shalt.err (!%p4309_p4)
}
  0x19   :  { %s5762_s0 = sld [smem:[#allocation37_spill]]  ;;  %s4321_s4 = scalar_lea.vmem %s75_s27, 1024 }
  0x1a   :  { %p4322_p5 = scmp.ne.s32.totalorder %s75_s27, %s4321_s4  ;;  %p4326_p6 = scmp.lt.s32.totalorder %s75_s27, %s75_s27 }
  0x1b   :  { %p4327_p7 = scmp.lt.s32.totalorder %s4321_s4, %s4321_s4 }
  0x1d   :  { %p4328_p8 = por %p4327_p7, %p4326_p6 }
  0x1f   :  { %54 = dma.hbm_to_vmem [thread:$0]  %s5762_s0, 128, %s52_s25, [#allocation6]  }
  0x20   :  { %p4329_p9 = pnand %p4328_p8, %p4322_p5 }
  0x22   :  { %4332 = shalt.err (!%p4329_p9)
}
  0x23   :  { %s4633_s30 = smov 512   ;;  %s4634_s5 = smov 32  }
  0x24   :  { %s5763_s1 = sld [smem:[#allocation40_spill]]  ;;  %s4635_s24 = smov [#allocation11]  }
  0x25   :  { %s101_s2 = sshll.u32 %s4635_s24, 4  ;;  %s4636_s26 = smov [#allocation14]   ;;  %s102_s2 = int_to_ptr.vmem [resolvable:$true] %s101_s2 }
  0x26   :  { %s123_s25 = sshll.u32 %s4636_s26, 4  ;;  %s4341_s3 = scalar_lea.vmem %s102_s2, 32  ;;  %s124_s25 = int_to_ptr.vmem [resolvable:$true] %s123_s25 }
  0x27   :  { %p4342_p10 = scmp.ne.s32.totalorder %s102_s2, %s4341_s3  ;;  %p4346_p11 = scmp.lt.s32.totalorder %s102_s2, %s102_s2 }
  0x28   :  { %p4347_p12 = scmp.lt.s32.totalorder %s4341_s3, %s4341_s3 }
  0x2a   :  { %80 = dma.hbm_to_vmem [thread:$0]  %s5763_s1, 1024, %s75_s27, [#allocation9], %s4633_s30, %s4633_s30, %s4634_s5  }
  0x2b   :  { %p4348_p13 = por %p4347_p12, %p4346_p11 }
  0x2d   :  { %p4349_p0 = pnand %p4348_p13, %p4342_p10 }
  0x2f   :  { %4352 = shalt.err (!%p4349_p0)
}
  0x30   :  { %104 = dma.hbm_to_vmem [thread:$0]  %s5740_s7, 32, %s102_s2, [#allocation12]  }
  0x31   :  { %s4361_s0 = scalar_lea.vmem %s124_s25, 16  ;;  %s4365_s27 = scalar_lea.vmem %s124_s25, 32 }
  0x32   :  { %p4362_p1 = scmp.ne.s32.totalorder %s124_s25, %s4361_s0  ;;  %p4366_p2 = scmp.lt.s32.totalorder %s124_s25, %s124_s25 }
  0x33   :  { %p4367_p3 = scmp.lt.s32.totalorder %s4365_s27, %s4361_s0 }
  0x35   :  { %p4368_p4 = por %p4367_p3, %p4366_p2 }
  0x37   :  { %p4369_p5 = pnand %p4368_p4, %p4362_p1 }
  0x39   :  { %4372 = shalt.err (!%p4369_p5)
}
  0x3a   :  { %126 = dma.hbm_to_vmem [thread:$0]  %s5742_s9, 16, %s124_s25, [#allocation15]  }
  0x3b   :  { %s4637_s23 = smov [#allocation17]   ;;  %s4638_s24 = smov [#allocation20]  }
  0x3c   :  { %s147_s1 = sshll.u32 %s4637_s23, 4  ;;  %s169_s26 = sshll.u32 %s4638_s24, 4  ;;  %s148_s1 = int_to_ptr.vmem [resolvable:$true] %s147_s1  ;;  %s170_s26 = int_to_ptr.vmem [resolvable:$true] %s169_s26 }
  0x3d   :  { %s4381_s3 = scalar_lea.vmem %s148_s1, 64  ;;  %p4386_p7 = scmp.lt.s32.totalorder %s148_s1, %s148_s1 }
  0x3e   :  { %p4382_p6 = scmp.ne.s32.totalorder %s148_s1, %s4381_s3  ;;  %p4387_p8 = scmp.lt.s32.totalorder %s4381_s3, %s4381_s3 }
  0x40   :  { %p4388_p9 = por %p4387_p8, %p4386_p7 }
  0x42   :  { %p4389_p10 = pnand %p4388_p9, %p4382_p6 }
  0x44   :  { %4392 = shalt.err (!%p4389_p10)
}
  0x45   :  { %150 = dma.hbm_to_vmem [thread:$0]  %s5745_s12, 64, %s148_s1, [#allocation18]  }
  0x46   :  { %s4401_s28 = scalar_lea.vmem %s170_s26, 32  ;;  %p4406_p12 = scmp.lt.s32.totalorder %s170_s26, %s170_s26 }
  0x47   :  { %p4402_p11 = scmp.ne.s32.totalorder %s170_s26, %s4401_s28  ;;  %p4407_p13 = scmp.lt.s32.totalorder %s4401_s28, %s4401_s28 }
  0x49   :  { %p4408_p0 = por %p4407_p13, %p4406_p12 }
  0x4b   :  { %p4409_p1 = pnand %p4408_p0, %p4402_p11 }
  0x4d   :  { %4412 = shalt.err (!%p4409_p1)
}
  0x4e   :  { %172 = dma.hbm_to_vmem [thread:$0]  %s5747_s14, 32, %s170_s26, [#allocation21]  }
  0x4f   :  { %s4639_s29 = smov [#allocation23]   ;;  %s4640_s27 = smov [#allocation2]  }
  0x50   :  { %s193_s0 = sshll.u32 %s4639_s29, 4  ;;  %s41_s4 = sshll.u32 %s4640_s27, 4  ;;  %s194_s0 = int_to_ptr.vmem [resolvable:$true] %s193_s0  ;;  %s42_s4 = int_to_ptr.vmem [resolvable:$true] %s41_s4 }
  0x51   :  { %s4421_s22 = scalar_lea.vmem %s194_s0, 16  ;;  %s4425_s12 = scalar_lea.vmem %s194_s0, 32 }
  0x52   :  { %p4422_p2 = scmp.ne.s32.totalorder %s194_s0, %s4421_s22  ;;  %p4426_p3 = scmp.lt.s32.totalorder %s194_s0, %s194_s0 }
  0x53   :  { %p4427_p4 = scmp.lt.s32.totalorder %s4425_s12, %s4421_s22 }
  0x55   :  { %p4428_p5 = por %p4427_p4, %p4426_p3 }
  0x57   :  { %p4429_p6 = pnand %p4428_p5, %p4422_p2 }
  0x59   :  { %4432 = shalt.err (!%p4429_p6)
}
  0x5a   :  { %196 = dma.hbm_to_vmem [thread:$0]  %s5750_s17, 16, %s194_s0, [#allocation24]  }
  0x5b   :  { %s4441_s24 = scalar_lea.vmem %s42_s4, 128  ;;  %p4446_p8 = scmp.lt.s32.totalorder %s42_s4, %s42_s4 }
  0x5c   :  { %p4442_p7 = scmp.ne.s32.totalorder %s42_s4, %s4441_s24  ;;  %p4447_p9 = scmp.lt.s32.totalorder %s4441_s24, %s4441_s24 }
  0x5e   :  { %p4448_p10 = por %p4447_p9, %p4446_p8 }
  0x60   :  { %p4449_p11 = pnand %p4448_p10, %p4442_p7 }
  0x62   :  { %4452 = shalt.err (!%p4449_p11)
}
  0x63   :  { %s5764_s3 = sld [smem:[#allocation36_spill]]  ;;  %s4641_s7 = smov [#allocation7]  }
  0x64   :  { %s62_s2 = sshll.u32 %s4641_s7, 4  ;;  %s63_s2 = int_to_ptr.vmem [resolvable:$true] %s62_s2 }
  0x65   :  { %s4461_s28 = scalar_lea.vmem %s63_s2, 3072  ;;  %p4466_p13 = scmp.lt.s32.totalorder %s63_s2, %s63_s2 }
  0x66   :  { %p4462_p12 = scmp.ne.s32.totalorder %s63_s2, %s4461_s28  ;;  %p4467_p0 = scmp.lt.s32.totalorder %s4461_s28, %s4461_s28 }
  0x68   :  { %p4468_p1 = por %p4467_p0, %p4466_p13 }
  0x69   :  { %44 = dma.hbm_to_vmem [thread:$0]  %s5764_s3, 128, %s42_s4, [#allocation3]  }
  0x6a   :  { %p4469_p2 = pnand %p4468_p1, %p4462_p12 }
  0x6c   :  { %4472 = shalt.err (!%p4469_p2)
}
  0x6d   :  { %s4642_s17 = smov 1024   ;;  %s4643_s9 = smov 64  }
  0x6e   :  { %s5765_s0 = sld [smem:[#allocation39_spill]]  ;;  %s4644_s27 = smov [#allocation10]  }
  0x6f   :  { %s88_s22 = sshll.u32 %s4644_s27, 4  ;;  %s89_s22 = int_to_ptr.vmem [resolvable:$true] %s88_s22 }
  0x70   :  { %s4481_s4 = scalar_lea.vmem %s89_s22, 16128  ;;  %p4486_p4 = scmp.lt.s32.totalorder %s89_s22, %s89_s22 }
  0x71   :  { %p4482_p3 = scmp.ne.s32.totalorder %s89_s22, %s4481_s4  ;;  %p4487_p5 = scmp.lt.s32.totalorder %s4481_s4, %s4481_s4 }
  0x73   :  { %p4488_p6 = por %p4487_p5, %p4486_p4 }
  0x74   :  { %68 = dma.hbm_to_vmem [thread:$0]  %s5765_s0, 3072, %s63_s2, [#allocation6], %s4642_s17, %s4642_s17, %s4643_s9  }
  0x75   :  { %p4489_p7 = pnand %p4488_p6, %p4482_p3 }
  0x77   :  { %4492 = shalt.err (!%p4489_p7)
}
  0x78   :  { %s4645_s12 = smov 256   ;;  %s4646_s23 = smov 16  }
  0x79   :  { %94 = dma.hbm_to_vmem [thread:$0]  %s5739_s6, 16128, %s89_s22, [#allocation9], %s4645_s12, %s4645_s12, %s4646_s23  }
  0x7a   :  { %s4647_s14 = smov [#allocation13]  }
  0x7b   :  { %s110_s26 = sshll.u32 %s4647_s14, 4  ;;  %s111_s26 = int_to_ptr.vmem [resolvable:$true] %s110_s26 }
  0x7c   :  { %s4501_s3 = scalar_lea.vmem %s111_s26, 4096  ;;  %p4506_p9 = scmp.lt.s32.totalorder %s111_s26, %s111_s26 }
  0x7d   :  { %p4502_p8 = scmp.ne.s32.totalorder %s111_s26, %s4501_s3  ;;  %p4507_p10 = scmp.lt.s32.totalorder %s4501_s3, %s4501_s3 }
  0x7f   :  { %p4508_p11 = por %p4507_p10, %p4506_p9 }
  0x81   :  { %p4509_p12 = pnand %p4508_p11, %p4502_p8 }
  0x83   :  { %4512 = shalt.err (!%p4509_p12)
}
  0x84   :  { %s4648_s7 = smov 128   ;;  %s4649_s2 = smov 8  }
  0x85   :  { %116 = dma.hbm_to_vmem [thread:$0]  %s5741_s8, 4096, %s111_s26, [#allocation12], %s4648_s7, %s4648_s7, %s4649_s2  }
  0x86   :  { %s4650_s6 = smov [#allocation16]   ;;  %s4651_s29 = smov [#allocation19]  }
  0x87   :  { %s134_s25 = sshll.u32 %s4650_s6, 4  ;;  %s156_s0 = sshll.u32 %s4651_s29, 4  ;;  %s135_s25 = int_to_ptr.vmem [resolvable:$true] %s134_s25  ;;  %s157_s0 = int_to_ptr.vmem [resolvable:$true] %s156_s0 }
  0x88   :  { %s4521_s27 = scalar_lea.vmem %s135_s25, 57856  ;;  %p4526_p0 = scmp.lt.s32.totalorder %s135_s25, %s135_s25 }
  0x89   :  { %p4522_p13 = scmp.ne.s32.totalorder %s135_s25, %s4521_s27  ;;  %p4527_p1 = scmp.lt.s32.totalorder %s4521_s27, %s4521_s27 }
  0x8b   :  { %p4528_p2 = por %p4527_p1, %p4526_p0 }
  0x8d   :  { %p4529_p3 = pnand %p4528_p2, %p4522_p13 }
  0x8f   :  { %4532 = shalt.err (!%p4529_p3)
}
  0x90   :  { %140 = dma.hbm_to_vmem [thread:$0]  %s5744_s11, 57856, %s135_s25, [#allocation15], %s4633_s30, %s4633_s30, %s4634_s5  }
  0x91   :  { %s4541_s8 = scalar_lea.vmem %s157_s0, 16384  ;;  %p4546_p5 = scmp.lt.s32.totalorder %s157_s0, %s157_s0 }
  0x92   :  { %p4542_p4 = scmp.ne.s32.totalorder %s157_s0, %s4541_s8  ;;  %p4547_p6 = scmp.lt.s32.totalorder %s4541_s8, %s4541_s8 }
  0x94   :  { %p4548_p7 = por %p4547_p6, %p4546_p5 }
  0x96   :  { %p4549_p8 = pnand %p4548_p7, %p4542_p4 }
  0x98   :  { %4552 = shalt.err (!%p4549_p8)
}
  0x99   :  { %162 = dma.hbm_to_vmem [thread:$0]  %s5746_s13, 16384, %s157_s0, [#allocation18], %s4645_s12, %s4645_s12, %s4646_s23  }
  0x9a   :  { %s4652_s14 = smov [#allocation22]   ;;  %s4653_s3 = smov [#allocation25]  }
  0x9b   :  { %s180_s26 = sshll.u32 %s4652_s14, 4  ;;  %s205_s11 = sshll.u32 %s4653_s3, 4  ;;  %s181_s26 = int_to_ptr.vmem [resolvable:$true] %s180_s26  ;;  %s206_s11 = int_to_ptr.vmem [resolvable:$true] %s205_s11 }
  0x9c   :  { %s4561_s30 = scalar_lea.vmem %s181_s26, 384  ;;  %p4566_p10 = scmp.lt.s32.totalorder %s181_s26, %s181_s26 }
  0x9d   :  { %p4562_p9 = scmp.ne.s32.totalorder %s181_s26, %s4561_s30  ;;  %p4567_p11 = scmp.lt.s32.totalorder %s4561_s30, %s4561_s30 }
  0x9f   :  { %p4568_p12 = por %p4567_p11, %p4566_p10 }
  0xa1   :  { %p4569_p13 = pnand %p4568_p12, %p4562_p9 }
  0xa3   :  { %4572 = shalt.err (!%p4569_p13)
}
  0xa4   :  { %186 = dma.hbm_to_vmem [thread:$0]  %s5749_s16, 384, %s181_s26, [#allocation21], %s4648_s7, %s4648_s7, %s4649_s2  }
  0xa5   :  { %s4581_s13 = scalar_lea.vmem %s206_s11, 16  ;;  %s4585_s12 = scalar_lea.vmem %s206_s11, 32 }
  0xa6   :  { %p4582_p0 = scmp.ne.s32.totalorder %s206_s11, %s4581_s13  ;;  %p4586_p1 = scmp.lt.s32.totalorder %s206_s11, %s206_s11 }
  0xa7   :  { %p4587_p2 = scmp.lt.s32.totalorder %s4585_s12, %s4581_s13 }
  0xa9   :  { %p4588_p3 = por %p4587_p2, %p4586_p1 }
  0xab   :  { %p4589_p4 = pnand %p4588_p3, %p4582_p0 }
  0xad   :  { %4592 = shalt.err (!%p4589_p4)
}
  0xae   :  { %208 = dma.hbm_to_vmem [thread:$0]  %s5752_s19, 16, %s206_s11, [#allocation24]  }
  0xaf   :  { %4613 = dma.done.wait [#allocation3], 128  }
  0xb0   :  { %4614 = vsyncadd [#allocation3], 4294967168 }
  0xb1   :  { %4615 = dma.done.wait [#allocation6], 3200  }
  0xb2   :  { %4616 = vsyncadd [#allocation6], 4294964096 }
  0xb3   :  { %4617 = dma.done.wait [#allocation9], 17152  }
  0xb4   :  { %4618 = vsyncadd [#allocation9], 4294950144 }
  0xb5   :  { %4619 = dma.done.wait [#allocation12], 4128  }
  0xb6   :  { %4620 = vsyncadd [#allocation12], 4294963168 }
  0xb7   :  { %4621 = dma.done.wait [#allocation15], 57872  }
  0xb8   :  { %4622 = vsyncadd [#allocation15], 4294909424 }
  0xb9   :  { %4623 = dma.done.wait [#allocation18], 16448  }
  0xba   :  { %4624 = vsyncadd [#allocation18], 4294950848 }
  0xbb   :  { %4625 = dma.done.wait [#allocation21], 416  }
  0xbc   :  { %4626 = vsyncadd [#allocation21], 4294966880 }
  0xbd   :  { %4627 = dma.done.wait [#allocation24], 32  }
  0xbe   :  { %4628 = vsyncadd [#allocation24], 4294967264  ;;  %v4654_v0 = vmov 0.0   ;;  %vm286_vm0 = vcmask 1041408   ;;  %v267_v1 = vld [vmem:[#allocation7 + $0x48] sm:$0xff]  ;;  %v266_v2 = vld [vmem:[#allocation7 + $0x40] sm:$0xff] }
  0xbf   :  { %363 = vmatprep.mubr.f32.mxu1 %v4654_v0  ;;  %v259_v3 = vld [vmem:[#allocation7 + $0x8] sm:$0xff]  ;;  %3751 = vmatprep.subr.msk.mxu1 %vm286_vm0, %v267_v1  ;;  %v258_v4 = vld [vmem:[#allocation7] sm:$0xff]  ;;  %v256_v5 = vld [vmem:[#allocation2] sm:$0xff]  ;;  %vm282_vm1 = vcmask 80896   ;;  %vm604_vm2 = vcmask 1043456   ;;  %vm600_vm5 = vcmask 949248  }
  0xc0   :  { %3752 = vmatpush1.msk.msra.mxu1 %vm286_vm0, %v266_v2  ;;  %v257_v6 = vcvt.s32.f32 %v256_v5  ;;  %v269_v7 = vld [vmem:[#allocation7 + $0x58] sm:$0xff]  ;;  %v268_v8 = vld [vmem:[#allocation7 + $0x50] sm:$0xff]  ;;  %v491_v13 = vld [vmem:[#allocation10 + $0xe8] sm:$0xff]  ;;  %vm4656_vm8 = vmmov 0   ;;  %vm951_vm9 = vcmask 64512   ;;  %s5766_s4 = sld [smem:[#allocation41_spill]] }
  0xc1   :  { %329 = vmatprep.subr.mxu1 %v259_v3  ;;  %v493_v9 = vld [vmem:[#allocation10 + $0xf8] sm:$0xff]  ;;  %v492_v11 = vld [vmem:[#allocation10 + $0xf0] sm:$0xff]  ;;  %v490_v14 = vld [vmem:[#allocation10 + $0xe0] sm:$0xff]  ;;  %vm1183_vm10 = vcmask 146432   ;;  %s5781_s30 = sld [smem:[#allocation38_spill]]  ;;  %s4659_s23 = smov 10  }
  0xc2   :  { %330 = vmatpush1.msra.mxu1 %v258_v4  ;;  %v261_v10 = vld [vmem:[#allocation7 + $0x18] sm:$0xff]  ;;  %611 = vmatprep.subr.mxu0 %v493_v9  ;;  %v260_v12 = vld [vmem:[#allocation7 + $0x10] sm:$0xff]  ;;  %v487_v19 = vld [vmem:[#allocation10 + $0xc8] sm:$0xff] }
  0xc3   :  { %3753 = vmatmul.mubr.msk.f32.vlgmr.msra.gmra.mxu1 %vm282_vm1, %v257_v6  ;;  %3754 = vmatprep.subr.msk.mxu1 %vm286_vm0, %v269_v7  ;;  %v489_v15 = vld [vmem:[#allocation10 + $0xd8] sm:$0xff]  ;;  %v488_v17 = vld [vmem:[#allocation10 + $0xd0] sm:$0xff]  ;;  %v555_v20 = vld [vmem:[#allocation10 + $0x2e8] sm:$0xff] }
  0xc4   :  { %3755 = vmatpush1.msk.msra.mxu1 %vm286_vm0, %v268_v8  ;;  %434 = vmatprep.mubr.f32.mxu1 %v4654_v0  ;;  %v557_v16 = vld [vmem:[#allocation10 + $0x2f8] sm:$0xff]  ;;  %v556_v18 = vld [vmem:[#allocation10 + $0x2f0] sm:$0xff]  ;;  %v486_v21 = vld [vmem:[#allocation10 + $0xc0] sm:$0xff] }
  0xc5   :  { %400 = vmatprep.subr.mxu1 %v261_v10  ;;  %612 = vmatpush1.msra.mxu0 %v492_v11  ;;  %v554_v22 = vld [vmem:[#allocation10 + $0x2e0] sm:$0xff]  ;;  %v485_v23 = vld [vmem:[#allocation10 + $0xb8] sm:$0xff]  ;;  %v484_v25 = vld [vmem:[#allocation10 + $0xb0] sm:$0xff] }
  0xc6   :  { %401 = vmatpush1.msra.mxu1 %v260_v12  ;;  %613 = vmatprep.subr.mxu0 %v491_v13  ;;  %v553_v24 = vld [vmem:[#allocation10 + $0x2d8] sm:$0xff]  ;;  %v552_v26 = vld [vmem:[#allocation10 + $0x2d0] sm:$0xff]  ;;  %v483_v27 = vld [vmem:[#allocation10 + $0xa8] sm:$0xff] }
  0xc7   :  { %3756 = vmatmul.mubr.msk.f32.vlgmr.msra.gmra.mxu1 %vm282_vm1, %v257_v6  ;;  %614 = vmatpush1.msra.mxu0 %v490_v14  ;;  %v551_v28 = vld [vmem:[#allocation10 + $0x2c8] sm:$0xff]  ;;  %v482_v29 = vld [vmem:[#allocation10 + $0xa0] sm:$0xff]  ;;  %v481_v31 = vld [vmem:[#allocation10 + $0x98] sm:$0xff] }
  0xc8   :  { %615 = vmatprep.subr.mxu0 %v489_v15  ;;  %682 = vmatprep.subr.mxu1 %v557_v16  ;;  %v550_v30 = vld [vmem:[#allocation10 + $0x2c0] sm:$0xff]  ;;  %v549_v32 = vld [vmem:[#allocation10 + $0x2b8] sm:$0xff]  ;;  %v480_v33 = vld [vmem:[#allocation10 + $0x90] sm:$0xff] }
  0xc9   :  { %616 = vmatpush1.msra.mxu0 %v488_v17  ;;  %683 = vmatpush1.msra.mxu1 %v556_v18  ;;  %v548_v34 = vld [vmem:[#allocation10 + $0x2b0] sm:$0xff]  ;;  %v479_v35 = vld [vmem:[#allocation10 + $0x88] sm:$0xff]  ;;  %v478_v37 = vld [vmem:[#allocation10 + $0x80] sm:$0xff] }
  0xca   :  { %617 = vmatprep.subr.mxu0 %v487_v19  ;;  %684 = vmatprep.subr.mxu1 %v555_v20  ;;  %v547_v36 = vld [vmem:[#allocation10 + $0x2a8] sm:$0xff]  ;;  %v546_v38 = vld [vmem:[#allocation10 + $0x2a0] sm:$0xff]  ;;  %v477_v39 = vld [vmem:[#allocation10 + $0x78] sm:$0xff] }
  0xcb   :  { %618 = vmatpush1.msra.mxu0 %v486_v21  ;;  %685 = vmatpush1.msra.mxu1 %v554_v22  ;;  %v545_v40 = vld [vmem:[#allocation10 + $0x298] sm:$0xff]  ;;  %v476_v41 = vld [vmem:[#allocation10 + $0x70] sm:$0xff]  ;;  %v475_v43 = vld [vmem:[#allocation10 + $0x68] sm:$0xff] }
  0xcc   :  { %619 = vmatprep.subr.mxu0 %v485_v23  ;;  %686 = vmatprep.subr.mxu1 %v553_v24  ;;  %v544_v42 = vld [vmem:[#allocation10 + $0x290] sm:$0xff]  ;;  %v543_v44 = vld [vmem:[#allocation10 + $0x288] sm:$0xff]  ;;  %v474_v45 = vld [vmem:[#allocation10 + $0x60] sm:$0xff] }
  0xcd   :  { %620 = vmatpush1.msra.mxu0 %v484_v25  ;;  %687 = vmatpush1.msra.mxu1 %v552_v26  ;;  %v542_v46 = vld [vmem:[#allocation10 + $0x280] sm:$0xff]  ;;  %v473_v47 = vld [vmem:[#allocation10 + $0x58] sm:$0xff]  ;;  %v472_v49 = vld [vmem:[#allocation10 + $0x50] sm:$0xff] }
  0xce   :  { %621 = vmatprep.subr.mxu0 %v483_v27  ;;  %688 = vmatprep.subr.mxu1 %v551_v28  ;;  %v541_v48 = vld [vmem:[#allocation10 + $0x278] sm:$0xff]  ;;  %v540_v50 = vld [vmem:[#allocation10 + $0x270] sm:$0xff]  ;;  %v471_v51 = vld [vmem:[#allocation10 + $0x48] sm:$0xff] }
  0xcf   :  { %622 = vmatpush1.msra.mxu0 %v482_v29  ;;  %689 = vmatpush1.msra.mxu1 %v550_v30  ;;  %v539_v52 = vld [vmem:[#allocation10 + $0x268] sm:$0xff]  ;;  %v470_v53 = vld [vmem:[#allocation10 + $0x40] sm:$0xff]  ;;  %v469_v55 = vld [vmem:[#allocation10 + $0x38] sm:$0xff] }
  0xd0   :  { %623 = vmatprep.subr.mxu0 %v481_v31  ;;  %690 = vmatprep.subr.mxu1 %v549_v32  ;;  %v538_v54 = vld [vmem:[#allocation10 + $0x260] sm:$0xff]  ;;  %v537_v56 = vld [vmem:[#allocation10 + $0x258] sm:$0xff]  ;;  %v468_v57 = vld [vmem:[#allocation10 + $0x30] sm:$0xff] }
  0xd1   :  { %624 = vmatpush1.msra.mxu0 %v480_v33  ;;  %691 = vmatpush1.msra.mxu1 %v548_v34  ;;  %v536_v58 = vld [vmem:[#allocation10 + $0x250] sm:$0xff]  ;;  %v467_v59 = vld [vmem:[#allocation10 + $0x28] sm:$0xff]  ;;  %v466_v61 = vld [vmem:[#allocation10 + $0x20] sm:$0xff] }
  0xd2   :  { %625 = vmatprep.subr.mxu0 %v479_v35  ;;  %692 = vmatprep.subr.mxu1 %v547_v36  ;;  %v535_v60 = vld [vmem:[#allocation10 + $0x248] sm:$0xff]  ;;  %v534_v62 = vld [vmem:[#allocation10 + $0x240] sm:$0xff]  ;;  %v465_v63 = vld [vmem:[#allocation10 + $0x18] sm:$0xff] }
  0xd3   :  { %626 = vmatpush1.msra.mxu0 %v478_v37  ;;  %693 = vmatpush1.msra.mxu1 %v546_v38  ;;  %v533_v1 = vld [vmem:[#allocation10 + $0x238] sm:$0xff]  ;;  %v464_v2 = vld [vmem:[#allocation10 + $0x10] sm:$0xff]  ;;  %v463_v4 = vld [vmem:[#allocation10 + $0x8] sm:$0xff] }
  0xd4   :  { %627 = vmatprep.subr.mxu0 %v477_v39  ;;  %694 = vmatprep.subr.mxu1 %v545_v40  ;;  %v532_v3 = vld [vmem:[#allocation10 + $0x230] sm:$0xff]  ;;  %v531_v5 = vld [vmem:[#allocation10 + $0x228] sm:$0xff]  ;;  %v462_v6 = vld [vmem:[#allocation10] sm:$0xff] }
  0xd5   :  { %628 = vmatpush1.msra.mxu0 %v476_v41  ;;  %695 = vmatpush1.msra.mxu1 %v544_v42  ;;  %v530_v7 = vld [vmem:[#allocation10 + $0x220] sm:$0xff]  ;;  %v525_v8 = vld [vmem:[#allocation10 + $0x1f8] sm:$0xff]  ;;  %v524_v10 = vld [vmem:[#allocation10 + $0x1f0] sm:$0xff] }
  0xd6   :  { %629 = vmatprep.subr.mxu0 %v475_v43  ;;  %696 = vmatprep.subr.mxu1 %v543_v44  ;;  %v529_v9 = vld [vmem:[#allocation10 + $0x218] sm:$0xff]  ;;  %v528_v11 = vld [vmem:[#allocation10 + $0x210] sm:$0xff]  ;;  %v523_v12 = vld [vmem:[#allocation10 + $0x1e8] sm:$0xff] }
  0xd7   :  { %630 = vmatpush1.msra.mxu0 %v474_v45  ;;  %697 = vmatpush1.msra.mxu1 %v542_v46  ;;  %v527_v13 = vld [vmem:[#allocation10 + $0x208] sm:$0xff]  ;;  %v522_v14 = vld [vmem:[#allocation10 + $0x1e0] sm:$0xff]  ;;  %v521_v16 = vld [vmem:[#allocation10 + $0x1d8] sm:$0xff] }
  0xd8   :  { %631 = vmatprep.subr.mxu0 %v473_v47  ;;  %698 = vmatprep.subr.mxu1 %v541_v48  ;;  %v526_v15 = vld [vmem:[#allocation10 + $0x200] sm:$0xff]  ;;  %v587_v17 = vld [vmem:[#allocation10 + $0x3e8] sm:$0xf]  ;;  %v520_v18 = vld [vmem:[#allocation10 + $0x1d0] sm:$0xff] }
  0xd9   :  { %632 = vmatpush1.msra.mxu0 %v472_v49  ;;  %699 = vmatpush1.msra.mxu1 %v540_v50  ;;  %v586_v19 = vld [vmem:[#allocation10 + $0x3e0] sm:$0xf]  ;;  %v519_v20 = vld [vmem:[#allocation10 + $0x1c8] sm:$0xff]  ;;  %v585_v21 = vld [vmem:[#allocation10 + $0x3d8] sm:$0xff] }
  0xda   :  { %633 = vmatprep.subr.mxu0 %v471_v51  ;;  %700 = vmatprep.subr.mxu1 %v539_v52  ;;  %v518_v22 = vld [vmem:[#allocation10 + $0x1c0] sm:$0xff]  ;;  %v584_v23 = vld [vmem:[#allocation10 + $0x3d0] sm:$0xff]  ;;  %v517_v24 = vld [vmem:[#allocation10 + $0x1b8] sm:$0xff] }
  0xdb   :  { %634 = vmatpush1.msra.mxu0 %v470_v53  ;;  %701 = vmatpush1.msra.mxu1 %v538_v54  ;;  %v583_v25 = vld [vmem:[#allocation10 + $0x3c8] sm:$0xff]  ;;  %v516_v26 = vld [vmem:[#allocation10 + $0x1b0] sm:$0xff]  ;;  %v582_v27 = vld [vmem:[#allocation10 + $0x3c0] sm:$0xff] }
  0xdc   :  { %635 = vmatprep.subr.mxu0 %v469_v55  ;;  %702 = vmatprep.subr.mxu1 %v537_v56  ;;  %v515_v28 = vld [vmem:[#allocation10 + $0x1a8] sm:$0xff]  ;;  %v581_v29 = vld [vmem:[#allocation10 + $0x3b8] sm:$0xff]  ;;  %v514_v30 = vld [vmem:[#allocation10 + $0x1a0] sm:$0xff] }
  0xdd   :  { %636 = vmatpush1.msra.mxu0 %v468_v57  ;;  %703 = vmatpush1.msra.mxu1 %v536_v58  ;;  %v580_v31 = vld [vmem:[#allocation10 + $0x3b0] sm:$0xff]  ;;  %v513_v32 = vld [vmem:[#allocation10 + $0x198] sm:$0xff]  ;;  %v579_v33 = vld [vmem:[#allocation10 + $0x3a8] sm:$0xff] }
  0xde   :  { %637 = vmatprep.subr.mxu0 %v467_v59  ;;  %704 = vmatprep.subr.mxu1 %v535_v60  ;;  %v512_v34 = vld [vmem:[#allocation10 + $0x190] sm:$0xff]  ;;  %v578_v35 = vld [vmem:[#allocation10 + $0x3a0] sm:$0xff]  ;;  %v511_v36 = vld [vmem:[#allocation10 + $0x188] sm:$0xff] }
  0xdf   :  { %638 = vmatpush1.msra.mxu0 %v466_v61  ;;  %705 = vmatpush1.msra.mxu1 %v534_v62  ;;  %v577_v37 = vld [vmem:[#allocation10 + $0x398] sm:$0xff]  ;;  %v510_v38 = vld [vmem:[#allocation10 + $0x180] sm:$0xff]  ;;  %v576_v39 = vld [vmem:[#allocation10 + $0x390] sm:$0xff] }
  0xe0   :  { %639 = vmatprep.subr.mxu0 %v465_v63  ;;  %706 = vmatprep.subr.mxu1 %v533_v1  ;;  %v509_v40 = vld [vmem:[#allocation10 + $0x178] sm:$0xff]  ;;  %v575_v41 = vld [vmem:[#allocation10 + $0x388] sm:$0xff]  ;;  %v508_v42 = vld [vmem:[#allocation10 + $0x170] sm:$0xff] }
  0xe1   :  { %640 = vmatpush1.msra.mxu0 %v464_v2  ;;  %707 = vmatpush1.msra.mxu1 %v532_v3  ;;  %v574_v43 = vld [vmem:[#allocation10 + $0x380] sm:$0xff]  ;;  %v507_v44 = vld [vmem:[#allocation10 + $0x168] sm:$0xff]  ;;  %v573_v45 = vld [vmem:[#allocation10 + $0x378] sm:$0xff] }
  0xe2   :  { %641 = vmatprep.subr.mxu0 %v463_v4  ;;  %708 = vmatprep.subr.mxu1 %v531_v5  ;;  %v506_v46 = vld [vmem:[#allocation10 + $0x160] sm:$0xff]  ;;  %v572_v47 = vld [vmem:[#allocation10 + $0x370] sm:$0xff]  ;;  %v505_v48 = vld [vmem:[#allocation10 + $0x158] sm:$0xff] }
  0xe3   :  { %642 = vmatpush1.msra.mxu0 %v462_v6  ;;  %709 = vmatpush1.msra.mxu1 %v530_v7  ;;  %v571_v49 = vld [vmem:[#allocation10 + $0x368] sm:$0xff]  ;;  %v504_v50 = vld [vmem:[#allocation10 + $0x150] sm:$0xff]  ;;  %v570_v51 = vld [vmem:[#allocation10 + $0x360] sm:$0xff] }
  0xe4   :  { %643 = vmatprep.subr.mxu0 %v525_v8  ;;  %710 = vmatprep.subr.mxu1 %v529_v9  ;;  %v503_v52 = vld [vmem:[#allocation10 + $0x148] sm:$0xff]  ;;  %v569_v53 = vld [vmem:[#allocation10 + $0x358] sm:$0xff]  ;;  %v502_v54 = vld [vmem:[#allocation10 + $0x140] sm:$0xff] }
  0xe5   :  { %644 = vmatpush2.msra.mxu0 %v524_v10  ;;  %711 = vmatpush1.msra.mxu1 %v528_v11  ;;  %v568_v55 = vld [vmem:[#allocation10 + $0x350] sm:$0xff]  ;;  %v501_v56 = vld [vmem:[#allocation10 + $0x138] sm:$0xff]  ;;  %v499_v58 = vld [vmem:[#allocation10 + $0x128] sm:$0xff] }
  0xe6   :  { %645 = vmatprep.subr.mxu0 %v523_v12  ;;  %712 = vmatprep.subr.mxu1 %v527_v13  ;;  %v500_v57 = vld [vmem:[#allocation10 + $0x130] sm:$0xff]  ;;  %v498_v59 = vld [vmem:[#allocation10 + $0x120] sm:$0xff]  ;;  %v567_v60 = vld [vmem:[#allocation10 + $0x348] sm:$0xff]  ;;  %v441_v12 = vlaneseq }
  0xe7   :  { %646 = vmatpush2.msra.mxu0 %v522_v14  ;;  %713 = vmatpush1.msra.mxu1 %v526_v15  ;;  %v497_v61 = vld [vmem:[#allocation10 + $0x118] sm:$0xff]  ;;  %v566_v62 = vld [vmem:[#allocation10 + $0x340] sm:$0xff]  ;;  %v496_v63 = vld [vmem:[#allocation10 + $0x110] sm:$0xff] }
  0xe8   :  { %647 = vmatprep.subr.mxu0 %v521_v16  ;;  %3763 = vmatprep.subr.msk.mxu1 %vm604_vm2, %v587_v17  ;;  %v565_v1 = vld [vmem:[#allocation10 + $0x338] sm:$0xff]  ;;  %v495_v2 = vld [vmem:[#allocation10 + $0x108] sm:$0xff]  ;;  %v564_v3 = vld [vmem:[#allocation10 + $0x330] sm:$0xff]  ;;  %v4847_v13 = vand.u32 127, %v441_v12 }
  0xe9   :  { %648 = vmatpush2.msra.mxu0 %v520_v18  ;;  %3764 = vmatpush2.msk.msra.mxu1 %vm604_vm2, %v586_v19  ;;  %v494_v4 = vld [vmem:[#allocation10 + $0x100] sm:$0xff]  ;;  %v563_v5 = vld [vmem:[#allocation10 + $0x328] sm:$0xff]  ;;  %v561_v7 = vld [vmem:[#allocation10 + $0x318] sm:$0xff] }
  0xea   :  { %649 = vmatprep.subr.mxu0 %v519_v20  ;;  %718 = vmatprep.subr.mxu1 %v585_v21  ;;  %v562_v6 = vld [vmem:[#allocation10 + $0x320] sm:$0xff]  ;;  %v560_v8 = vld [vmem:[#allocation10 + $0x310] sm:$0xff]  ;;  %v559_v9 = vld [vmem:[#allocation10 + $0x308] sm:$0xff]  ;;  %v4850_v14 = vadd.s32 128, %v4847_v13  ;;  %v4854_v16 = vadd.s32 384, %v4847_v13  ;;  %v446_v18 = vcvt.s32.f32 %v4847_v13  ;;  %v4858_v19 = vadd.s32 256, %v4847_v13 }
  0xeb   :  { %650 = vmatpush2.msra.mxu0 %v518_v22  ;;  %719 = vmatpush2.msra.mxu1 %v584_v23  ;;  %v558_v10 = vld [vmem:[#allocation10 + $0x300] sm:$0xff]  ;;  %v786_v11 = vld [vmem:[#allocation13 + $0xf8] sm:$0xff]  ;;  %v4655_v23 = vmov 1.0  }
  0xec   :  { %651 = vmatprep.subr.mxu0 %v517_v24  ;;  %720 = vmatprep.subr.mxu1 %v583_v25  ;;  %v447_v15 = vcvt.s32.f32 %v4850_v14  ;;  %v449_v21 = vcvt.s32.f32 %v4854_v16  ;;  %v448_v24 = vcvt.s32.f32 %v4858_v19  ;;  %v1839_v14 = vld [vmem:[#allocation16 + $0x9c0] sm:$0xff]  ;;  %v1962_v16 = vld [vmem:[#allocation16 + $0xd98] sm:$0xff] }
  0xed   :  { %652 = vmatpush2.msra.mxu0 %v516_v26  ;;  %721 = vmatpush2.msra.mxu1 %v582_v27  ;;  %v770_v27 = vld [vmem:[#allocation13 + $0x78] sm:$0xff] }
  0xee   :  { %653 = vmatprep.subr.mxu0 %v515_v28  ;;  %722 = vmatprep.subr.mxu1 %v581_v29  ;;  %v785_v28 = vld [vmem:[#allocation13 + $0xf0] sm:$0xff]  ;;  %v1830_v19 = vld [vmem:[#allocation16 + $0x978] sm:$0xff] }
  0xef   :  { %654 = vmatpush2.msra.mxu0 %v514_v30  ;;  %723 = vmatpush2.msra.mxu1 %v580_v31  ;;  %v769_v29 = vld [vmem:[#allocation13 + $0x70] sm:$0xff]  ;;  %v784_v30 = vld [vmem:[#allocation13 + $0xe8] sm:$0xff] }
  0xf0   :  { %655 = vmatprep.subr.mxu0 %v513_v32  ;;  %724 = vmatprep.subr.mxu1 %v579_v33  ;;  %v768_v31 = vld [vmem:[#allocation13 + $0x68] sm:$0xff]  ;;  %v783_v32 = vld [vmem:[#allocation13 + $0xe0] sm:$0xff] }
  0xf1   :  { %656 = vmatpush2.msra.mxu0 %v512_v34  ;;  %725 = vmatpush2.msra.mxu1 %v578_v35  ;;  %v767_v33 = vld [vmem:[#allocation13 + $0x60] sm:$0xff]  ;;  %v782_v34 = vld [vmem:[#allocation13 + $0xd8] sm:$0xff] }
  0xf2   :  { %657 = vmatprep.subr.mxu0 %v511_v36  ;;  %726 = vmatprep.subr.mxu1 %v577_v37  ;;  %v766_v35 = vld [vmem:[#allocation13 + $0x58] sm:$0xff]  ;;  %v781_v36 = vld [vmem:[#allocation13 + $0xd0] sm:$0xff] }
  0xf3   :  { %658 = vmatpush2.msra.mxu0 %v510_v38  ;;  %727 = vmatpush2.msra.mxu1 %v576_v39  ;;  %v765_v37 = vld [vmem:[#allocation13 + $0x50] sm:$0xff]  ;;  %v780_v38 = vld [vmem:[#allocation13 + $0xc8] sm:$0xff] }
  0xf4   :  { %659 = vmatprep.subr.mxu0 %v509_v40  ;;  %728 = vmatprep.subr.mxu1 %v575_v41  ;;  %v764_v39 = vld [vmem:[#allocation13 + $0x48] sm:$0xff]  ;;  %v779_v40 = vld [vmem:[#allocation13 + $0xc0] sm:$0xff] }
  0xf5   :  { %660 = vmatpush2.msra.mxu0 %v508_v42  ;;  %729 = vmatpush2.msra.mxu1 %v574_v43  ;;  %v763_v41 = vld [vmem:[#allocation13 + $0x40] sm:$0xff]  ;;  %v778_v42 = vld [vmem:[#allocation13 + $0xb8] sm:$0xff] }
  0xf6   :  { %661 = vmatprep.subr.mxu0 %v507_v44  ;;  %730 = vmatprep.subr.mxu1 %v573_v45  ;;  %v762_v43 = vld [vmem:[#allocation13 + $0x38] sm:$0xff]  ;;  %v777_v44 = vld [vmem:[#allocation13 + $0xb0] sm:$0xff] }
  0xf7   :  { %662 = vmatpush2.msra.mxu0 %v506_v46  ;;  %731 = vmatpush2.msra.mxu1 %v572_v47  ;;  %v761_v45 = vld [vmem:[#allocation13 + $0x30] sm:$0xff]  ;;  %v776_v46 = vld [vmem:[#allocation13 + $0xa8] sm:$0xff] }
  0xf8   :  { %663 = vmatprep.subr.mxu0 %v505_v48  ;;  %732 = vmatprep.subr.mxu1 %v571_v49  ;;  %v760_v47 = vld [vmem:[#allocation13 + $0x28] sm:$0xff]  ;;  %v775_v48 = vld [vmem:[#allocation13 + $0xa0] sm:$0xff] }
  0xf9   :  { %664 = vmatpush2.msra.mxu0 %v504_v50  ;;  %733 = vmatpush2.msra.mxu1 %v570_v51  ;;  %v759_v49 = vld [vmem:[#allocation13 + $0x20] sm:$0xff]  ;;  %v774_v50 = vld [vmem:[#allocation13 + $0x98] sm:$0xff] }
  0xfa   :  { %665 = vmatprep.subr.mxu0 %v503_v52  ;;  %734 = vmatprep.subr.mxu1 %v569_v53  ;;  %v758_v51 = vld [vmem:[#allocation13 + $0x18] sm:$0xff]  ;;  %v773_v52 = vld [vmem:[#allocation13 + $0x90] sm:$0xff] }
  0xfb   :  { %666 = vmatpush2.msra.mxu0 %v502_v54  ;;  %735 = vmatpush2.msra.mxu1 %v568_v55  ;;  %v757_v53 = vld [vmem:[#allocation13 + $0x10] sm:$0xff]  ;;  %v772_v54 = vld [vmem:[#allocation13 + $0x88] sm:$0xff] }
  0xfc   :  { %667 = vmatprep.subr.mxu0 %v501_v56  ;;  %736 = vmatprep.subr.mxu1 %v567_v60  ;;  %v756_v55 = vld [vmem:[#allocation13 + $0x8] sm:$0xff]  ;;  %v771_v56 = vld [vmem:[#allocation13 + $0x80] sm:$0xff] }
  0xfd   :  { %668 = vmatpush2.msra.mxu0 %v500_v57  ;;  %737 = vmatpush2.msra.mxu1 %v566_v62  ;;  %v755_v57 = vld [vmem:[#allocation13] sm:$0xff]  ;;  %v876_v62 = vld [vmem:[%s5743_s10 + $0x58] sm:$0xff] }
  0xfe   :  { %669 = vmatprep.subr.mxu0 %v499_v58  ;;  %738 = vmatprep.subr.mxu1 %v565_v1  ;;  %v880_v58 = vld [vmem:[%s5743_s10 + $0x78] sm:$0xff]  ;;  %v878_v60 = vld [vmem:[%s5743_s10 + $0x68] sm:$0xff] }
  0xff   :  { %670 = vmatpush2.msra.mxu0 %v498_v59  ;;  %739 = vmatpush2.msra.mxu1 %v564_v3  ;;  %v879_v59 = vld [vmem:[%s5743_s10 + $0x70] sm:$0xff] }
 0x100   :  { %671 = vmatprep.subr.mxu0 %v497_v61  ;;  %740 = vmatprep.subr.mxu1 %v563_v5  ;;  %v877_v61 = vld [vmem:[%s5743_s10 + $0x60] sm:$0xff] }
 0x101   :  { %672 = vmatpush2.msra.mxu0 %v496_v63  ;;  %741 = vmatpush2.msra.mxu1 %v562_v6  ;;  %v4895_v63 = vshrl.u32 %v441_v12, 7 }
 0x102   :  { %673 = vmatprep.subr.mxu0 %v495_v2  ;;  %742 = vmatprep.subr.mxu1 %v561_v7  ;;  %v588_v2 = vld [vmem:[#allocation11] sm:$0x3] }
 0x103   :  { %674 = vmatpush2.msra.mxu0 %v494_v4  ;;  %743 = vmatpush2.msra.mxu1 %v560_v8  ;;  %v4898_v1 = vsub.s32 0, %v4895_v63  ;;  %v4901_v3 = vsub.s32 1, %v4895_v63 }
 0x104   :  { %4061 = vmatprep.subr.mxu0 %v4654_v0  ;;  %744 = vmatprep.subr.mxu1 %v559_v9 }
 0x105   :  { %745 = vmatpush2.msra.mxu1 %v558_v10  ;;  %v593_v5 = vrot.slane %v588_v2, %v4898_v1  ;;  %v597_v6 = vrot.slane %v588_v2, %v4901_v3  ;;  %v997_v2 = vld [vmem:[%s5766_s4 + $0xd0] sm:$0xff] }
 0x106   :  { %3820 = vmatprep.subr.mxu1 %v786_v11 }
 0x183   :  { %v365_v17 = vpop.f32.mrf.mxu1 }
 0x184   :  { %vm450_vm4 = vcmp.eq.f32.partialorder %v365_v17, %v446_v18 }
 0x185   :  { %v367_v20 = vpop.f32.mrf.mxu1 }
 0x186   :  { %vm451_vm3 = vcmp.eq.f32.partialorder %v367_v20, %v447_v15 }
 0x187   :  { %v436_v22 = vpop.f32.mrf.mxu1  ;;  %3761 = vmatprep.mubr.msk.f32.mxu0 %vm451_vm3, %v4655_v23 }
 0x188   :  { %3762 = vmatmul.mubr.msk.f32.vlgmr.msra.gmra.mxu0 %vm450_vm4, %v4655_v23  ;;  %vm452_vm7 = vcmp.eq.f32.partialorder %v436_v22, %v448_v24  ;;  %vm2001_vm4 = vcmask 31744  }
 0x189   :  { %v438_v25 = vpop.f32.mrf.mxu1  ;;  %4062 = vmatpush3.msra.mxu0 %v880_v58  ;;  %4093 = vmatprep.mubr.msk.f32.mxu0 %vm4656_vm8, %v4654_v0  ;;  %v984_v58 = vld [vmem:[%s5766_s4 + $0x68] sm:$0xff] }
 0x18a   :  { %vm453_vm6 = vcmp.eq.f32.partialorder %v438_v25, %v449_v21  ;;  %4063 = vmatprep.subr.mxu0 %v4654_v0  ;;  %v875_v25 = vld [vmem:[%s5743_s10 + $0x50] sm:$0xff] }
 0x18b   :  { %v3760_v26 = vsel %vm453_vm6, 1.0, %v4654_v0  ;;  %4064 = vmatpush3.msra.mxu0 %v879_v59  ;;  %v999_v59 = vld [vmem:[%s5766_s4 + $0xe0] sm:$0xff]  ;;  %vm2975_vm6 = vcmask 130048  }
 0x18c   :  { %3765 = vmatprep.mubr.msk.f32.mxu1 %vm600_vm5, %v3760_v26  ;;  %4065 = vmatprep.subr.mxu0 %v4654_v0  ;;  %v874_v26 = vld [vmem:[%s5743_s10 + $0x48] sm:$0xff] }
 0x18d   :  { %3766 = vmatmul.mubr.msk.f32.vlgmr.msra.gmra.mxu1 %vm452_vm7, %v4655_v23  ;;  %4066 = vmatpush3.msra.mxu0 %v878_v60  ;;  %v983_v60 = vld [vmem:[%s5766_s4 + $0x60] sm:$0xff] }
 0x18e   :  { %3821 = vmatpush3.msra.mxu1 %v770_v27  ;;  %4067 = vmatprep.subr.mxu0 %v4654_v0  ;;  %v873_v27 = vld [vmem:[%s5743_s10 + $0x40] sm:$0xff] }
 0x18f   :  { %3822 = vmatprep.subr.mxu1 %v785_v28  ;;  %4068 = vmatpush3.msra.mxu0 %v877_v61  ;;  %v872_v28 = vld [vmem:[%s5743_s10 + $0x38] sm:$0xff] }
 0x190   :  { %3823 = vmatpush3.msra.mxu1 %v769_v29  ;;  %4069 = vmatprep.subr.mxu0 %v4654_v0  ;;  %v871_v29 = vld [vmem:[%s5743_s10 + $0x30] sm:$0xff]  ;;  %v998_v61 = vld [vmem:[%s5766_s4 + $0xd8] sm:$0xff] }
 0x191   :  { %3824 = vmatprep.subr.mxu1 %v784_v30  ;;  %4070 = vmatpush3.msra.mxu0 %v876_v62  ;;  %v870_v30 = vld [vmem:[%s5743_s10 + $0x28] sm:$0xff]  ;;  %v982_v62 = vld [vmem:[%s5766_s4 + $0x58] sm:$0xff] }
 0x192   :  { %3825 = vmatpush3.msra.mxu1 %v768_v31  ;;  %4071 = vmatprep.subr.mxu0 %v4654_v0  ;;  %v869_v31 = vld [vmem:[%s5743_s10 + $0x20] sm:$0xff] }
 0x193   :  { %3826 = vmatprep.subr.mxu1 %v783_v32  ;;  %4072 = vmatpush3.msra.mxu0 %v875_v25  ;;  %v868_v32 = vld [vmem:[%s5743_s10 + $0x18] sm:$0xff]  ;;  %v977_v25 = vld [vmem:[%s5766_s4 + $0x30] sm:$0xff] }
 0x194   :  { %3827 = vmatpush3.msra.mxu1 %v767_v33  ;;  %4073 = vmatprep.subr.mxu0 %v4654_v0  ;;  %v867_v33 = vld [vmem:[%s5743_s10 + $0x10] sm:$0xff] }
 0x195   :  { %3828 = vmatprep.subr.mxu1 %v782_v34  ;;  %4074 = vmatpush3.msra.mxu0 %v874_v26  ;;  %v866_v34 = vld [vmem:[%s5743_s10 + $0x8] sm:$0xff] }
 0x196   :  { %3829 = vmatpush3.msra.mxu1 %v766_v35  ;;  %4075 = vmatprep.subr.mxu0 %v4654_v0  ;;  %v865_v35 = vld [vmem:[%s5743_s10] sm:$0xff]  ;;  %v992_v26 = vld [vmem:[%s5766_s4 + $0xa8] sm:$0xff] }
 0x197   :  { %3830 = vmatprep.subr.mxu1 %v781_v36  ;;  %4076 = vmatpush3.msra.mxu0 %v873_v27  ;;  %v976_v27 = vld [vmem:[%s5766_s4 + $0x28] sm:$0xff] }
 0x198   :  { %3831 = vmatpush3.msra.mxu1 %v765_v37  ;;  %4077 = vmatprep.subr.mxu0 %v4654_v0  ;;  %v3767_v37 = vld [vmem:[#allocation14] ss:$0 sm:$0xff] }
 0x199   :  { %3832 = vmatprep.subr.mxu1 %v780_v38  ;;  %4078 = vmatpush3.msra.mxu0 %v872_v28  ;;  %v991_v28 = vld [vmem:[%s5766_s4 + $0xa0] sm:$0xff] }
 0x19a   :  { %3833 = vmatpush3.msra.mxu1 %v764_v39  ;;  %4079 = vmatprep.subr.mxu0 %v4654_v0 }
 0x19b   :  { %3834 = vmatprep.subr.mxu1 %v779_v40  ;;  %4080 = vmatpush3.msra.mxu0 %v871_v29  ;;  %v975_v29 = vld [vmem:[%s5766_s4 + $0x20] sm:$0xff] }
 0x19c   :  { %3835 = vmatpush3.msra.mxu1 %v763_v41  ;;  %4081 = vmatprep.subr.mxu0 %v4654_v0 }
 0x19d   :  { %3836 = vmatprep.subr.mxu1 %v778_v42  ;;  %4082 = vmatpush3.msra.mxu0 %v870_v30  ;;  %v990_v30 = vld [vmem:[%s5766_s4 + $0x98] sm:$0xff] }
 0x19e   :  { %3837 = vmatpush3.msra.mxu1 %v762_v43  ;;  %4083 = vmatprep.subr.mxu0 %v4654_v0 }
 0x19f   :  { %3838 = vmatprep.subr.mxu1 %v777_v44  ;;  %4084 = vmatpush3.msra.mxu0 %v869_v31  ;;  %v974_v31 = vld [vmem:[%s5766_s4 + $0x18] sm:$0xff] }
 0x1a0   :  { %3839 = vmatpush3.msra.mxu1 %v761_v45  ;;  %4085 = vmatprep.subr.mxu0 %v4654_v0 }
 0x1a1   :  { %3840 = vmatprep.subr.mxu1 %v776_v46  ;;  %4086 = vmatpush3.msra.mxu0 %v868_v32  ;;  %v989_v32 = vld [vmem:[%s5766_s4 + $0x90] sm:$0xff] }
 0x1a2   :  { %3841 = vmatpush3.msra.mxu1 %v760_v47  ;;  %4087 = vmatprep.subr.mxu0 %v4654_v0 }
 0x1a3   :  { %3842 = vmatprep.subr.mxu1 %v775_v48  ;;  %4088 = vmatpush3.msra.mxu0 %v867_v33 }
 0x1a4   :  { %3843 = vmatpush3.msra.mxu1 %v759_v49  ;;  %4089 = vmatprep.subr.mxu0 %v4654_v0 }
 0x1a5   :  { %3844 = vmatprep.subr.mxu1 %v774_v50  ;;  %4090 = vmatpush3.msra.mxu0 %v866_v34  ;;  %v964_v50 = vld [vmem:[#allocation8 + $0x8] sm:$0xff] }
 0x1a6   :  { %3845 = vmatpush3.msra.mxu1 %v758_v51  ;;  %4091 = vmatprep.subr.mxu0 %v4654_v0  ;;  %v963_v51 = vld [vmem:[#allocation8] sm:$0xff] }
 0x1a7   :  { %3846 = vmatprep.subr.mxu1 %v773_v52  ;;  %4092 = vmatpush3.msra.mxu0 %v865_v35  ;;  %v275_v52 = vld [vmem:[#allocation7 + $0x88] sm:$0x3] }
 0x1a8   :  { %3847 = vmatpush3.msra.mxu1 %v757_v53  ;;  %v1002_v53 = vld [vmem:[%s5766_s4 + $0xf8] sm:$0xff] }
 0x1a9   :  { %3848 = vmatprep.subr.mxu1 %v772_v54  ;;  %3872 = vmatprep.subr.mxu0 %v1002_v53  ;;  %v986_v54 = vld [vmem:[%s5766_s4 + $0x78] sm:$0xff] }
 0x1aa   :  { %3849 = vmatpush3.msra.mxu1 %v756_v55  ;;  %v1001_v55 = vld [vmem:[%s5766_s4 + $0xf0] sm:$0xff]  ;;  %v263_v53 = vld [vmem:[#allocation7 + $0x28] sm:$0xff] }
 0x1ab   :  { %3850 = vmatprep.subr.mxu1 %v771_v56  ;;  %v985_v56 = vld [vmem:[%s5766_s4 + $0x70] sm:$0xff] }
 0x1ac   :  { %3851 = vmatpush3.msra.mxu1 %v755_v57  ;;  %v1000_v57 = vld [vmem:[%s5766_s4 + $0xe8] sm:$0xff] }
 0x1ad   :  { %1068 = vmatprep.subr.mxu1 %v964_v50  ;;  %v4258_v50 = vld [vmem:[#allocation7 + $0x10] sm:$0xff] }
 0x248   :  { %v677_v4 = vpop.f32.mrf.mxu0 }
 0x249   :  { %v678_v8 = vadd.f32 %v677_v4, %v593_v5  ;;  %v981_v4 = vld [vmem:[%s5766_s4 + $0x50] sm:$0xff]  ;;  %v996_v5 = vld [vmem:[%s5766_s4 + $0xc8] sm:$0xff] }
 0x24a   :  { %v679_v7 = vpop.f32.mrf.mxu0 }
 0x24b   :  { %v680_v10 = vadd.f32 %v679_v7, %v597_v6  ;;  %v980_v6 = vld [vmem:[%s5766_s4 + $0x48] sm:$0xff]  ;;  %v995_v7 = vld [vmem:[%s5766_s4 + $0xc0] sm:$0xff] }
 0x24d   :  { %v748_v9 = vpop.f32.mrf.mxu1 }
 0x24e   :  { %v4905_v11 = vadd.f32 %v748_v9, %v678_v8  ;;  %v979_v8 = vld [vmem:[%s5766_s4 + $0x40] sm:$0xff]  ;;  %v994_v9 = vld [vmem:[%s5766_s4 + $0xb8] sm:$0xff] }
 0x24f   :  { %v750_v12 = vpop.f32.mrf.mxu1 }
 0x250   :  { %v4907_v17 = vadd.f32 %v750_v12, %v680_v10  ;;  %v753_v22 = vmax.f32 %v4905_v11, 0.0  ;;  %v978_v10 = vld [vmem:[%s5766_s4 + $0x38] sm:$0xff]  ;;  %v993_v12 = vld [vmem:[%s5766_s4 + $0xb0] sm:$0xff] }
 0x251   :  { %v1770_v11 = vld [vmem:[#allocation16 + $0x798] sm:$0xff] }
 0x252   :  { %v754_v20 = vmax.f32 %v4907_v17, 0.0  ;;  %v1707_v17 = vld [vmem:[#allocation16 + $0x5a0] sm:$0xff] }
 0x254   :  { %858 = vmatprep.mubr.f32.mxu1 %v754_v20 }
 0x255   :  { %859 = vmatmul.mubr.f32.vlgmr.msra.gmra.mxu1 %v753_v22 }
 0x256   :  { %1102 = vmatprep.mubr.f32.mxu1 %v4654_v0  ;;  %1069 = vmatpush1.msra.mxu1 %v963_v51  ;;  %v271_v51 = vld [vmem:[#allocation7 + $0x68] sm:$0xff] }
 0x257   :  { %3769 = vmatprep.subr.msk.mxu1 %vm286_vm0, %v275_v52  ;;  %v270_v52 = vld [vmem:[#allocation7 + $0x60] sm:$0xff] }
 0x315   :  { %v3852_v36 = vpop.f32.mrf.mxu1 }
 0x317   :  { %v3853_v38 = vpop.f32.mrf.mxu1 }
 0x318   :  { %v3854_v39 = vadd.f32 %v3853_v38, %v3852_v36  ;;  %v274_v36 = vld [vmem:[#allocation7 + $0x80] sm:$0x3]  ;;  %v4251_v38 = vld [vmem:[#allocation7 + $0x48] sm:$0xff] }
 0x31a   :  { %v861_v40 = vadd.f32 %v3854_v39, %v3767_v37  ;;  %v1181_v37 = vld [vmem:[#allocation5] sm:$0xff] }
 0x31b   :  { %v1182_v39 = vcvt.s32.f32 %v1181_v37  ;;  %v1543_v37 = vld [vmem:[#allocation16 + $0x80] sm:$0xff] }
 0x31c   :  { %4231 = vtanh.f32 %v861_v40  ;;  %v4252_v40 = vld [vmem:[#allocation7 + $0x40] sm:$0xff] }
 0x329   :  { %v4232_v41 = vpop.eup %4231 }
 0x32a   :  { %4094 = vmatmul.mubr.f32.vlgmr.msra.gmra.mxu0 %v4232_v41  ;;  %v277_v41 = vld [vmem:[#allocation7 + $0x98] sm:$0x3] }
 0x32b   :  { %3873 = vmatpush3.msra.mxu0 %v986_v54  ;;  %v262_v54 = vld [vmem:[#allocation7 + $0x20] sm:$0xff] }
 0x32c   :  { %3874 = vmatprep.subr.mxu0 %v1001_v55  ;;  %v281_v55 = vld [vmem:[#allocation7 + $0xb8] sm:$0x3] }
 0x32d   :  { %3875 = vmatpush3.msra.mxu0 %v985_v56  ;;  %v280_v56 = vld [vmem:[#allocation7 + $0xb0] sm:$0x3] }
 0x32e   :  { %3876 = vmatprep.subr.mxu0 %v1000_v57  ;;  %v273_v57 = vld [vmem:[#allocation7 + $0x78] sm:$0xff] }
 0x32f   :  { %3877 = vmatpush3.msra.mxu0 %v984_v58  ;;  %v272_v58 = vld [vmem:[#allocation7 + $0x70] sm:$0xff] }
 0x330   :  { %3878 = vmatprep.subr.mxu0 %v999_v59  ;;  %v265_v59 = vld [vmem:[#allocation7 + $0x38] sm:$0xff] }
 0x331   :  { %3879 = vmatpush3.msra.mxu0 %v983_v60  ;;  %v264_v60 = vld [vmem:[#allocation7 + $0x30] sm:$0xff] }
 0x332   :  { %3880 = vmatprep.subr.mxu0 %v998_v61  ;;  %v1588_v61 = vld [vmem:[#allocation16 + $0x1e8] sm:$0xff] }
 0x333   :  { %3881 = vmatpush3.msra.mxu0 %v982_v62  ;;  %v1587_v62 = vld [vmem:[#allocation16 + $0x1e0] sm:$0xff] }
 0x334   :  { %3882 = vmatprep.subr.mxu0 %v997_v2  ;;  %v1584_v2 = vld [vmem:[#allocation16 + $0x1c8] sm:$0xff] }
 0x335   :  { %3883 = vmatpush3.msra.mxu0 %v981_v4  ;;  %v1583_v4 = vld [vmem:[#allocation16 + $0x1c0] sm:$0xff] }
 0x336   :  { %3884 = vmatprep.subr.mxu0 %v996_v5  ;;  %v1580_v5 = vld [vmem:[#allocation16 + $0x1a8] sm:$0xff] }
 0x337   :  { %3885 = vmatpush3.msra.mxu0 %v980_v6  ;;  %v1579_v6 = vld [vmem:[#allocation16 + $0x1a0] sm:$0xff] }
 0x338   :  { %3886 = vmatprep.subr.mxu0 %v995_v7  ;;  %v1576_v7 = vld [vmem:[#allocation16 + $0x188] sm:$0xff] }
 0x339   :  { %3887 = vmatpush3.msra.mxu0 %v979_v8  ;;  %v1575_v8 = vld [vmem:[#allocation16 + $0x180] sm:$0xff] }
 0x33a   :  { %3888 = vmatprep.subr.mxu0 %v994_v9  ;;  %v1572_v9 = vld [vmem:[#allocation16 + $0x168] sm:$0xff] }
 0x33b   :  { %3889 = vmatpush3.msra.mxu0 %v978_v10  ;;  %v1571_v10 = vld [vmem:[#allocation16 + $0x160] sm:$0xff] }
 0x33c   :  { %3890 = vmatprep.subr.mxu0 %v993_v12  ;;  %v1568_v12 = vld [vmem:[#allocation16 + $0x148] sm:$0xff] }
 0x33d   :  { %3891 = vmatpush3.msra.mxu0 %v977_v25  ;;  %v1567_v25 = vld [vmem:[#allocation16 + $0x140] sm:$0xff] }
 0x33e   :  { %3892 = vmatprep.subr.mxu0 %v992_v26  ;;  %v1564_v26 = vld [vmem:[#allocation16 + $0x128] sm:$0xff] }
 0x33f   :  { %3893 = vmatpush3.msra.mxu0 %v976_v27  ;;  %v1563_v27 = vld [vmem:[#allocation16 + $0x120] sm:$0xff] }
 0x340   :  { %3894 = vmatprep.subr.mxu0 %v991_v28  ;;  %v1560_v28 = vld [vmem:[#allocation16 + $0x108] sm:$0xff] }
 0x341   :  { %3895 = vmatpush3.msra.mxu0 %v975_v29  ;;  %v1559_v29 = vld [vmem:[#allocation16 + $0x100] sm:$0xff] }
 0x342   :  { %3896 = vmatprep.subr.mxu0 %v990_v30  ;;  %v1556_v30 = vld [vmem:[#allocation16 + $0xe8] sm:$0xff] }
 0x343   :  { %3897 = vmatpush3.msra.mxu0 %v974_v31  ;;  %v1555_v31 = vld [vmem:[#allocation16 + $0xe0] sm:$0xff] }
 0x344   :  { %3898 = vmatprep.subr.mxu0 %v989_v32  ;;  %v1552_v32 = vld [vmem:[#allocation16 + $0xc8] sm:$0xff] }
 0x3ea   :  { %v947_v42 = vpop.f32.mrf.mxu0 }
 0x3eb   :  { %v952_v43 = vsel %vm951_vm9, %v947_v42, -inf }
 0x3ec   :  { %953 = vmax.xlane.f32.xlu0 %v952_v43  ;;  %v4095_v44 = vpop.f32.mrf.mxu0  ;;  %v276_v43 = vld [vmem:[#allocation7 + $0x90] sm:$0x3] }
 0x3ed   :  { %v4254_v44 = vld [vmem:[#allocation7] sm:$0xff] }
 0x475   :  { %v954_v45 = vpop.xlane.xlu0 %953 }
 0x476   :  { %v955_v46 = vsub.f32 %v947_v42, %v954_v45  ;;  %v4253_v42 = vld [vmem:[#allocation7 + $0x8] sm:$0xff]  ;;  %v4255_v45 = vld [vmem:[#allocation7 + $0x58] sm:$0xff] }
 0x478   :  { %v956_v47 = vmul.f32 1.442695, %v955_v46  ;;  %v4256_v46 = vld [vmem:[#allocation7 + $0x50] sm:$0xff] }
 0x47a   :  { %4233 = vpow2.f32 %v956_v47  ;;  %v279_v47 = vld [vmem:[#allocation7 + $0xa8] sm:$0x3] }
 0x487   :  { %v4962_v48 = vpop.eup %4233 }
 0x488   :  { %v958_v49 = vsel %vm951_vm9, %v4962_v48, 0.0 }
 0x489   :  { %959 = vadd.xlane.f32.xlu0 %v958_v49  ;;  %v278_v49 = vld [vmem:[#allocation7 + $0xa0] sm:$0x3] }
 0x512   :  { %v960_v33 = vpop.xlane.xlu0 %959 }
 0x513   :  { %4235 = vrcp.f32 %v960_v33  ;;  %v1551_v33 = vld [vmem:[#allocation16 + $0xc0] sm:$0xff] }
 0x520   :  { %v4236_v34 = vpop.eup %4235 }
 0x521   :  { %v962_v35 = vmul.f32 %v4236_v34, %v4962_v48  ;;  %v4257_v48 = vld [vmem:[#allocation7 + $0x18] sm:$0xff] }
 0x522   :  { %v1548_v34 = vld [vmem:[#allocation16 + $0xa8] sm:$0xff] }
 0x523   :  { %3768 = vmatmul.mubr.msk.f32.vlgmr.msra.gmra.mxu1 %vm951_vm9, %v962_v35  ;;  %v1547_v35 = vld [vmem:[#allocation16 + $0xa0] sm:$0xff] }
 0x524   :  { %3770 = vmatpush1.msk.msra.mxu1 %vm286_vm0, %v274_v36  ;;  %1275 = vmatprep.mubr.f32.mxu1 %v4654_v0  ;;  %v1544_v36 = vld [vmem:[#allocation16 + $0x88] sm:$0xff] }
 0x525   :  { %1239 = vmatprep.subr.mxu1 %v4251_v38  ;;  %v1540_v38 = vld [vmem:[#allocation16 + $0x68] sm:$0xff] }
 0x526   :  { %1240 = vmatpush1.msra.mxu1 %v4252_v40  ;;  %v1536_v40 = vld [vmem:[#allocation16 + $0x48] sm:$0xff] }
 0x527   :  { %1241 = vmatprep.subr.mxu1 %v4253_v42  ;;  %v1532_v42 = vld [vmem:[#allocation16 + $0x28] sm:$0xff] }
 0x528   :  { %1242 = vmatpush1.msra.mxu1 %v4254_v44  ;;  %v1528_v44 = vld [vmem:[#allocation16 + $0x8] sm:$0xff] }
 0x529   :  { %3771 = vmatmul.mubr.msk.f32.vlgmr.msra.gmra.mxu1 %vm1183_vm10, %v1182_v39  ;;  %3772 = vmatprep.subr.msk.mxu1 %vm286_vm0, %v277_v41  ;;  %v1535_v41 = vld [vmem:[#allocation16 + $0x40] sm:$0xff] }
 0x52a   :  { %3773 = vmatpush1.msk.msra.mxu1 %vm286_vm0, %v276_v43  ;;  %1346 = vmatprep.mubr.f32.mxu1 %v4654_v0  ;;  %v1531_v43 = vld [vmem:[#allocation16 + $0x20] sm:$0xff] }
 0x52b   :  { %1310 = vmatprep.subr.mxu1 %v4255_v45  ;;  %v1527_v45 = vld [vmem:[#allocation16] sm:$0xff] }
 0x52c   :  { %1311 = vmatpush1.msra.mxu1 %v4256_v46  ;;  %v1652_v46 = vld [vmem:[#allocation16 + $0x3e8] sm:$0xff] }
 0x52d   :  { %1312 = vmatprep.subr.mxu1 %v4257_v48  ;;  %v1648_v48 = vld [vmem:[#allocation16 + $0x3c8] sm:$0xff] }
 0x52e   :  { %1313 = vmatpush1.msra.mxu1 %v4258_v50  ;;  %v1644_v50 = vld [vmem:[#allocation16 + $0x3a8] sm:$0xff] }
 0x52f   :  { %3775 = vmatprep.subr.msk.mxu1 %vm286_vm0, %v279_v47  ;;  %3774 = vmatmul.mubr.msk.f32.vlgmr.msra.gmra.mxu1 %vm1183_vm10, %v1182_v39  ;;  %v1651_v47 = vld [vmem:[#allocation16 + $0x3e0] sm:$0xff] }
 0x530   :  { %3776 = vmatpush1.msk.msra.mxu1 %vm286_vm0, %v278_v49  ;;  %1417 = vmatprep.mubr.f32.mxu1 %v4654_v0  ;;  %v1647_v49 = vld [vmem:[#allocation16 + $0x3c0] sm:$0xff] }
 0x531   :  { %1381 = vmatprep.subr.mxu1 %v271_v51  ;;  %v1643_v51 = vld [vmem:[#allocation16 + $0x3a0] sm:$0xff] }
 0x532   :  { %1382 = vmatpush1.msra.mxu1 %v270_v52  ;;  %v1640_v52 = vld [vmem:[#allocation16 + $0x388] sm:$0xff] }
 0x533   :  { %1383 = vmatprep.subr.mxu1 %v263_v53  ;;  %v1639_v53 = vld [vmem:[#allocation16 + $0x380] sm:$0xff] }
 0x534   :  { %1384 = vmatpush1.msra.mxu1 %v262_v54  ;;  %v1636_v54 = vld [vmem:[#allocation16 + $0x368] sm:$0xff] }
 0x535   :  { %3777 = vmatmul.mubr.msk.f32.vlgmr.msra.gmra.mxu1 %vm1183_vm10, %v1182_v39  ;;  %3778 = vmatprep.subr.msk.mxu1 %vm286_vm0, %v281_v55  ;;  %v1635_v55 = vld [vmem:[#allocation16 + $0x360] sm:$0xff] }
 0x536   :  { %3779 = vmatpush1.msk.msra.mxu1 %vm286_vm0, %v280_v56  ;;  %1488 = vmatprep.mubr.f32.mxu1 %v4654_v0  ;;  %v1632_v56 = vld [vmem:[#allocation16 + $0x348] sm:$0xff] }
 0x537   :  { %1452 = vmatprep.subr.mxu1 %v273_v57  ;;  %v1631_v57 = vld [vmem:[#allocation16 + $0x340] sm:$0xff] }
 0x538   :  { %1453 = vmatpush1.msra.mxu1 %v272_v58  ;;  %v973_v58 = vld [vmem:[%s5766_s4 + $0x10] sm:$0xff] }
 0x539   :  { %1454 = vmatprep.subr.mxu1 %v265_v59  ;;  %v1628_v59 = vld [vmem:[#allocation16 + $0x328] sm:$0xff]  ;;  %3899 = vmatpush3.msra.mxu0 %v973_v58 }
 0x53a   :  { %1455 = vmatpush1.msra.mxu1 %v264_v60  ;;  %v988_v60 = vld [vmem:[%s5766_s4 + $0x88] sm:$0xff] }
 0x53b   :  { %3780 = vmatmul.mubr.msk.f32.vlgmr.msra.gmra.mxu1 %vm1183_vm10, %v1182_v39  ;;  %2017 = vmatprep.subr.mxu1 %v1588_v61  ;;  %v1539_v39 = vld [vmem:[#allocation16 + $0x60] sm:$0xff]  ;;  %v1828_v58 = vld [vmem:[#allocation16 + $0x968] sm:$0xff]  ;;  %vm3308_vm10 = vcmask 1045504  }
 0x53c   :  { %2018 = vmatpush1.msra.mxu1 %v1587_v62  ;;  %v1627_v61 = vld [vmem:[#allocation16 + $0x320] sm:$0xff]  ;;  %3900 = vmatprep.subr.mxu0 %v988_v60 }
 0x53d   :  { %2019 = vmatprep.subr.mxu1 %v1584_v2  ;;  %v972_v62 = vld [vmem:[%s5766_s4 + $0x8] sm:$0xff] }
 0x53e   :  { %2020 = vmatpush1.msra.mxu1 %v1583_v4  ;;  %v1624_v2 = vld [vmem:[#allocation16 + $0x308] sm:$0xff]  ;;  %3901 = vmatpush3.msra.mxu0 %v972_v62  ;;  %v987_v4 = vld [vmem:[%s5766_s4 + $0x80] sm:$0xff] }
 0x53f   :  { %2021 = vmatprep.subr.mxu1 %v1580_v5  ;;  %v971_v5 = vld [vmem:[%s5766_s4] sm:$0xff]  ;;  %3902 = vmatprep.subr.mxu0 %v987_v4  ;;  %v1824_v62 = vld [vmem:[#allocation16 + $0x948] sm:$0xff] }
 0x540   :  { %2022 = vmatpush1.msra.mxu1 %v1579_v6  ;;  %v1623_v6 = vld [vmem:[#allocation16 + $0x300] sm:$0xff]  ;;  %3903 = vmatpush3.msra.mxu0 %v971_v5  ;;  %v1684_v5 = vld [vmem:[#allocation16 + $0x4e8] sm:$0xff] }
 0x541   :  { %2023 = vmatprep.subr.mxu1 %v1576_v7  ;;  %v1620_v7 = vld [vmem:[#allocation16 + $0x2e8] sm:$0xff]  ;;  %v1827_v60 = vld [vmem:[#allocation16 + $0x960] sm:$0xff] }
 0x542   :  { %2024 = vmatpush1.msra.mxu1 %v1575_v8  ;;  %v1716_v8 = vld [vmem:[#allocation16 + $0x5e8] sm:$0xff]  ;;  %v1823_v4 = vld [vmem:[#allocation16 + $0x940] sm:$0xff] }
 0x543   :  { %2025 = vmatprep.subr.mxu1 %v1572_v9  ;;  %v1619_v9 = vld [vmem:[#allocation16 + $0x2e0] sm:$0xff]  ;;  %2088 = vmatprep.subr.mxu0 %v1716_v8 }
 0x544   :  { %2026 = vmatpush1.msra.mxu1 %v1571_v10  ;;  %v1616_v10 = vld [vmem:[#allocation16 + $0x2c8] sm:$0xff]  ;;  %v1819_v8 = vld [vmem:[#allocation16 + $0x920] sm:$0xff] }
 0x545   :  { %2027 = vmatprep.subr.mxu1 %v1568_v12  ;;  %v1615_v12 = vld [vmem:[#allocation16 + $0x2c0] sm:$0xff] }
 0x546   :  { %2028 = vmatpush1.msra.mxu1 %v1567_v25  ;;  %v1612_v25 = vld [vmem:[#allocation16 + $0x2a8] sm:$0xff] }
 0x547   :  { %2029 = vmatprep.subr.mxu1 %v1564_v26  ;;  %v1611_v26 = vld [vmem:[#allocation16 + $0x2a0] sm:$0xff] }
 0x548   :  { %2030 = vmatpush1.msra.mxu1 %v1563_v27  ;;  %v1608_v27 = vld [vmem:[#allocation16 + $0x288] sm:$0xff] }
 0x549   :  { %2031 = vmatprep.subr.mxu1 %v1560_v28  ;;  %v1607_v28 = vld [vmem:[#allocation16 + $0x280] sm:$0xff] }
 0x54a   :  { %2032 = vmatpush1.msra.mxu1 %v1559_v29  ;;  %v1604_v29 = vld [vmem:[#allocation16 + $0x268] sm:$0xff] }
 0x54b   :  { %2033 = vmatprep.subr.mxu1 %v1556_v30  ;;  %v1603_v30 = vld [vmem:[#allocation16 + $0x260] sm:$0xff] }
 0x54c   :  { %2034 = vmatpush1.msra.mxu1 %v1555_v31  ;;  %v1600_v31 = vld [vmem:[#allocation16 + $0x248] sm:$0xff] }
 0x54d   :  { %2035 = vmatprep.subr.mxu1 %v1552_v32  ;;  %v1599_v32 = vld [vmem:[#allocation16 + $0x240] sm:$0xff] }
 0x54e   :  { %2036 = vmatpush1.msra.mxu1 %v1551_v33  ;;  %v1596_v33 = vld [vmem:[#allocation16 + $0x228] sm:$0xff] }
 0x54f   :  { %2037 = vmatprep.subr.mxu1 %v1548_v34  ;;  %v1595_v34 = vld [vmem:[#allocation16 + $0x220] sm:$0xff] }
 0x550   :  { %2038 = vmatpush1.msra.mxu1 %v1547_v35  ;;  %v1592_v35 = vld [vmem:[#allocation16 + $0x208] sm:$0xff] }
 0x551   :  { %2039 = vmatprep.subr.mxu1 %v1544_v36  ;;  %v1591_v36 = vld [vmem:[#allocation16 + $0x200] sm:$0xff] }
 0x552   :  { %2040 = vmatpush1.msra.mxu1 %v1543_v37  ;;  %v1844_v37 = vld [vmem:[#allocation16 + $0x9e8] sm:$0xff] }
 0x553   :  { %2041 = vmatprep.subr.mxu1 %v1540_v38 }
 0x554   :  { %2042 = vmatpush1.msra.mxu1 %v1539_v39 }
 0x555   :  { %2043 = vmatprep.subr.mxu1 %v1536_v40 }
 0x556   :  { %2044 = vmatpush1.msra.mxu1 %v1535_v41 }
 0x557   :  { %2045 = vmatprep.subr.mxu1 %v1532_v42  ;;  %v1715_v42 = vld [vmem:[#allocation16 + $0x5e0] sm:$0xff] }
 0x558   :  { %2046 = vmatpush1.msra.mxu1 %v1531_v43  ;;  %v1712_v43 = vld [vmem:[#allocation16 + $0x5c8] sm:$0xff] }
 0x559   :  { %2047 = vmatprep.subr.mxu1 %v1528_v44 }
 0x55a   :  { %2048 = vmatpush1.msra.mxu1 %v1527_v45  ;;  %v1711_v45 = vld [vmem:[#allocation16 + $0x5c0] sm:$0xff] }
 0x55b   :  { %2049 = vmatprep.subr.mxu1 %v1652_v46  ;;  %v1708_v46 = vld [vmem:[#allocation16 + $0x5a8] sm:$0xff] }
 0x55c   :  { %2050 = vmatpush2.msra.mxu1 %v1651_v47  ;;  %v1834_v47 = vld [vmem:[#allocation16 + $0x998] sm:$0xff] }
 0x55d   :  { %2051 = vmatprep.subr.mxu1 %v1648_v48 }
 0x55e   :  { %2052 = vmatpush2.msra.mxu1 %v1647_v49  ;;  %v1703_v49 = vld [vmem:[#allocation16 + $0x580] sm:$0xff] }
 0x55f   :  { %2053 = vmatprep.subr.mxu1 %v1644_v50  ;;  %v1836_v50 = vld [vmem:[#allocation16 + $0x9a8] sm:$0xff] }
 0x560   :  { %2054 = vmatpush2.msra.mxu1 %v1643_v51  ;;  %v1699_v51 = vld [vmem:[#allocation16 + $0x560] sm:$0xff] }
 0x561   :  { %2055 = vmatprep.subr.mxu1 %v1640_v52  ;;  %v1835_v52 = vld [vmem:[#allocation16 + $0x9a0] sm:$0xff] }
 0x562   :  { %2056 = vmatpush2.msra.mxu1 %v1639_v53  ;;  %v1696_v53 = vld [vmem:[#allocation16 + $0x548] sm:$0xff] }
 0x563   :  { %2057 = vmatprep.subr.mxu1 %v1636_v54  ;;  %v1832_v54 = vld [vmem:[#allocation16 + $0x988] sm:$0xff] }
 0x564   :  { %2058 = vmatpush2.msra.mxu1 %v1635_v55  ;;  %v1695_v55 = vld [vmem:[#allocation16 + $0x540] sm:$0xff] }
 0x565   :  { %2059 = vmatprep.subr.mxu1 %v1632_v56  ;;  %v1831_v56 = vld [vmem:[#allocation16 + $0x980] sm:$0xff] }
 0x566   :  { %2060 = vmatpush2.msra.mxu1 %v1631_v57  ;;  %v1692_v57 = vld [vmem:[#allocation16 + $0x528] sm:$0xff] }
 0x567   :  { %2061 = vmatprep.subr.mxu1 %v1628_v59  ;;  %v1691_v59 = vld [vmem:[#allocation16 + $0x520] sm:$0xff] }
 0x568   :  { %2062 = vmatpush2.msra.mxu1 %v1627_v61  ;;  %v1688_v61 = vld [vmem:[#allocation16 + $0x508] sm:$0xff] }
 0x569   :  { %2063 = vmatprep.subr.mxu1 %v1624_v2  ;;  %v1687_v2 = vld [vmem:[#allocation16 + $0x500] sm:$0xff] }
 0x56a   :  { %2064 = vmatpush2.msra.mxu1 %v1623_v6  ;;  %v1820_v6 = vld [vmem:[#allocation16 + $0x928] sm:$0xff] }
 0x56b   :  { %2065 = vmatprep.subr.mxu1 %v1620_v7  ;;  %v1683_v7 = vld [vmem:[#allocation16 + $0x4e0] sm:$0xff] }
 0x56c   :  { %2066 = vmatpush2.msra.mxu1 %v1619_v9  ;;  %v1680_v9 = vld [vmem:[#allocation16 + $0x4c8] sm:$0xff] }
 0x56d   :  { %2067 = vmatprep.subr.mxu1 %v1616_v10  ;;  %v1816_v10 = vld [vmem:[#allocation16 + $0x908] sm:$0xff] }
 0x56e   :  { %2068 = vmatpush2.msra.mxu1 %v1615_v12  ;;  %v1679_v12 = vld [vmem:[#allocation16 + $0x4c0] sm:$0xff] }
 0x56f   :  { %2069 = vmatprep.subr.mxu1 %v1612_v25  ;;  %v1815_v25 = vld [vmem:[#allocation16 + $0x900] sm:$0xff] }
 0x570   :  { %2070 = vmatpush2.msra.mxu1 %v1611_v26  ;;  %v1676_v26 = vld [vmem:[#allocation16 + $0x4a8] sm:$0xff] }
 0x571   :  { %2071 = vmatprep.subr.mxu1 %v1608_v27  ;;  %v1812_v27 = vld [vmem:[#allocation16 + $0x8e8] sm:$0xff] }
 0x572   :  { %2072 = vmatpush2.msra.mxu1 %v1607_v28  ;;  %v1675_v28 = vld [vmem:[#allocation16 + $0x4a0] sm:$0xff] }
 0x573   :  { %2073 = vmatprep.subr.mxu1 %v1604_v29  ;;  %v1811_v29 = vld [vmem:[#allocation16 + $0x8e0] sm:$0xff] }
 0x574   :  { %2074 = vmatpush2.msra.mxu1 %v1603_v30  ;;  %v1672_v30 = vld [vmem:[#allocation16 + $0x488] sm:$0xff] }
 0x575   :  { %2075 = vmatprep.subr.mxu1 %v1600_v31  ;;  %v1808_v31 = vld [vmem:[#allocation16 + $0x8c8] sm:$0xff] }
 0x576   :  { %2076 = vmatpush2.msra.mxu1 %v1599_v32  ;;  %v1671_v32 = vld [vmem:[#allocation16 + $0x480] sm:$0xff] }
 0x577   :  { %2077 = vmatprep.subr.mxu1 %v1596_v33  ;;  %v1807_v33 = vld [vmem:[#allocation16 + $0x8c0] sm:$0xff] }
 0x578   :  { %2078 = vmatpush2.msra.mxu1 %v1595_v34  ;;  %v1668_v34 = vld [vmem:[#allocation16 + $0x468] sm:$0xff] }
 0x579   :  { %2079 = vmatprep.subr.mxu1 %v1592_v35  ;;  %v1804_v35 = vld [vmem:[#allocation16 + $0x8a8] sm:$0xff] }
 0x57a   :  { %2080 = vmatpush2.msra.mxu1 %v1591_v36  ;;  %v1667_v36 = vld [vmem:[#allocation16 + $0x460] sm:$0xff] }
 0x57b   :  { %2159 = vmatprep.subr.mxu1 %v1844_v37  ;;  %v1803_v37 = vld [vmem:[#allocation16 + $0x8a0] sm:$0xff] }
 0x5e3   :  { %v1104_v38 = vpop.f32.mrf.mxu1 }
 0x5e4   :  { %v1109_v41 = vmul.f32 %v1104_v38, %v753_v22  ;;  %v1704_v22 = vld [vmem:[#allocation16 + $0x588] sm:$0xff] }
 0x5e5   :  { %v1106_v39 = vpop.f32.mrf.mxu1  ;;  %v1664_v38 = vld [vmem:[#allocation16 + $0x448] sm:$0xff] }
 0x5e6   :  { %v1110_v40 = vmul.f32 %v1106_v39, %v754_v20  ;;  %v1843_v20 = vld [vmem:[#allocation16 + $0x9e0] sm:$0xff]  ;;  %v1800_v39 = vld [vmem:[#allocation16 + $0x888] sm:$0xff] }
 0x5e8   :  { %1175 = vmatprep.mubr.f32.mxu0 %v1110_v40  ;;  %v1663_v40 = vld [vmem:[#allocation16 + $0x440] sm:$0xff] }
 0x5e9   :  { %v1277_v44 = vpop.f32.mrf.mxu1  ;;  %1176 = vmatmul.mubr.f32.vlgmr.msra.gmra.mxu0 %v1109_v41  ;;  %v1799_v41 = vld [vmem:[#allocation16 + $0x880] sm:$0xff] }
 0x5ea   :  { %2089 = vmatpush1.msra.mxu0 %v1715_v42  ;;  %vm5086_vm11 = vcmp.eq.f32.partialorder %v1277_v44, %v446_v18  ;;  %v1840_v18 = vld [vmem:[#allocation16 + $0x9c8] sm:$0xff]  ;;  %v1659_v44 = vld [vmem:[#allocation16 + $0x420] sm:$0xff] }
 0x5eb   :  { %v1279_v48 = vpop.f32.mrf.mxu1  ;;  %2090 = vmatprep.subr.mxu0 %v1712_v43  ;;  %v1660_v42 = vld [vmem:[#allocation16 + $0x428] sm:$0xff] }
 0x5ec   :  { %vm5092_vm12 = vcmp.eq.f32.partialorder %v1279_v48, %v447_v15  ;;  %2091 = vmatpush1.msra.mxu0 %v1711_v45  ;;  %v1700_v15 = vld [vmem:[#allocation16 + $0x568] sm:$0xff]  ;;  %v1795_v45 = vld [vmem:[#allocation16 + $0x860] sm:$0xff] }
 0x5ed   :  { %3789 = vmatprep.mubr.msk.f32.mxu1 %vm5092_vm12, %v4655_v23  ;;  %2092 = vmatprep.subr.mxu0 %v1708_v46  ;;  %v1796_v43 = vld [vmem:[#allocation16 + $0x868] sm:$0xff] }
 0x5ee   :  { %3790 = vmatmul.mubr.msk.f32.vlgmr.msra.gmra.mxu1 %vm5086_vm11, %v4655_v23  ;;  %2093 = vmatpush1.msra.mxu0 %v1707_v17  ;;  %v1656_v46 = vld [vmem:[#allocation16 + $0x408] sm:$0xff]  ;;  %v1655_v17 = vld [vmem:[#allocation16 + $0x400] sm:$0xff] }
 0x5ef   :  { %2160 = vmatpush1.msra.mxu1 %v1843_v20  ;;  %2094 = vmatprep.subr.mxu0 %v1704_v22  ;;  %v1792_v48 = vld [vmem:[#allocation16 + $0x848] sm:$0xff]  ;;  %v1791_v20 = vld [vmem:[#allocation16 + $0x840] sm:$0xff] }
 0x5f0   :  { %2161 = vmatprep.subr.mxu1 %v1840_v18  ;;  %2095 = vmatpush1.msra.mxu0 %v1703_v49  ;;  %v1780_v22 = vld [vmem:[#allocation16 + $0x7e8] sm:$0xff]  ;;  %v1779_v49 = vld [vmem:[#allocation16 + $0x7e0] sm:$0xff] }
 0x5f1   :  { %2162 = vmatpush1.msra.mxu1 %v1839_v14  ;;  %2096 = vmatprep.subr.mxu0 %v1700_v15  ;;  %v1788_v18 = vld [vmem:[#allocation16 + $0x828] sm:$0xff]  ;;  %v1787_v14 = vld [vmem:[#allocation16 + $0x820] sm:$0xff] }
 0x5f2   :  { %2163 = vmatprep.subr.mxu1 %v1836_v50  ;;  %2097 = vmatpush1.msra.mxu0 %v1699_v51  ;;  %v1776_v15 = vld [vmem:[#allocation16 + $0x7c8] sm:$0xff]  ;;  %v1775_v51 = vld [vmem:[#allocation16 + $0x7c0] sm:$0xff] }
 0x5f3   :  { %2164 = vmatpush1.msra.mxu1 %v1835_v52  ;;  %2098 = vmatprep.subr.mxu0 %v1696_v53  ;;  %v1784_v50 = vld [vmem:[#allocation16 + $0x808] sm:$0xff]  ;;  %v1783_v52 = vld [vmem:[#allocation16 + $0x800] sm:$0xff] }
 0x5f4   :  { %2165 = vmatprep.subr.mxu1 %v1832_v54  ;;  %2099 = vmatpush1.msra.mxu0 %v1695_v55  ;;  %v1772_v53 = vld [vmem:[#allocation16 + $0x7a8] sm:$0xff]  ;;  %v1771_v55 = vld [vmem:[#allocation16 + $0x7a0] sm:$0xff] }
 0x5f5   :  { %2166 = vmatpush1.msra.mxu1 %v1831_v56  ;;  %2100 = vmatprep.subr.mxu0 %v1692_v57  ;;  %v1908_v54 = vld [vmem:[#allocation16 + $0xbe8] sm:$0xff]  ;;  %v1907_v56 = vld [vmem:[#allocation16 + $0xbe0] sm:$0xff] }
 0x5f6   :  { %2167 = vmatprep.subr.mxu1 %v1828_v58  ;;  %2101 = vmatpush1.msra.mxu0 %v1691_v59  ;;  %v1768_v57 = vld [vmem:[#allocation16 + $0x788] sm:$0xff]  ;;  %v1767_v59 = vld [vmem:[#allocation16 + $0x780] sm:$0xff] }
 0x5f7   :  { %2168 = vmatpush1.msra.mxu1 %v1827_v60  ;;  %2102 = vmatprep.subr.mxu0 %v1688_v61  ;;  %v1904_v58 = vld [vmem:[#allocation16 + $0xbc8] sm:$0xff]  ;;  %v1903_v60 = vld [vmem:[#allocation16 + $0xbc0] sm:$0xff] }
 0x5f8   :  { %2169 = vmatprep.subr.mxu1 %v1824_v62  ;;  %2103 = vmatpush1.msra.mxu0 %v1687_v2  ;;  %v1764_v61 = vld [vmem:[#allocation16 + $0x768] sm:$0xff]  ;;  %v1763_v2 = vld [vmem:[#allocation16 + $0x760] sm:$0xff] }
 0x5f9   :  { %2170 = vmatpush1.msra.mxu1 %v1823_v4  ;;  %2104 = vmatprep.subr.mxu0 %v1684_v5  ;;  %v1900_v62 = vld [vmem:[#allocation16 + $0xba8] sm:$0xff]  ;;  %v1899_v4 = vld [vmem:[#allocation16 + $0xba0] sm:$0xff] }
 0x5fa   :  { %2171 = vmatprep.subr.mxu1 %v1820_v6  ;;  %2105 = vmatpush1.msra.mxu0 %v1683_v7  ;;  %v1760_v5 = vld [vmem:[#allocation16 + $0x748] sm:$0xff]  ;;  %v1759_v7 = vld [vmem:[#allocation16 + $0x740] sm:$0xff] }
 0x5fb   :  { %2172 = vmatpush1.msra.mxu1 %v1819_v8  ;;  %2106 = vmatprep.subr.mxu0 %v1680_v9  ;;  %v1896_v6 = vld [vmem:[#allocation16 + $0xb88] sm:$0xff]  ;;  %v1895_v8 = vld [vmem:[#allocation16 + $0xb80] sm:$0xff] }
 0x5fc   :  { %2173 = vmatprep.subr.mxu1 %v1816_v10  ;;  %2107 = vmatpush1.msra.mxu0 %v1679_v12  ;;  %v1756_v9 = vld [vmem:[#allocation16 + $0x728] sm:$0xff]  ;;  %v1755_v12 = vld [vmem:[#allocation16 + $0x720] sm:$0xff] }
 0x5fd   :  { %2174 = vmatpush1.msra.mxu1 %v1815_v25  ;;  %2108 = vmatprep.subr.mxu0 %v1676_v26  ;;  %v1892_v10 = vld [vmem:[#allocation16 + $0xb68] sm:$0xff]  ;;  %v1891_v25 = vld [vmem:[#allocation16 + $0xb60] sm:$0xff] }
 0x5fe   :  { %2175 = vmatprep.subr.mxu1 %v1812_v27  ;;  %2109 = vmatpush1.msra.mxu0 %v1675_v28  ;;  %v1752_v26 = vld [vmem:[#allocation16 + $0x708] sm:$0xff]  ;;  %v1751_v28 = vld [vmem:[#allocation16 + $0x700] sm:$0xff] }
 0x5ff   :  { %2176 = vmatpush1.msra.mxu1 %v1811_v29  ;;  %2110 = vmatprep.subr.mxu0 %v1672_v30  ;;  %v1888_v27 = vld [vmem:[#allocation16 + $0xb48] sm:$0xff]  ;;  %v1887_v29 = vld [vmem:[#allocation16 + $0xb40] sm:$0xff] }
 0x600   :  { %2177 = vmatprep.subr.mxu1 %v1808_v31  ;;  %2111 = vmatpush1.msra.mxu0 %v1671_v32  ;;  %v1748_v30 = vld [vmem:[#allocation16 + $0x6e8] sm:$0xff]  ;;  %v1747_v32 = vld [vmem:[#allocation16 + $0x6e0] sm:$0xff] }
 0x601   :  { %2178 = vmatpush1.msra.mxu1 %v1807_v33  ;;  %2112 = vmatprep.subr.mxu0 %v1668_v34  ;;  %v1884_v31 = vld [vmem:[#allocation16 + $0xb28] sm:$0xff]  ;;  %v1883_v33 = vld [vmem:[#allocation16 + $0xb20] sm:$0xff] }
 0x602   :  { %2179 = vmatprep.subr.mxu1 %v1804_v35  ;;  %2113 = vmatpush1.msra.mxu0 %v1667_v36  ;;  %v1744_v34 = vld [vmem:[#allocation16 + $0x6c8] sm:$0xff]  ;;  %v1743_v36 = vld [vmem:[#allocation16 + $0x6c0] sm:$0xff] }
 0x603   :  { %2180 = vmatpush1.msra.mxu1 %v1803_v37  ;;  %2114 = vmatprep.subr.mxu0 %v1664_v38  ;;  %v1880_v35 = vld [vmem:[#allocation16 + $0xb08] sm:$0xff]  ;;  %v1879_v37 = vld [vmem:[#allocation16 + $0xb00] sm:$0xff] }
 0x604   :  { %2181 = vmatprep.subr.mxu1 %v1800_v39  ;;  %2115 = vmatpush1.msra.mxu0 %v1663_v40  ;;  %v1740_v38 = vld [vmem:[#allocation16 + $0x6a8] sm:$0xff]  ;;  %v1739_v40 = vld [vmem:[#allocation16 + $0x6a0] sm:$0xff] }
 0x605   :  { %2182 = vmatpush1.msra.mxu1 %v1799_v41  ;;  %2116 = vmatprep.subr.mxu0 %v1660_v42  ;;  %v1876_v39 = vld [vmem:[#allocation16 + $0xae8] sm:$0xff]  ;;  %v1875_v41 = vld [vmem:[#allocation16 + $0xae0] sm:$0xff] }
 0x606   :  { %2183 = vmatprep.subr.mxu1 %v1796_v43  ;;  %2117 = vmatpush1.msra.mxu0 %v1659_v44  ;;  %v1736_v42 = vld [vmem:[#allocation16 + $0x688] sm:$0xff]  ;;  %v1348_v43 = vpop.f32.mrf.mxu1 }
 0x607   :  { %2184 = vmatpush1.msra.mxu1 %v1795_v45  ;;  %2118 = vmatprep.subr.mxu0 %v1656_v46  ;;  %v1872_v44 = vld [vmem:[#allocation16 + $0xac8] sm:$0xff]  ;;  %v1735_v45 = vld [vmem:[#allocation16 + $0x680] sm:$0xff]  ;;  %vm5112_vm14 = vcmp.eq.f32.partialorder %v1348_v43, %v448_v24  ;;  %v1702_v43 = vld [vmem:[#allocation16 + $0x578] sm:$0xff] }
 0x608   :  { %2185 = vmatprep.subr.mxu1 %v1792_v48  ;;  %2119 = vmatpush1.msra.mxu0 %v1655_v17  ;;  %v1871_v46 = vld [vmem:[#allocation16 + $0xac0] sm:$0xff]  ;;  %v1732_v48 = vld [vmem:[#allocation16 + $0x668] sm:$0xff] }
 0x609   :  { %2186 = vmatpush1.msra.mxu1 %v1791_v20  ;;  %2120 = vmatprep.subr.mxu0 %v1780_v22  ;;  %v1868_v17 = vld [vmem:[#allocation16 + $0xaa8] sm:$0xff]  ;;  %v1731_v20 = vld [vmem:[#allocation16 + $0x660] sm:$0xff] }
 0x60a   :  { %2187 = vmatprep.subr.mxu1 %v1788_v18  ;;  %2121 = vmatpush2.msra.mxu0 %v1779_v49  ;;  %v1867_v22 = vld [vmem:[#allocation16 + $0xaa0] sm:$0xff]  ;;  %v1728_v18 = vld [vmem:[#allocation16 + $0x648] sm:$0xff]  ;;  %v1350_v49 = vpop.f32.mrf.mxu1 }
 0x60b   :  { %2188 = vmatpush1.msra.mxu1 %v1787_v14  ;;  %2122 = vmatprep.subr.mxu0 %v1776_v15  ;;  %v1864_v14 = vld [vmem:[#allocation16 + $0xa88] sm:$0xff]  ;;  %v1727_v15 = vld [vmem:[#allocation16 + $0x640] sm:$0xff]  ;;  %vm5106_vm13 = vcmp.eq.f32.partialorder %v1350_v49, %v449_v21 }
 0x60c   :  { %2189 = vmatprep.subr.mxu1 %v1784_v50  ;;  %2123 = vmatpush2.msra.mxu0 %v1775_v51  ;;  %v1863_v50 = vld [vmem:[#allocation16 + $0xa80] sm:$0xff]  ;;  %v1724_v51 = vld [vmem:[#allocation16 + $0x628] sm:$0xff] }
 0x60d   :  { %2190 = vmatpush1.msra.mxu1 %v1783_v52  ;;  %2124 = vmatprep.subr.mxu0 %v1772_v53  ;;  %v1860_v52 = vld [vmem:[#allocation16 + $0xa68] sm:$0xff]  ;;  %v1723_v53 = vld [vmem:[#allocation16 + $0x620] sm:$0xff] }
 0x60e   :  { %2191 = vmatprep.subr.mxu1 %v1908_v54  ;;  %2125 = vmatpush2.msra.mxu0 %v1771_v55  ;;  %v1496_v54 = vadd.s32 640, %v4847_v13  ;;  %v1859_v55 = vld [vmem:[#allocation16 + $0xa60] sm:$0xff] }
 0x60f   :  { %2192 = vmatpush2.msra.mxu1 %v1907_v56  ;;  %2126 = vmatprep.subr.mxu0 %v1768_v57  ;;  %v1720_v56 = vld [vmem:[#allocation16 + $0x608] sm:$0xff]  ;;  %v1419_v57 = vpop.f32.mrf.mxu1  ;;  %v1971_v21 = vld [vmem:[#allocation16 + $0xde0] sm:$0xff] }
 0x610   :  { %2193 = vmatprep.subr.mxu1 %v1904_v58  ;;  %2127 = vmatpush2.msra.mxu0 %v1767_v59  ;;  %v1495_v58 = vadd.s32 512, %v4847_v13  ;;  %v1856_v59 = vld [vmem:[#allocation16 + $0xa48] sm:$0xff]  ;;  %v1967_v24 = vld [vmem:[#allocation16 + $0xdc0] sm:$0xff] }
 0x611   :  { %2194 = vmatpush2.msra.mxu1 %v1903_v60  ;;  %2128 = vmatprep.subr.mxu0 %v1764_v61  ;;  %v1719_v60 = vld [vmem:[#allocation16 + $0x600] sm:$0xff]  ;;  %v1681_v61 = vld [vmem:[#allocation16 + $0x4d0] sm:$0xff] }
 0x612   :  { %2195 = vmatprep.subr.mxu1 %v1900_v62  ;;  %2129 = vmatpush2.msra.mxu0 %v1763_v2  ;;  %v1855_v62 = vld [vmem:[#allocation16 + $0xa40] sm:$0xff]  ;;  %v1852_v2 = vld [vmem:[#allocation16 + $0xa28] sm:$0xff] }
 0x613   :  { %2196 = vmatpush2.msra.mxu1 %v1899_v4  ;;  %2130 = vmatprep.subr.mxu0 %v1760_v5  ;;  %v1500_v4 = vcvt.s32.f32 %v1496_v54  ;;  %v1499_v5 = vcvt.s32.f32 %v1495_v58  ;;  %v1939_v49 = vld [vmem:[#allocation16 + $0xce0] sm:$0xff]  ;;  %v1686_v54 = vld [vmem:[#allocation16 + $0x4f8] sm:$0xff] }
 0x614   :  { %2197 = vmatprep.subr.mxu1 %v1896_v6  ;;  %2131 = vmatpush2.msra.mxu0 %v1759_v7  ;;  %v1972_v6 = vld [vmem:[#allocation16 + $0xde8] sm:$0xff]  ;;  %v1421_v7 = vpop.f32.mrf.mxu1  ;;  %v1682_v58 = vld [vmem:[#allocation16 + $0x4d8] sm:$0xff] }
 0x615   :  { %2198 = vmatpush2.msra.mxu1 %v1895_v8  ;;  %2132 = vmatprep.subr.mxu0 %v1756_v9  ;;  %v1851_v8 = vld [vmem:[#allocation16 + $0xa20] sm:$0xff]  ;;  %v1848_v9 = vld [vmem:[#allocation16 + $0xa08] sm:$0xff]  ;;  %vm5122_vm15 = vcmp.eq.f32.partialorder %v1421_v7, %v1500_v4  ;;  %vm5126_vm0 = vcmp.eq.f32.partialorder %v1419_v57, %v1499_v5  ;;  %v1678_v4 = vld [vmem:[#allocation16 + $0x4b8] sm:$0xff] }
 0x616   :  { %2199 = vmatprep.subr.mxu1 %v1892_v10  ;;  %2133 = vmatpush2.msra.mxu0 %v1755_v12  ;;  %v1968_v10 = vld [vmem:[#allocation16 + $0xdc8] sm:$0xff]  ;;  %v1847_v12 = vld [vmem:[#allocation16 + $0xa00] sm:$0xff] }
 0x617   :  { %2200 = vmatpush2.msra.mxu1 %v1891_v25  ;;  %2134 = vmatprep.subr.mxu0 %v1752_v26  ;;  %v1964_v26 = vld [vmem:[#allocation16 + $0xda8] sm:$0xff]  ;;  %v1923_v5 = vld [vmem:[#allocation16 + $0xc60] sm:$0xff] }
 0x618   :  { %2201 = vmatprep.subr.mxu1 %v1888_v27  ;;  %2135 = vmatpush2.msra.mxu0 %v1751_v28  ;;  %v1718_v27 = vld [vmem:[#allocation16 + $0x5f8] sm:$0xff]  ;;  %v1963_v28 = vld [vmem:[#allocation16 + $0xda0] sm:$0xff]  ;;  %v1928_v57 = vld [vmem:[#allocation16 + $0xc88] sm:$0xff] }
 0x619   :  { %2202 = vmatpush2.msra.mxu1 %v1887_v29  ;;  %2136 = vmatprep.subr.mxu0 %v1748_v30  ;;  %v1717_v29 = vld [vmem:[#allocation16 + $0x5f0] sm:$0xff]  ;;  %v1960_v30 = vld [vmem:[#allocation16 + $0xd88] sm:$0xff] }
 0x61a   :  { %2203 = vmatprep.subr.mxu1 %v1884_v31  ;;  %2137 = vmatpush2.msra.mxu0 %v1747_v32  ;;  %v1714_v31 = vld [vmem:[#allocation16 + $0x5d8] sm:$0xff]  ;;  %v1959_v32 = vld [vmem:[#allocation16 + $0xd80] sm:$0xff]  ;;  %v1920_v7 = vld [vmem:[#allocation16 + $0xc48] sm:$0xff] }
 0x61b   :  { %2204 = vmatpush2.msra.mxu1 %v1883_v33  ;;  %2138 = vmatprep.subr.mxu0 %v1744_v34  ;;  %v1713_v33 = vld [vmem:[#allocation16 + $0x5d0] sm:$0xff]  ;;  %v1956_v34 = vld [vmem:[#allocation16 + $0xd68] sm:$0xff] }
 0x61c   :  { %2205 = vmatprep.subr.mxu1 %v1880_v35  ;;  %2139 = vmatpush2.msra.mxu0 %v1743_v36  ;;  %v1710_v35 = vld [vmem:[#allocation16 + $0x5b8] sm:$0xff]  ;;  %v1955_v36 = vld [vmem:[#allocation16 + $0xd60] sm:$0xff] }
 0x61d   :  { %2206 = vmatpush2.msra.mxu1 %v1879_v37  ;;  %2140 = vmatprep.subr.mxu0 %v1740_v38  ;;  %v1709_v37 = vld [vmem:[#allocation16 + $0x5b0] sm:$0xff]  ;;  %v1952_v38 = vld [vmem:[#allocation16 + $0xd48] sm:$0xff] }
 0x61e   :  { %2207 = vmatprep.subr.mxu1 %v1876_v39  ;;  %2141 = vmatpush2.msra.mxu0 %v1739_v40  ;;  %v1706_v39 = vld [vmem:[#allocation16 + $0x598] sm:$0xff]  ;;  %v1951_v40 = vld [vmem:[#allocation16 + $0xd40] sm:$0xff] }
 0x61f   :  { %2208 = vmatpush2.msra.mxu1 %v1875_v41  ;;  %2142 = vmatprep.subr.mxu0 %v1736_v42  ;;  %v1705_v41 = vld [vmem:[#allocation16 + $0x590] sm:$0xff]  ;;  %v1948_v42 = vld [vmem:[#allocation16 + $0xd28] sm:$0xff] }
 0x620   :  { %2209 = vmatprep.subr.mxu1 %v1872_v44  ;;  %2143 = vmatpush2.msra.mxu0 %v1735_v45  ;;  %v1947_v44 = vld [vmem:[#allocation16 + $0xd20] sm:$0xff]  ;;  %v1701_v45 = vld [vmem:[#allocation16 + $0x570] sm:$0xff] }
 0x621   :  { %2210 = vmatpush2.msra.mxu1 %v1871_v46  ;;  %2144 = vmatprep.subr.mxu0 %v1732_v48  ;;  %v1944_v46 = vld [vmem:[#allocation16 + $0xd08] sm:$0xff]  ;;  %v1698_v48 = vld [vmem:[#allocation16 + $0x558] sm:$0xff] }
 0x622   :  { %2211 = vmatprep.subr.mxu1 %v1868_v17  ;;  %2145 = vmatpush2.msra.mxu0 %v1731_v20  ;;  %v1943_v17 = vld [vmem:[#allocation16 + $0xd00] sm:$0xff]  ;;  %v1697_v20 = vld [vmem:[#allocation16 + $0x550] sm:$0xff] }
 0x623   :  { %2212 = vmatpush2.msra.mxu1 %v1867_v22  ;;  %2146 = vmatprep.subr.mxu0 %v1728_v18  ;;  %v1940_v22 = vld [vmem:[#allocation16 + $0xce8] sm:$0xff]  ;;  %v1694_v18 = vld [vmem:[#allocation16 + $0x538] sm:$0xff] }
 0x624   :  { %2213 = vmatprep.subr.mxu1 %v1864_v14  ;;  %2147 = vmatpush2.msra.mxu0 %v1727_v15  ;;  %v1693_v14 = vld [vmem:[#allocation16 + $0x530] sm:$0xff]  ;;  %v1936_v15 = vld [vmem:[#allocation16 + $0xcc8] sm:$0xff] }
 0x625   :  { %2214 = vmatpush2.msra.mxu1 %v1863_v50  ;;  %2148 = vmatprep.subr.mxu0 %v1724_v51  ;;  %v1690_v50 = vld [vmem:[#allocation16 + $0x518] sm:$0xff]  ;;  %v1935_v51 = vld [vmem:[#allocation16 + $0xcc0] sm:$0xff] }
 0x626   :  { %2215 = vmatprep.subr.mxu1 %v1860_v52  ;;  %2149 = vmatpush2.msra.mxu0 %v1723_v53  ;;  %v1689_v52 = vld [vmem:[#allocation16 + $0x510] sm:$0xff]  ;;  %v1932_v53 = vld [vmem:[#allocation16 + $0xca8] sm:$0xff] }
 0x627   :  { %2216 = vmatpush2.msra.mxu1 %v1859_v55  ;;  %2150 = vmatprep.subr.mxu0 %v1720_v56  ;;  %v1931_v55 = vld [vmem:[#allocation16 + $0xca0] sm:$0xff]  ;;  %v1685_v56 = vld [vmem:[#allocation16 + $0x4f0] sm:$0xff] }
 0x628   :  { %2217 = vmatprep.subr.mxu1 %v1856_v59  ;;  %2151 = vmatpush2.msra.mxu0 %v1719_v60  ;;  %v1498_v59 = vadd.s32 896, %v4847_v13  ;;  %v1927_v60 = vld [vmem:[#allocation16 + $0xc80] sm:$0xff] }
 0x629   :  { %3791 = vmatprep.mubr.msk.f32.mxu0 %vm5106_vm13, %v4655_v23  ;;  %2218 = vmatpush2.msra.mxu1 %v1855_v62  ;;  %v1490_v62 = vpop.f32.mrf.mxu1  ;;  %v2677_v25 = vld [vmem:[#allocation19 + $0x2c0] sm:$0xff] }
 0x62a   :  { %3792 = vmatmul.mubr.msk.f32.vlgmr.msra.gmra.mxu0 %vm5112_vm14, %v4655_v23  ;;  %2219 = vmatprep.subr.mxu1 %v1852_v2  ;;  %v1924_v2 = vld [vmem:[#allocation16 + $0xc68] sm:$0xff] }
 0x62b   :  { %2230 = vmatprep.subr.mxu0 %v1972_v6  ;;  %2220 = vmatpush2.msra.mxu1 %v1851_v8  ;;  %v1677_v6 = vld [vmem:[#allocation16 + $0x4b0] sm:$0xff]  ;;  %v1674_v8 = vld [vmem:[#allocation16 + $0x498] sm:$0xff] }
 0x62c   :  { %2231 = vmatpush1.msra.mxu0 %v1971_v21  ;;  %2221 = vmatprep.subr.mxu1 %v1848_v9  ;;  %v1502_v21 = vcvt.s32.f32 %v1498_v59  ;;  %v1919_v9 = vld [vmem:[#allocation16 + $0xc40] sm:$0xff]  ;;  %v1566_v59 = vld [vmem:[#allocation16 + $0x138] sm:$0xff] }
 0x62d   :  { %2232 = vmatprep.subr.mxu0 %v1968_v10  ;;  %2222 = vmatpush2.msra.mxu1 %v1847_v12  ;;  %v1673_v10 = vld [vmem:[#allocation16 + $0x490] sm:$0xff]  ;;  %v1492_v12 = vpop.f32.mrf.mxu1 }
 0x62e   :  { %3793 = vmatprep.mubr.msk.f32.mxu1 %vm5122_vm15, %v4655_v23  ;;  %2233 = vmatpush1.msra.mxu0 %v1967_v24  ;;  %v1497_v24 = vadd.s32 768, %v4847_v13  ;;  %vm1510_vm3 = vcmp.eq.f32.partialorder %v1492_v12, %v1502_v21  ;;  %v1557_v21 = vld [vmem:[#allocation16 + $0xf0] sm:$0xff]  ;;  %v1750_v12 = vld [vmem:[#allocation16 + $0x6f8] sm:$0xff] }
 0x62f   :  { %3794 = vmatmul.mubr.msk.f32.vlgmr.msra.gmra.mxu1 %vm5126_vm0, %v4655_v23  ;;  %2234 = vmatprep.subr.mxu0 %v1964_v26  ;;  %v1916_v26 = vld [vmem:[#allocation16 + $0xc28] sm:$0xff] }
 0x630   :  { %2372 = vmatprep.subr.mxu1 %v1718_v27  ;;  %2235 = vmatpush1.msra.mxu0 %v1963_v28  ;;  %v1670_v27 = vld [vmem:[#allocation16 + $0x478] sm:$0xff]  ;;  %v1915_v28 = vld [vmem:[#allocation16 + $0xc20] sm:$0xff] }
 0x631   :  { %2373 = vmatpush1.msra.mxu1 %v1717_v29  ;;  %3801 = vmatprep.mubr.msk.f32.mxu1 %vm5106_vm13, %v4655_v23  ;;  %v1669_v29 = vld [vmem:[#allocation16 + $0x470] sm:$0xff] }
 0x632   :  { %2236 = vmatprep.subr.mxu0 %v1960_v30  ;;  %2374 = vmatprep.subr.mxu1 %v1714_v31  ;;  %v1912_v30 = vld [vmem:[#allocation16 + $0xc08] sm:$0xff]  ;;  %v1666_v31 = vld [vmem:[#allocation16 + $0x458] sm:$0xff] }
 0x633   :  { %2237 = vmatpush1.msra.mxu0 %v1959_v32  ;;  %2375 = vmatpush1.msra.mxu1 %v1713_v33  ;;  %v1911_v32 = vld [vmem:[#allocation16 + $0xc00] sm:$0xff]  ;;  %v1665_v33 = vld [vmem:[#allocation16 + $0x450] sm:$0xff] }
 0x634   :  { %2238 = vmatprep.subr.mxu0 %v1956_v34  ;;  %2376 = vmatprep.subr.mxu1 %v1710_v35  ;;  %v1501_v34 = vcvt.s32.f32 %v1497_v24  ;;  %v1976_v35 = vld [vmem:[#allocation16 + $0xe08] sm:$0xf]  ;;  %v1553_v24 = vld [vmem:[#allocation16 + $0xd0] sm:$0xff] }
 0x635   :  { %2239 = vmatpush1.msra.mxu0 %v1955_v36  ;;  %2377 = vmatpush1.msra.mxu1 %v1709_v37  ;;  %v1662_v36 = vld [vmem:[#allocation16 + $0x438] sm:$0xff]  ;;  %v5142_v37 = vsel %vm1510_vm3, 1.0, %v4654_v0 }
 0x636   :  { %2240 = vmatprep.subr.mxu0 %v1952_v38  ;;  %2378 = vmatprep.subr.mxu1 %v1706_v39  ;;  %v1975_v38 = vld [vmem:[#allocation16 + $0xe00] sm:$0xf]  ;;  %v1661_v39 = vld [vmem:[#allocation16 + $0x430] sm:$0xff]  ;;  %vm5145_vm5 = vcmp.eq.f32.partialorder %v1490_v62, %v1501_v34 }
 0x637   :  { %2241 = vmatpush1.msra.mxu0 %v1951_v40  ;;  %2379 = vmatpush1.msra.mxu1 %v1705_v41  ;;  %v1590_v40 = vld [vmem:[#allocation16 + $0x1f8] sm:$0xff]  ;;  %v1761_v62 = vld [vmem:[#allocation16 + $0x750] sm:$0xff] }
 0x638   :  { %2242 = vmatprep.subr.mxu0 %v1948_v42  ;;  %2380 = vmatprep.subr.mxu1 %v1702_v43  ;;  %v1658_v41 = vld [vmem:[#allocation16 + $0x418] sm:$0xff]  ;;  %v1589_v43 = vld [vmem:[#allocation16 + $0x1f0] sm:$0xff] }
 0x639   :  { %2243 = vmatpush1.msra.mxu0 %v1947_v44  ;;  %2381 = vmatpush1.msra.mxu1 %v1701_v45  ;;  %v1657_v44 = vld [vmem:[#allocation16 + $0x410] sm:$0xff]  ;;  %v1586_v45 = vld [vmem:[#allocation16 + $0x1d8] sm:$0xff] }
 0x63a   :  { %2244 = vmatprep.subr.mxu0 %v1944_v46  ;;  %2382 = vmatprep.subr.mxu1 %v1698_v48  ;;  %v1782_v46 = vld [vmem:[#allocation16 + $0x7f8] sm:$0xff]  ;;  %v1585_v48 = vld [vmem:[#allocation16 + $0x1d0] sm:$0xff] }
 0x63b   :  { %2245 = vmatpush1.msra.mxu0 %v1943_v17  ;;  %2383 = vmatpush1.msra.mxu1 %v1697_v20  ;;  %v1781_v17 = vld [vmem:[#allocation16 + $0x7f0] sm:$0xff]  ;;  %v1582_v20 = vld [vmem:[#allocation16 + $0x1b8] sm:$0xff] }
 0x63c   :  { %2246 = vmatprep.subr.mxu0 %v1940_v22  ;;  %2384 = vmatprep.subr.mxu1 %v1694_v18  ;;  %v1778_v22 = vld [vmem:[#allocation16 + $0x7d8] sm:$0xff]  ;;  %v1581_v18 = vld [vmem:[#allocation16 + $0x1b0] sm:$0xff] }
 0x63d   :  { %2247 = vmatpush1.msra.mxu0 %v1939_v49  ;;  %2385 = vmatpush1.msra.mxu1 %v1693_v14  ;;  %v1777_v49 = vld [vmem:[#allocation16 + $0x7d0] sm:$0xff]  ;;  %v1578_v14 = vld [vmem:[#allocation16 + $0x198] sm:$0xff] }
 0x63e   :  { %2248 = vmatprep.subr.mxu0 %v1936_v15  ;;  %2386 = vmatprep.subr.mxu1 %v1690_v50  ;;  %v1774_v15 = vld [vmem:[#allocation16 + $0x7b8] sm:$0xff]  ;;  %v1577_v50 = vld [vmem:[#allocation16 + $0x190] sm:$0xff] }
 0x63f   :  { %2249 = vmatpush1.msra.mxu0 %v1935_v51  ;;  %2387 = vmatpush1.msra.mxu1 %v1689_v52  ;;  %v1773_v51 = vld [vmem:[#allocation16 + $0x7b0] sm:$0xff]  ;;  %v1574_v52 = vld [vmem:[#allocation16 + $0x178] sm:$0xff] }
 0x640   :  { %2250 = vmatprep.subr.mxu0 %v1932_v53  ;;  %2388 = vmatprep.subr.mxu1 %v1686_v54  ;;  %v1573_v53 = vld [vmem:[#allocation16 + $0x170] sm:$0xff] }
 0x641   :  { %2251 = vmatpush1.msra.mxu0 %v1931_v55  ;;  %2389 = vmatpush1.msra.mxu1 %v1685_v56  ;;  %v1769_v54 = vld [vmem:[#allocation16 + $0x790] sm:$0xff]  ;;  %v1570_v55 = vld [vmem:[#allocation16 + $0x158] sm:$0xff] }
 0x642   :  { %2252 = vmatprep.subr.mxu0 %v1928_v57  ;;  %2390 = vmatprep.subr.mxu1 %v1682_v58  ;;  %v1766_v56 = vld [vmem:[#allocation16 + $0x778] sm:$0xff]  ;;  %v1569_v57 = vld [vmem:[#allocation16 + $0x150] sm:$0xff] }
 0x643   :  { %2253 = vmatpush1.msra.mxu0 %v1927_v60  ;;  %2391 = vmatpush1.msra.mxu1 %v1681_v61  ;;  %v1765_v58 = vld [vmem:[#allocation16 + $0x770] sm:$0xff]  ;;  %v1762_v60 = vld [vmem:[#allocation16 + $0x758] sm:$0xff] }
 0x644   :  { %2254 = vmatprep.subr.mxu0 %v1924_v2  ;;  %2392 = vmatprep.subr.mxu1 %v1678_v4  ;;  %v1565_v61 = vld [vmem:[#allocation16 + $0x130] sm:$0xff]  ;;  %v1562_v2 = vld [vmem:[#allocation16 + $0x118] sm:$0xff] }
 0x645   :  { %2255 = vmatpush1.msra.mxu0 %v1923_v5  ;;  %2393 = vmatpush1.msra.mxu1 %v1677_v6  ;;  %v1758_v4 = vld [vmem:[#allocation16 + $0x738] sm:$0xff]  ;;  %v1561_v5 = vld [vmem:[#allocation16 + $0x110] sm:$0xff] }
 0x646   :  { %2256 = vmatprep.subr.mxu0 %v1920_v7  ;;  %2394 = vmatprep.subr.mxu1 %v1674_v8  ;;  %v1757_v6 = vld [vmem:[#allocation16 + $0x730] sm:$0xff]  ;;  %v1558_v7 = vld [vmem:[#allocation16 + $0xf8] sm:$0xff] }
 0x647   :  { %2257 = vmatpush1.msra.mxu0 %v1919_v9  ;;  %2395 = vmatpush1.msra.mxu1 %v1673_v10  ;;  %v1754_v8 = vld [vmem:[#allocation16 + $0x718] sm:$0xff]  ;;  %v1753_v9 = vld [vmem:[#allocation16 + $0x710] sm:$0xff] }
 0x648   :  { %2258 = vmatprep.subr.mxu0 %v1916_v26  ;;  %2396 = vmatprep.subr.mxu1 %v1670_v27  ;;  %v1554_v10 = vld [vmem:[#allocation16 + $0xd8] sm:$0xff]  ;;  %v1749_v26 = vld [vmem:[#allocation16 + $0x6f0] sm:$0xff] }
 0x649   :  { %2259 = vmatpush1.msra.mxu0 %v1915_v28  ;;  %2397 = vmatpush1.msra.mxu1 %v1669_v29  ;;  %v1550_v27 = vld [vmem:[#allocation16 + $0xb8] sm:$0xff]  ;;  %v1549_v29 = vld [vmem:[#allocation16 + $0xb0] sm:$0xff] }
 0x64a   :  { %2260 = vmatprep.subr.mxu0 %v1912_v30  ;;  %2398 = vmatprep.subr.mxu1 %v1666_v31  ;;  %v1746_v28 = vld [vmem:[#allocation16 + $0x6d8] sm:$0xff]  ;;  %v1745_v30 = vld [vmem:[#allocation16 + $0x6d0] sm:$0xff] }
 0x64b   :  { %2261 = vmatpush1.msra.mxu0 %v1911_v32  ;;  %2399 = vmatpush1.msra.mxu1 %v1665_v33  ;;  %v1546_v31 = vld [vmem:[#allocation16 + $0x98] sm:$0xff]  ;;  %v1545_v33 = vld [vmem:[#allocation16 + $0x90] sm:$0xff] }
 0x64c   :  { %3795 = vmatprep.subr.msk.mxu0 %vm604_vm2, %v1976_v35  ;;  %2400 = vmatprep.subr.mxu1 %v1662_v36  ;;  %v1742_v32 = vld [vmem:[#allocation16 + $0x6b8] sm:$0xff]  ;;  %v1741_v34 = vld [vmem:[#allocation16 + $0x6b0] sm:$0xff] }
 0x64d   :  { %3796 = vmatpush2.msk.msra.mxu0 %vm604_vm2, %v1975_v38  ;;  %3797 = vmatprep.mubr.msk.f32.mxu0 %vm2001_vm4, %v5142_v37  ;;  %v1542_v35 = vld [vmem:[#allocation16 + $0x78] sm:$0xff]  ;;  %v1541_v38 = vld [vmem:[#allocation16 + $0x70] sm:$0xff] }
 0x64e   :  { %2401 = vmatpush1.msra.mxu1 %v1661_v39  ;;  %3798 = vmatmul.mubr.msk.f32.vlgmr.msra.gmra.mxu0 %vm5145_vm5, %v4655_v23  ;;  %v1738_v36 = vld [vmem:[#allocation16 + $0x698] sm:$0xff]  ;;  %v1737_v39 = vld [vmem:[#allocation16 + $0x690] sm:$0xff] }
 0x64f   :  { %2301 = vmatprep.subr.mxu0 %v1590_v40  ;;  %2402 = vmatprep.subr.mxu1 %v1658_v41  ;;  %v1538_v40 = vld [vmem:[#allocation16 + $0x58] sm:$0xff]  ;;  %v2614_v42 = vld [vmem:[#allocation19 + $0xc8] sm:$0xff] }
 0x650   :  { %2302 = vmatpush1.msra.mxu0 %v1589_v43  ;;  %3799 = vmatprep.mubr.msk.f32.mxu0 %vm5092_vm12, %v4655_v23  ;;  %v1734_v41 = vld [vmem:[#allocation16 + $0x678] sm:$0xff]  ;;  %v1537_v43 = vld [vmem:[#allocation16 + $0x50] sm:$0xff]  ;;  %vm3393_vm12 = vcmask 523264  }
 0x651   :  { %2403 = vmatpush1.msra.mxu1 %v1657_v44  ;;  %2303 = vmatprep.subr.mxu0 %v1586_v45  ;;  %v1733_v44 = vld [vmem:[#allocation16 + $0x670] sm:$0xff]  ;;  %v1534_v45 = vld [vmem:[#allocation16 + $0x38] sm:$0xff] }
 0x652   :  { %2404 = vmatprep.subr.mxu1 %v1782_v46  ;;  %2304 = vmatpush1.msra.mxu0 %v1585_v48  ;;  %v1730_v46 = vld [vmem:[#allocation16 + $0x658] sm:$0xff]  ;;  %v1533_v48 = vld [vmem:[#allocation16 + $0x30] sm:$0xff] }
 0x653   :  { %2405 = vmatpush2.msra.mxu1 %v1781_v17  ;;  %2305 = vmatprep.subr.mxu0 %v1582_v20  ;;  %v1729_v17 = vld [vmem:[#allocation16 + $0x650] sm:$0xff]  ;;  %v1530_v20 = vld [vmem:[#allocation16 + $0x18] sm:$0xff] }
 0x654   :  { %2406 = vmatprep.subr.mxu1 %v1778_v22  ;;  %2306 = vmatpush1.msra.mxu0 %v1581_v18  ;;  %v1726_v22 = vld [vmem:[#allocation16 + $0x638] sm:$0xff]  ;;  %v1529_v18 = vld [vmem:[#allocation16 + $0x10] sm:$0xff] }
 0x655   :  { %2407 = vmatpush2.msra.mxu1 %v1777_v49  ;;  %2307 = vmatprep.subr.mxu0 %v1578_v14  ;;  %v1725_v49 = vld [vmem:[#allocation16 + $0x630] sm:$0xff]  ;;  %v1654_v14 = vld [vmem:[#allocation16 + $0x3f8] sm:$0xff] }
 0x656   :  { %2408 = vmatprep.subr.mxu1 %v1774_v15  ;;  %2308 = vmatpush1.msra.mxu0 %v1577_v50  ;;  %v1722_v15 = vld [vmem:[#allocation16 + $0x618] sm:$0xff]  ;;  %v1653_v50 = vld [vmem:[#allocation16 + $0x3f0] sm:$0xff] }
 0x657   :  { %2409 = vmatpush2.msra.mxu1 %v1773_v51  ;;  %2309 = vmatprep.subr.mxu0 %v1574_v52  ;;  %v1721_v51 = vld [vmem:[#allocation16 + $0x610] sm:$0xff]  ;;  %v1650_v52 = vld [vmem:[#allocation16 + $0x3d8] sm:$0xff] }
 0x658   :  { %2410 = vmatprep.subr.mxu1 %v1770_v11  ;;  %2310 = vmatpush1.msra.mxu0 %v1573_v53  ;;  %v1974_v11 = vld [vmem:[#allocation16 + $0xdf8] sm:$0xff]  ;;  %v1649_v53 = vld [vmem:[#allocation16 + $0x3d0] sm:$0xff] }
 0x659   :  { %2411 = vmatpush2.msra.mxu1 %v1769_v54  ;;  %2311 = vmatprep.subr.mxu0 %v1570_v55  ;;  %v1973_v54 = vld [vmem:[#allocation16 + $0xdf0] sm:$0xff]  ;;  %v1646_v55 = vld [vmem:[#allocation16 + $0x3b8] sm:$0xff] }
 0x65a   :  { %2412 = vmatprep.subr.mxu1 %v1766_v56  ;;  %2312 = vmatpush1.msra.mxu0 %v1569_v57  ;;  %v1970_v56 = vld [vmem:[#allocation16 + $0xdd8] sm:$0xff]  ;;  %v1645_v57 = vld [vmem:[#allocation16 + $0x3b0] sm:$0xff] }
 0x65b   :  { %2413 = vmatpush2.msra.mxu1 %v1765_v58  ;;  %2313 = vmatprep.subr.mxu0 %v1566_v59  ;;  %v1969_v58 = vld [vmem:[#allocation16 + $0xdd0] sm:$0xff]  ;;  %v1642_v59 = vld [vmem:[#allocation16 + $0x398] sm:$0xff] }
 0x65c   :  { %2414 = vmatprep.subr.mxu1 %v1762_v60  ;;  %2314 = vmatpush1.msra.mxu0 %v1565_v61  ;;  %v1966_v60 = vld [vmem:[#allocation16 + $0xdb8] sm:$0xff]  ;;  %v1641_v61 = vld [vmem:[#allocation16 + $0x390] sm:$0xff] }
 0x65d   :  { %2415 = vmatpush2.msra.mxu1 %v1761_v62  ;;  %2315 = vmatprep.subr.mxu0 %v1562_v2  ;;  %v1965_v62 = vld [vmem:[#allocation16 + $0xdb0] sm:$0xff]  ;;  %v1638_v2 = vld [vmem:[#allocation16 + $0x378] sm:$0xff] }
 0x65e   :  { %2416 = vmatprep.subr.mxu1 %v1758_v4  ;;  %2316 = vmatpush1.msra.mxu0 %v1561_v5  ;;  %v1637_v4 = vld [vmem:[#allocation16 + $0x370] sm:$0xff] }
 0x65f   :  { %2417 = vmatpush2.msra.mxu1 %v1757_v6  ;;  %2317 = vmatprep.subr.mxu0 %v1558_v7  ;;  %v1961_v5 = vld [vmem:[#allocation16 + $0xd90] sm:$0xff]  ;;  %v1634_v6 = vld [vmem:[#allocation16 + $0x358] sm:$0xff] }
 0x660   :  { %2418 = vmatprep.subr.mxu1 %v1754_v8  ;;  %2318 = vmatpush1.msra.mxu0 %v1557_v21  ;;  %v1958_v7 = vld [vmem:[#allocation16 + $0xd78] sm:$0xff]  ;;  %v1633_v8 = vld [vmem:[#allocation16 + $0x350] sm:$0xff] }
 0x661   :  { %2419 = vmatpush2.msra.mxu1 %v1753_v9  ;;  %2319 = vmatprep.subr.mxu0 %v1554_v10  ;;  %v1630_v21 = vld [vmem:[#allocation16 + $0x338] sm:$0xff]  ;;  %v1629_v10 = vld [vmem:[#allocation16 + $0x330] sm:$0xff] }
 0x662   :  { %2420 = vmatprep.subr.mxu1 %v1750_v12  ;;  %2320 = vmatpush1.msra.mxu0 %v1553_v24  ;;  %v1954_v9 = vld [vmem:[#allocation16 + $0xd58] sm:$0xff]  ;;  %v1953_v12 = vld [vmem:[#allocation16 + $0xd50] sm:$0xff] }
 0x663   :  { %2421 = vmatpush2.msra.mxu1 %v1749_v26  ;;  %2321 = vmatprep.subr.mxu0 %v1550_v27  ;;  %v1626_v24 = vld [vmem:[#allocation16 + $0x318] sm:$0xff]  ;;  %v1625_v27 = vld [vmem:[#allocation16 + $0x310] sm:$0xff] }
 0x664   :  { %2422 = vmatprep.subr.mxu1 %v1746_v28  ;;  %2322 = vmatpush1.msra.mxu0 %v1549_v29  ;;  %v1950_v26 = vld [vmem:[#allocation16 + $0xd38] sm:$0xff]  ;;  %v1949_v28 = vld [vmem:[#allocation16 + $0xd30] sm:$0xff] }
 0x665   :  { %2423 = vmatpush2.msra.mxu1 %v1745_v30  ;;  %2323 = vmatprep.subr.mxu0 %v1546_v31  ;;  %v1622_v29 = vld [vmem:[#allocation16 + $0x2f8] sm:$0xff]  ;;  %v1621_v31 = vld [vmem:[#allocation16 + $0x2f0] sm:$0xff] }
 0x666   :  { %2424 = vmatprep.subr.mxu1 %v1742_v32  ;;  %2324 = vmatpush1.msra.mxu0 %v1545_v33  ;;  %v1946_v30 = vld [vmem:[#allocation16 + $0xd18] sm:$0xff]  ;;  %v1945_v32 = vld [vmem:[#allocation16 + $0xd10] sm:$0xff] }
 0x667   :  { %2425 = vmatpush2.msra.mxu1 %v1741_v34  ;;  %2325 = vmatprep.subr.mxu0 %v1542_v35  ;;  %v1618_v33 = vld [vmem:[#allocation16 + $0x2d8] sm:$0xff]  ;;  %v1617_v35 = vld [vmem:[#allocation16 + $0x2d0] sm:$0xff] }
 0x668   :  { %2426 = vmatprep.subr.mxu1 %v1738_v36  ;;  %2326 = vmatpush1.msra.mxu0 %v1541_v38  ;;  %v1942_v34 = vld [vmem:[#allocation16 + $0xcf8] sm:$0xff]  ;;  %v1941_v36 = vld [vmem:[#allocation16 + $0xcf0] sm:$0xff] }
 0x669   :  { %2427 = vmatpush2.msra.mxu1 %v1737_v39  ;;  %2327 = vmatprep.subr.mxu0 %v1538_v40  ;;  %v1614_v38 = vld [vmem:[#allocation16 + $0x2b8] sm:$0xff]  ;;  %v1613_v40 = vld [vmem:[#allocation16 + $0x2b0] sm:$0xff] }
 0x66a   :  { %2428 = vmatprep.subr.mxu1 %v1734_v41  ;;  %2328 = vmatpush1.msra.mxu0 %v1537_v43  ;;  %v1938_v39 = vld [vmem:[#allocation16 + $0xcd8] sm:$0xff]  ;;  %v1937_v41 = vld [vmem:[#allocation16 + $0xcd0] sm:$0xff] }
 0x66b   :  { %2429 = vmatpush2.msra.mxu1 %v1733_v44  ;;  %2329 = vmatprep.subr.mxu0 %v1534_v45  ;;  %v1610_v43 = vld [vmem:[#allocation16 + $0x298] sm:$0xff]  ;;  %v1609_v45 = vld [vmem:[#allocation16 + $0x290] sm:$0xff] }
 0x66c   :  { %2430 = vmatprep.subr.mxu1 %v1730_v46  ;;  %2330 = vmatpush1.msra.mxu0 %v1533_v48  ;;  %v1934_v44 = vld [vmem:[#allocation16 + $0xcb8] sm:$0xff]  ;;  %v1933_v46 = vld [vmem:[#allocation16 + $0xcb0] sm:$0xff] }
 0x66d   :  { %2431 = vmatpush2.msra.mxu1 %v1729_v17  ;;  %2331 = vmatprep.subr.mxu0 %v1530_v20  ;;  %v1606_v48 = vld [vmem:[#allocation16 + $0x278] sm:$0xff]  ;;  %v1605_v20 = vld [vmem:[#allocation16 + $0x270] sm:$0xff] }
 0x66e   :  { %2432 = vmatprep.subr.mxu1 %v1726_v22  ;;  %2332 = vmatpush1.msra.mxu0 %v1529_v18  ;;  %v1930_v17 = vld [vmem:[#allocation16 + $0xc98] sm:$0xff]  ;;  %v1929_v22 = vld [vmem:[#allocation16 + $0xc90] sm:$0xff] }
 0x66f   :  { %2433 = vmatpush2.msra.mxu1 %v1725_v49  ;;  %2333 = vmatprep.subr.mxu0 %v1654_v14  ;;  %v1602_v18 = vld [vmem:[#allocation16 + $0x258] sm:$0xff]  ;;  %v1601_v14 = vld [vmem:[#allocation16 + $0x250] sm:$0xff] }
 0x670   :  { %2434 = vmatprep.subr.mxu1 %v1722_v15  ;;  %2334 = vmatpush2.msra.mxu0 %v1653_v50  ;;  %v1926_v49 = vld [vmem:[#allocation16 + $0xc78] sm:$0xff]  ;;  %v1925_v15 = vld [vmem:[#allocation16 + $0xc70] sm:$0xff] }
 0x671   :  { %2435 = vmatpush2.msra.mxu1 %v1721_v51  ;;  %2335 = vmatprep.subr.mxu0 %v1650_v52  ;;  %v1598_v50 = vld [vmem:[#allocation16 + $0x238] sm:$0xff]  ;;  %v1597_v52 = vld [vmem:[#allocation16 + $0x230] sm:$0xff] }
 0x672   :  { %3802 = vmatmul.mubr.msk.f32.vlgmr.msra.gmra.mxu1 %vm5112_vm14, %v4655_v23  ;;  %2514 = vmatprep.subr.mxu1 %v1974_v11  ;;  %v1922_v51 = vld [vmem:[#allocation16 + $0xc58] sm:$0xff]  ;;  %v1921_v11 = vld [vmem:[#allocation16 + $0xc50] sm:$0xff] }
 0x673   :  { %2336 = vmatpush2.msra.mxu0 %v1649_v53  ;;  %2515 = vmatpush1.msra.mxu1 %v1973_v54  ;;  %v1594_v53 = vld [vmem:[#allocation16 + $0x218] sm:$0xff] }
 0x674   :  { %3807 = vmatprep.mubr.msk.f32.mxu1 %vm2001_vm4, %v5142_v37  ;;  %2337 = vmatprep.subr.mxu0 %v1646_v55  ;;  %v1957_v37 = vld [vmem:[#allocation16 + $0xd70] sm:$0xff]  ;;  %v1918_v54 = vld [vmem:[#allocation16 + $0xc38] sm:$0xff] }
 0x675   :  { %2516 = vmatprep.subr.mxu1 %v1970_v56  ;;  %2338 = vmatpush2.msra.mxu0 %v1645_v57  ;;  %v1593_v55 = vld [vmem:[#allocation16 + $0x210] sm:$0xff]  ;;  %v1846_v57 = vld [vmem:[#allocation16 + $0x9f8] sm:$0xff] }
 0x676   :  { %2517 = vmatpush1.msra.mxu1 %v1969_v58  ;;  %2339 = vmatprep.subr.mxu0 %v1642_v59  ;;  %v1917_v56 = vld [vmem:[#allocation16 + $0xc30] sm:$0xff]  ;;  %v1914_v58 = vld [vmem:[#allocation16 + $0xc18] sm:$0xff] }
 0x677   :  { %2518 = vmatprep.subr.mxu1 %v1966_v60  ;;  %2340 = vmatpush2.msra.mxu0 %v1641_v61  ;;  %v1845_v59 = vld [vmem:[#allocation16 + $0x9f0] sm:$0xff]  ;;  %v1842_v61 = vld [vmem:[#allocation16 + $0x9d8] sm:$0xff] }
 0x678   :  { %2519 = vmatpush1.msra.mxu1 %v1965_v62  ;;  %2341 = vmatprep.subr.mxu0 %v1638_v2  ;;  %v1913_v60 = vld [vmem:[#allocation16 + $0xc10] sm:$0xff]  ;;  %v1978_v62 = vld [vmem:[#allocation16 + $0xe18] sm:$0xf] }
 0x679   :  { %2520 = vmatprep.subr.mxu1 %v1962_v16  ;;  %2342 = vmatpush2.msra.mxu0 %v1637_v4  ;;  %v1841_v2 = vld [vmem:[#allocation16 + $0x9d0] sm:$0xff]  ;;  %v1838_v4 = vld [vmem:[#allocation16 + $0x9b8] sm:$0xff] }
 0x67a   :  { %2521 = vmatpush1.msra.mxu1 %v1961_v5  ;;  %2343 = vmatprep.subr.mxu0 %v1634_v6  ;;  %v1977_v16 = vld [vmem:[#allocation16 + $0xe10] sm:$0xf]  ;;  %v2620_v6 = vld [vmem:[#allocation19 + $0xf8] sm:$0xff] }
 0x67b   :  { %2522 = vmatprep.subr.mxu1 %v1958_v7  ;;  %2344 = vmatpush2.msra.mxu0 %v1633_v8  ;;  %v1837_v5 = vld [vmem:[#allocation16 + $0x9b0] sm:$0xff] }
 0x67c   :  { %2523 = vmatpush1.msra.mxu1 %v1957_v37  ;;  %2345 = vmatprep.subr.mxu0 %v1630_v21  ;;  %v1833_v7 = vld [vmem:[#allocation16 + $0x990] sm:$0xff] }
 0x67d   :  { %2524 = vmatprep.subr.mxu1 %v1954_v9  ;;  %2346 = vmatpush2.msra.mxu0 %v1629_v10  ;;  %v2619_v8 = vld [vmem:[#allocation19 + $0xf0] sm:$0xff]  ;;  %v2618_v37 = vld [vmem:[#allocation19 + $0xe8] sm:$0xff]  ;;  %v2617_v9 = vld [vmem:[#allocation19 + $0xe0] sm:$0xff] }
 0x67e   :  { %2525 = vmatpush1.msra.mxu1 %v1953_v12  ;;  %2347 = vmatprep.subr.mxu0 %v1626_v24  ;;  %v1829_v21 = vld [vmem:[#allocation16 + $0x970] sm:$0xff]  ;;  %v1826_v10 = vld [vmem:[#allocation16 + $0x958] sm:$0xff] }
 0x67f   :  { %2526 = vmatprep.subr.mxu1 %v1950_v26  ;;  %2348 = vmatpush2.msra.mxu0 %v1625_v27  ;;  %v2616_v12 = vld [vmem:[#allocation19 + $0xd8] sm:$0xff]  ;;  %v1825_v24 = vld [vmem:[#allocation16 + $0x950] sm:$0xff] }
 0x680   :  { %2527 = vmatpush1.msra.mxu1 %v1949_v28  ;;  %2349 = vmatprep.subr.mxu0 %v1622_v29  ;;  %v2615_v26 = vld [vmem:[#allocation19 + $0xd0] sm:$0xff]  ;;  %v2613_v29 = vld [vmem:[#allocation19 + $0xc0] sm:$0xff] }
 0x681   :  { %2528 = vmatprep.subr.mxu1 %v1946_v30  ;;  %2350 = vmatpush2.msra.mxu0 %v1621_v31  ;;  %v1822_v27 = vld [vmem:[#allocation16 + $0x938] sm:$0xff]  ;;  %v1821_v28 = vld [vmem:[#allocation16 + $0x930] sm:$0xff] }
 0x682   :  { %2529 = vmatpush1.msra.mxu1 %v1945_v32  ;;  %2351 = vmatprep.subr.mxu0 %v1618_v33  ;;  %v1818_v30 = vld [vmem:[#allocation16 + $0x918] sm:$0xff]  ;;  %v1817_v32 = vld [vmem:[#allocation16 + $0x910] sm:$0xff] }
 0x683   :  { %2530 = vmatprep.subr.mxu1 %v1942_v34  ;;  %2352 = vmatpush2.msra.mxu0 %v1617_v35  ;;  %v2612_v31 = vld [vmem:[#allocation19 + $0xb8] sm:$0xff]  ;;  %v2611_v33 = vld [vmem:[#allocation19 + $0xb0] sm:$0xff]  ;;  %v2610_v35 = vld [vmem:[#allocation19 + $0xa8] sm:$0xff] }
 0x684   :  { %2531 = vmatpush1.msra.mxu1 %v1941_v36  ;;  %2353 = vmatprep.subr.mxu0 %v1614_v38  ;;  %v1814_v34 = vld [vmem:[#allocation16 + $0x8f8] sm:$0xff]  ;;  %v1813_v36 = vld [vmem:[#allocation16 + $0x8f0] sm:$0xff]  ;;  %v2609_v38 = vld [vmem:[#allocation19 + $0xa0] sm:$0xff] }
 0x685   :  { %2532 = vmatprep.subr.mxu1 %v1938_v39  ;;  %2354 = vmatpush2.msra.mxu0 %v1613_v40  ;;  %v1810_v39 = vld [vmem:[#allocation16 + $0x8d8] sm:$0xff] }
 0x686   :  { %2533 = vmatpush1.msra.mxu1 %v1937_v41  ;;  %2355 = vmatprep.subr.mxu0 %v1610_v43  ;;  %v2608_v40 = vld [vmem:[#allocation19 + $0x98] sm:$0xff]  ;;  %v1809_v41 = vld [vmem:[#allocation16 + $0x8d0] sm:$0xff] }
 0x687   :  { %2534 = vmatprep.subr.mxu1 %v1934_v44  ;;  %2356 = vmatpush2.msra.mxu0 %v1609_v45  ;;  %v2607_v43 = vld [vmem:[#allocation19 + $0x90] sm:$0xff]  ;;  %v2606_v45 = vld [vmem:[#allocation19 + $0x88] sm:$0xff] }
 0x688   :  { %2535 = vmatpush1.msra.mxu1 %v1933_v46  ;;  %2357 = vmatprep.subr.mxu0 %v1606_v48  ;;  %v1806_v44 = vld [vmem:[#allocation16 + $0x8b8] sm:$0xff]  ;;  %v1805_v46 = vld [vmem:[#allocation16 + $0x8b0] sm:$0xff]  ;;  %v2605_v48 = vld [vmem:[#allocation19 + $0x80] sm:$0xff] }
 0x689   :  { %2536 = vmatprep.subr.mxu1 %v1930_v17  ;;  %2358 = vmatpush2.msra.mxu0 %v1605_v20  ;;  %v1802_v17 = vld [vmem:[#allocation16 + $0x898] sm:$0xff] }
 0x68a   :  { %2537 = vmatpush1.msra.mxu1 %v1929_v22  ;;  %2359 = vmatprep.subr.mxu0 %v1602_v18  ;;  %v2604_v20 = vld [vmem:[#allocation19 + $0x78] sm:$0xff]  ;;  %v1801_v22 = vld [vmem:[#allocation16 + $0x890] sm:$0xff] }
 0x68b   :  { %2538 = vmatprep.subr.mxu1 %v1926_v49  ;;  %2360 = vmatpush2.msra.mxu0 %v1601_v14  ;;  %v2603_v18 = vld [vmem:[#allocation19 + $0x70] sm:$0xff]  ;;  %v2602_v14 = vld [vmem:[#allocation19 + $0x68] sm:$0xff] }
 0x68c   :  { %2539 = vmatpush1.msra.mxu1 %v1925_v15  ;;  %2361 = vmatprep.subr.mxu0 %v1598_v50  ;;  %v1798_v49 = vld [vmem:[#allocation16 + $0x878] sm:$0xff]  ;;  %v1797_v15 = vld [vmem:[#allocation16 + $0x870] sm:$0xff]  ;;  %v2601_v50 = vld [vmem:[#allocation19 + $0x60] sm:$0xff] }
 0x68d   :  { %2540 = vmatprep.subr.mxu1 %v1922_v51  ;;  %2362 = vmatpush2.msra.mxu0 %v1597_v52  ;;  %v1794_v51 = vld [vmem:[#allocation16 + $0x858] sm:$0xff] }
 0x68e   :  { %2541 = vmatpush1.msra.mxu1 %v1921_v11  ;;  %2363 = vmatprep.subr.mxu0 %v1594_v53  ;;  %v2600_v52 = vld [vmem:[#allocation19 + $0x58] sm:$0xff]  ;;  %v1793_v11 = vld [vmem:[#allocation16 + $0x850] sm:$0xff] }
 0x68f   :  { %2542 = vmatprep.subr.mxu1 %v1918_v54  ;;  %2364 = vmatpush2.msra.mxu0 %v1593_v55  ;;  %v2599_v54 = vld [vmem:[#allocation19 + $0x50] sm:$0xff] }
 0x690   :  { %2543 = vmatpush1.msra.mxu1 %v1917_v56  ;;  %3800 = vmatmul.mubr.msk.f32.vlgmr.msra.gmra.mxu0 %vm5086_vm11, %v4655_v23  ;;  %v1790_v55 = vld [vmem:[#allocation16 + $0x838] sm:$0xff]  ;;  %v2598_v56 = vld [vmem:[#allocation19 + $0x48] sm:$0xff]  ;;  %vm3304_vm11 = vcmask 179200  }
 0x691   :  { %2443 = vmatprep.subr.mxu0 %v1846_v57  ;;  %2544 = vmatprep.subr.mxu1 %v1914_v58  ;;  %v1789_v57 = vld [vmem:[#allocation16 + $0x830] sm:$0xff] }
 0x692   :  { %2444 = vmatpush1.msra.mxu0 %v1845_v59  ;;  %3803 = vmatprep.mubr.msk.f32.mxu0 %vm5122_vm15, %v4655_v23  ;;  %v2597_v59 = vld [vmem:[#allocation19 + $0x40] sm:$0xff] }
 0x693   :  { %2545 = vmatpush1.msra.mxu1 %v1913_v60  ;;  %2445 = vmatprep.subr.mxu0 %v1842_v61  ;;  %v1786_v60 = vld [vmem:[#allocation16 + $0x818] sm:$0xff] }
 0x694   :  { %3805 = vmatprep.subr.msk.mxu1 %vm604_vm2, %v1978_v62  ;;  %2446 = vmatpush1.msra.mxu0 %v1841_v2  ;;  %v2596_v62 = vld [vmem:[#allocation19 + $0x38] sm:$0xff]  ;;  %v1785_v2 = vld [vmem:[#allocation16 + $0x810] sm:$0xff] }
 0x695   :  { %3806 = vmatpush2.msk.msra.mxu1 %vm604_vm2, %v1977_v16  ;;  %2447 = vmatprep.subr.mxu0 %v1838_v4  ;;  %v2595_v16 = vld [vmem:[#allocation19 + $0x30] sm:$0xff] }
 0x696   :  { %3808 = vmatmul.mubr.msk.f32.vlgmr.msra.gmra.mxu1 %vm5145_vm5, %v4655_v23  ;;  %2448 = vmatpush1.msra.mxu0 %v1837_v5  ;;  %v1910_v4 = vld [vmem:[#allocation16 + $0xbf8] sm:$0xff]  ;;  %v2594_v5 = vld [vmem:[#allocation19 + $0x28] sm:$0xff] }
 0x697   :  { %2449 = vmatprep.subr.mxu0 %v1834_v47  ;;  %2729 = vmatprep.subr.mxu1 %v2620_v6  ;;  %v1909_v47 = vld [vmem:[#allocation16 + $0xbf0] sm:$0xff]  ;;  %v2593_v6 = vld [vmem:[#allocation19 + $0x20] sm:$0xff] }
 0x698   :  { %2450 = vmatpush1.msra.mxu0 %v1833_v7  ;;  %2730 = vmatpush1.msra.mxu1 %v2619_v8  ;;  %v1906_v7 = vld [vmem:[#allocation16 + $0xbd8] sm:$0xff] }
 0x699   :  { %2451 = vmatprep.subr.mxu0 %v1830_v19  ;;  %2731 = vmatprep.subr.mxu1 %v2618_v37  ;;  %v2592_v8 = vld [vmem:[#allocation19 + $0x18] sm:$0xff]  ;;  %v1905_v19 = vld [vmem:[#allocation16 + $0xbd0] sm:$0xff] }
 0x69a   :  { %2452 = vmatpush1.msra.mxu0 %v1829_v21  ;;  %2732 = vmatpush1.msra.mxu1 %v2617_v9  ;;  %v2591_v37 = vld [vmem:[#allocation19 + $0x10] sm:$0xff]  ;;  %v2590_v9 = vld [vmem:[#allocation19 + $0x8] sm:$0xff] }
 0x69b   :  { %2453 = vmatprep.subr.mxu0 %v1826_v10  ;;  %2733 = vmatprep.subr.mxu1 %v2616_v12  ;;  %v1902_v21 = vld [vmem:[#allocation16 + $0xbb8] sm:$0xff]  ;;  %v1901_v10 = vld [vmem:[#allocation16 + $0xbb0] sm:$0xff]  ;;  %v2589_v12 = vld [vmem:[#allocation19] sm:$0xff] }
 0x69c   :  { %2454 = vmatpush1.msra.mxu0 %v1825_v24  ;;  %2734 = vmatpush1.msra.mxu1 %v2615_v26  ;;  %v1898_v24 = vld [vmem:[#allocation16 + $0xb98] sm:$0xff] }
 0x69d   :  { %2455 = vmatprep.subr.mxu0 %v1822_v27  ;;  %2735 = vmatprep.subr.mxu1 %v2614_v42  ;;  %v2652_v26 = vld [vmem:[#allocation19 + $0x1f8] sm:$0xff]  ;;  %v1897_v27 = vld [vmem:[#allocation16 + $0xb90] sm:$0xff] }
 0x69e   :  { %2456 = vmatpush1.msra.mxu0 %v1821_v28  ;;  %2736 = vmatpush1.msra.mxu1 %v2613_v29  ;;  %v2651_v42 = vld [vmem:[#allocation19 + $0x1f0] sm:$0xff]  ;;  %v2650_v29 = vld [vmem:[#allocation19 + $0x1e8] sm:$0xff] }
 0x69f   :  { %2457 = vmatprep.subr.mxu0 %v1818_v30  ;;  %2737 = vmatprep.subr.mxu1 %v2612_v31  ;;  %v1894_v28 = vld [vmem:[#allocation16 + $0xb78] sm:$0xff]  ;;  %v1893_v30 = vld [vmem:[#allocation16 + $0xb70] sm:$0xff]  ;;  %v2649_v31 = vld [vmem:[#allocation19 + $0x1e0] sm:$0xff] }
 0x6a0   :  { %2458 = vmatpush1.msra.mxu0 %v1817_v32  ;;  %2738 = vmatpush1.msra.mxu1 %v2611_v33  ;;  %v1890_v32 = vld [vmem:[#allocation16 + $0xb58] sm:$0xff] }
 0x6a1   :  { %2459 = vmatprep.subr.mxu0 %v1814_v34  ;;  %2739 = vmatprep.subr.mxu1 %v2610_v35  ;;  %v2648_v33 = vld [vmem:[#allocation19 + $0x1d8] sm:$0xff]  ;;  %v1889_v34 = vld [vmem:[#allocation16 + $0xb50] sm:$0xff] }
 0x6a2   :  { %2460 = vmatpush1.msra.mxu0 %v1813_v36  ;;  %2740 = vmatpush1.msra.mxu1 %v2609_v38  ;;  %v2647_v35 = vld [vmem:[#allocation19 + $0x1d0] sm:$0xff]  ;;  %v2646_v38 = vld [vmem:[#allocation19 + $0x1c8] sm:$0xff] }
 0x6a3   :  { %2461 = vmatprep.subr.mxu0 %v1810_v39  ;;  %2741 = vmatprep.subr.mxu1 %v2608_v40  ;;  %v1886_v36 = vld [vmem:[#allocation16 + $0xb38] sm:$0xff]  ;;  %v1885_v39 = vld [vmem:[#allocation16 + $0xb30] sm:$0xff]  ;;  %v2645_v40 = vld [vmem:[#allocation19 + $0x1c0] sm:$0xff] }
 0x6a4   :  { %2462 = vmatpush1.msra.mxu0 %v1809_v41  ;;  %2742 = vmatpush1.msra.mxu1 %v2607_v43  ;;  %v1882_v41 = vld [vmem:[#allocation16 + $0xb18] sm:$0xff] }
 0x6a5   :  { %2463 = vmatprep.subr.mxu0 %v1806_v44  ;;  %2743 = vmatprep.subr.mxu1 %v2606_v45  ;;  %v2644_v43 = vld [vmem:[#allocation19 + $0x1b8] sm:$0xff]  ;;  %v1881_v44 = vld [vmem:[#allocation16 + $0xb10] sm:$0xff] }
 0x6a6   :  { %2464 = vmatpush1.msra.mxu0 %v1805_v46  ;;  %2744 = vmatpush1.msra.mxu1 %v2605_v48  ;;  %v2643_v45 = vld [vmem:[#allocation19 + $0x1b0] sm:$0xff]  ;;  %v2642_v48 = vld [vmem:[#allocation19 + $0x1a8] sm:$0xff] }
 0x6a7   :  { %2465 = vmatprep.subr.mxu0 %v1802_v17  ;;  %2745 = vmatprep.subr.mxu1 %v2604_v20  ;;  %v1878_v46 = vld [vmem:[#allocation16 + $0xaf8] sm:$0xff]  ;;  %v1877_v17 = vld [vmem:[#allocation16 + $0xaf0] sm:$0xff]  ;;  %v2641_v20 = vld [vmem:[#allocation19 + $0x1a0] sm:$0xff] }
 0x6a8   :  { %2466 = vmatpush1.msra.mxu0 %v1801_v22  ;;  %2746 = vmatpush1.msra.mxu1 %v2603_v18  ;;  %v1874_v22 = vld [vmem:[#allocation16 + $0xad8] sm:$0xff] }
 0x6a9   :  { %2467 = vmatprep.subr.mxu0 %v1798_v49  ;;  %v3904_v53 = vpop.f32.mrf.mxu0  ;;  %2747 = vmatprep.subr.mxu1 %v2602_v14  ;;  %v2640_v18 = vld [vmem:[#allocation19 + $0x198] sm:$0xff]  ;;  %v1873_v49 = vld [vmem:[#allocation16 + $0xad0] sm:$0xff] }
 0x6aa   :  { %2468 = vmatpush1.msra.mxu0 %v1797_v15  ;;  %2748 = vmatpush1.msra.mxu1 %v2601_v50  ;;  %v2639_v14 = vld [vmem:[#allocation19 + $0x190] sm:$0xff]  ;;  %v2638_v50 = vld [vmem:[#allocation19 + $0x188] sm:$0xff] }
 0x6ab   :  { %2469 = vmatprep.subr.mxu0 %v1794_v51  ;;  %v3905_v58 = vpop.f32.mrf.mxu0  ;;  %2749 = vmatprep.subr.mxu1 %v2600_v52  ;;  %v1870_v15 = vld [vmem:[#allocation16 + $0xab8] sm:$0xff]  ;;  %v1869_v51 = vld [vmem:[#allocation16 + $0xab0] sm:$0xff]  ;;  %v2637_v52 = vld [vmem:[#allocation19 + $0x180] sm:$0xff] }
 0x6ac   :  { %2470 = vmatpush1.msra.mxu0 %v1793_v11  ;;  %v5174_v61 = vadd.f32 %v3905_v58, %v3904_v53  ;;  %2750 = vmatpush1.msra.mxu1 %v2599_v54  ;;  %v1866_v11 = vld [vmem:[#allocation16 + $0xa98] sm:$0xff]  ;;  %v1865_v54 = vld [vmem:[#allocation16 + $0xa90] sm:$0xff] }
 0x6ad   :  { %2471 = vmatprep.subr.mxu0 %v1790_v55  ;;  %2751 = vmatprep.subr.mxu1 %v2598_v56  ;;  %v2636_v53 = vld [vmem:[#allocation19 + $0x178] sm:$0xff]  ;;  %v2635_v55 = vld [vmem:[#allocation19 + $0x170] sm:$0xff] }
 0x6ae   :  { %2472 = vmatpush1.msra.mxu0 %v1789_v57  ;;  %2752 = vmatpush1.msra.mxu1 %v2597_v59  ;;  %v1862_v56 = vld [vmem:[#allocation16 + $0xa78] sm:$0xff]  ;;  %v2634_v57 = vld [vmem:[#allocation19 + $0x168] sm:$0xff]  ;;  %v2633_v59 = vld [vmem:[#allocation19 + $0x160] sm:$0xff] }
 0x6af   :  { %2473 = vmatprep.subr.mxu0 %v1786_v60  ;;  %2753 = vmatprep.subr.mxu1 %v2596_v62  ;;  %v1861_v58 = vld [vmem:[#allocation16 + $0xa70] sm:$0xff]  ;;  %v1858_v60 = vld [vmem:[#allocation16 + $0xa58] sm:$0xff] }
 0x6b0   :  { %2474 = vmatpush1.msra.mxu0 %v1785_v2  ;;  %2754 = vmatpush1.msra.mxu1 %v2595_v16  ;;  %v2632_v62 = vld [vmem:[#allocation19 + $0x158] sm:$0xff]  ;;  %v1857_v2 = vld [vmem:[#allocation16 + $0xa50] sm:$0xff] }
 0x6b1   :  { %2475 = vmatprep.subr.mxu0 %v1910_v4  ;;  %2755 = vmatprep.subr.mxu1 %v2594_v5  ;;  %v2631_v16 = vld [vmem:[#allocation19 + $0x150] sm:$0xff]  ;;  %v2630_v5 = vld [vmem:[#allocation19 + $0x148] sm:$0xff] }
 0x6b2   :  { %2476 = vmatpush2.msra.mxu0 %v1909_v47  ;;  %2756 = vmatpush1.msra.mxu1 %v2593_v6  ;;  %v1854_v4 = vld [vmem:[#allocation16 + $0xa38] sm:$0xff]  ;;  %v1853_v47 = vld [vmem:[#allocation16 + $0xa30] sm:$0xff]  ;;  %v2629_v6 = vld [vmem:[#allocation19 + $0x140] sm:$0xff] }
 0x6b3   :  { %2477 = vmatprep.subr.mxu0 %v1906_v7  ;;  %2757 = vmatprep.subr.mxu1 %v2592_v8  ;;  %v1850_v7 = vld [vmem:[#allocation16 + $0xa18] sm:$0xff] }
 0x6b4   :  { %2478 = vmatpush2.msra.mxu0 %v1905_v19  ;;  %2758 = vmatpush1.msra.mxu1 %v2591_v37  ;;  %v2628_v8 = vld [vmem:[#allocation19 + $0x138] sm:$0xff]  ;;  %v1849_v19 = vld [vmem:[#allocation16 + $0xa10] sm:$0xff] }
 0x6b5   :  { %2479 = vmatprep.subr.mxu0 %v1902_v21  ;;  %2759 = vmatprep.subr.mxu1 %v2590_v9  ;;  %v2627_v37 = vld [vmem:[#allocation19 + $0x130] sm:$0xff]  ;;  %v2626_v21 = vld [vmem:[#allocation19 + $0x128] sm:$0xff]  ;;  %v2625_v9 = vld [vmem:[#allocation19 + $0x120] sm:$0xff] }
 0x6b6   :  { %2480 = vmatpush2.msra.mxu0 %v1901_v10  ;;  %2760 = vmatpush1.msra.mxu1 %v2589_v12  ;;  %v2624_v10 = vld [vmem:[#allocation19 + $0x118] sm:$0xff]  ;;  %v2623_v12 = vld [vmem:[#allocation19 + $0x110] sm:$0xff] }
 0x6b7   :  { %2481 = vmatprep.subr.mxu0 %v1898_v24  ;;  %2761 = vmatprep.subr.mxu1 %v2652_v26  ;;  %v2622_v24 = vld [vmem:[#allocation19 + $0x108] sm:$0xff]  ;;  %v2621_v26 = vld [vmem:[#allocation19 + $0x100] sm:$0xff] }
 0x6b8   :  { %2482 = vmatpush2.msra.mxu0 %v1897_v27  ;;  %2762 = vmatpush2.msra.mxu1 %v2651_v42  ;;  %v2684_v27 = vld [vmem:[#allocation19 + $0x2f8] sm:$0xff]  ;;  %v2683_v42 = vld [vmem:[#allocation19 + $0x2f0] sm:$0xff] }
 0x6b9   :  { %2483 = vmatprep.subr.mxu0 %v1894_v28  ;;  %2763 = vmatprep.subr.mxu1 %v2650_v29  ;;  %v2682_v28 = vld [vmem:[#allocation19 + $0x2e8] sm:$0xff]  ;;  %v2681_v29 = vld [vmem:[#allocation19 + $0x2e0] sm:$0xff] }
 0x6ba   :  { %2484 = vmatpush2.msra.mxu0 %v1893_v30  ;;  %2764 = vmatpush2.msra.mxu1 %v2649_v31  ;;  %v2680_v30 = vld [vmem:[#allocation19 + $0x2d8] sm:$0xff]  ;;  %v2679_v31 = vld [vmem:[#allocation19 + $0x2d0] sm:$0xff] }
 0x6bb   :  { %2485 = vmatprep.subr.mxu0 %v1890_v32  ;;  %2765 = vmatprep.subr.mxu1 %v2648_v33  ;;  %v2676_v32 = vld [vmem:[#allocation19 + $0x2b8] sm:$0xff]  ;;  %v2675_v33 = vld [vmem:[#allocation19 + $0x2b0] sm:$0xff] }
 0x6bc   :  { %2486 = vmatpush2.msra.mxu0 %v1889_v34  ;;  %2766 = vmatpush2.msra.mxu1 %v2647_v35  ;;  %v2674_v34 = vld [vmem:[#allocation19 + $0x2a8] sm:$0xff]  ;;  %v2673_v35 = vld [vmem:[#allocation19 + $0x2a0] sm:$0xff] }
 0x6bd   :  { %2487 = vmatprep.subr.mxu0 %v1886_v36  ;;  %2767 = vmatprep.subr.mxu1 %v2646_v38  ;;  %v2672_v36 = vld [vmem:[#allocation19 + $0x298] sm:$0xff]  ;;  %v2671_v38 = vld [vmem:[#allocation19 + $0x290] sm:$0xff] }
 0x6be   :  { %2488 = vmatpush2.msra.mxu0 %v1885_v39  ;;  %2768 = vmatpush2.msra.mxu1 %v2645_v40  ;;  %v2670_v39 = vld [vmem:[#allocation19 + $0x288] sm:$0xff]  ;;  %v2669_v40 = vld [vmem:[#allocation19 + $0x280] sm:$0xff] }
 0x6bf   :  { %2489 = vmatprep.subr.mxu0 %v1882_v41  ;;  %2769 = vmatprep.subr.mxu1 %v2644_v43  ;;  %v2668_v41 = vld [vmem:[#allocation19 + $0x278] sm:$0xff]  ;;  %v2667_v43 = vld [vmem:[#allocation19 + $0x270] sm:$0xff] }
 0x6c0   :  { %2490 = vmatpush2.msra.mxu0 %v1881_v44  ;;  %2770 = vmatpush2.msra.mxu1 %v2643_v45  ;;  %v2666_v44 = vld [vmem:[#allocation19 + $0x268] sm:$0xff]  ;;  %v2665_v45 = vld [vmem:[#allocation19 + $0x260] sm:$0xff] }
 0x6c1   :  { %2491 = vmatprep.subr.mxu0 %v1878_v46  ;;  %2771 = vmatprep.subr.mxu1 %v2642_v48  ;;  %v2664_v46 = vld [vmem:[#allocation19 + $0x258] sm:$0xff]  ;;  %v2663_v48 = vld [vmem:[#allocation19 + $0x250] sm:$0xff] }
 0x6c2   :  { %2492 = vmatpush2.msra.mxu0 %v1877_v17  ;;  %2772 = vmatpush2.msra.mxu1 %v2641_v20  ;;  %v2662_v17 = vld [vmem:[#allocation19 + $0x248] sm:$0xff]  ;;  %v2661_v20 = vld [vmem:[#allocation19 + $0x240] sm:$0xff] }
 0x6c3   :  { %2493 = vmatprep.subr.mxu0 %v1874_v22  ;;  %2773 = vmatprep.subr.mxu1 %v2640_v18  ;;  %v2660_v22 = vld [vmem:[#allocation19 + $0x238] sm:$0xff]  ;;  %v2659_v18 = vld [vmem:[#allocation19 + $0x230] sm:$0xff] }
 0x6c4   :  { %2494 = vmatpush2.msra.mxu0 %v1873_v49  ;;  %2774 = vmatpush2.msra.mxu1 %v2639_v14  ;;  %v2658_v49 = vld [vmem:[#allocation19 + $0x228] sm:$0xff]  ;;  %v2657_v14 = vld [vmem:[#allocation19 + $0x220] sm:$0xff] }
 0x6c5   :  { %2495 = vmatprep.subr.mxu0 %v1870_v15  ;;  %2775 = vmatprep.subr.mxu1 %v2638_v50  ;;  %v2656_v15 = vld [vmem:[#allocation19 + $0x218] sm:$0xff]  ;;  %v2655_v50 = vld [vmem:[#allocation19 + $0x210] sm:$0xff] }
 0x6c6   :  { %2496 = vmatpush2.msra.mxu0 %v1869_v51  ;;  %2776 = vmatpush2.msra.mxu1 %v2637_v52  ;;  %v2654_v51 = vld [vmem:[#allocation19 + $0x208] sm:$0xff]  ;;  %v2653_v52 = vld [vmem:[#allocation19 + $0x200] sm:$0xff] }
 0x6c7   :  { %2497 = vmatprep.subr.mxu0 %v1866_v11  ;;  %2777 = vmatprep.subr.mxu1 %v2636_v53  ;;  %v2716_v11 = vld [vmem:[#allocation19 + $0x3f8] sm:$0xff]  ;;  %v2715_v53 = vld [vmem:[#allocation19 + $0x3f0] sm:$0xff] }
 0x6c8   :  { %2498 = vmatpush2.msra.mxu0 %v1865_v54  ;;  %2778 = vmatpush2.msra.mxu1 %v2635_v55  ;;  %v2714_v54 = vld [vmem:[#allocation19 + $0x3e8] sm:$0xff]  ;;  %v2713_v55 = vld [vmem:[#allocation19 + $0x3e0] sm:$0xff] }
 0x6c9   :  { %2499 = vmatprep.subr.mxu0 %v1862_v56  ;;  %2779 = vmatprep.subr.mxu1 %v2634_v57  ;;  %v2712_v56 = vld [vmem:[#allocation19 + $0x3d8] sm:$0xff]  ;;  %v2711_v57 = vld [vmem:[#allocation19 + $0x3d0] sm:$0xff] }
 0x6ca   :  { %2500 = vmatpush2.msra.mxu0 %v1861_v58  ;;  %2780 = vmatpush2.msra.mxu1 %v2633_v59  ;;  %v2710_v58 = vld [vmem:[#allocation19 + $0x3c8] sm:$0xff]  ;;  %v2709_v59 = vld [vmem:[#allocation19 + $0x3c0] sm:$0xff] }
 0x6cb   :  { %2501 = vmatprep.subr.mxu0 %v1858_v60  ;;  %2781 = vmatprep.subr.mxu1 %v2632_v62  ;;  %v2708_v60 = vld [vmem:[#allocation19 + $0x3b8] sm:$0xff]  ;;  %v2707_v62 = vld [vmem:[#allocation19 + $0x3b0] sm:$0xff] }
 0x6cc   :  { %2502 = vmatpush2.msra.mxu0 %v1857_v2  ;;  %2782 = vmatpush2.msra.mxu1 %v2631_v16  ;;  %v2706_v2 = vld [vmem:[#allocation19 + $0x3a8] sm:$0xff]  ;;  %v2705_v16 = vld [vmem:[#allocation19 + $0x3a0] sm:$0xff] }
 0x6cd   :  { %2503 = vmatprep.subr.mxu0 %v1854_v4  ;;  %2783 = vmatprep.subr.mxu1 %v2630_v5  ;;  %v2083_v4 = vpop.f32.mrf.mxu1  ;;  %v2704_v5 = vld [vmem:[#allocation19 + $0x398] sm:$0xff] }
 0x6ce   :  { %2504 = vmatpush2.msra.mxu0 %v1853_v47  ;;  %2784 = vmatpush2.msra.mxu1 %v2629_v6  ;;  %v5179_v47 = vld [vmem:[#allocation17] sm:$0xf]  ;;  %v2703_v6 = vld [vmem:[#allocation19 + $0x390] sm:$0xff] }
 0x6cf   :  { %2505 = vmatprep.subr.mxu0 %v1850_v7  ;;  %2785 = vmatprep.subr.mxu1 %v2628_v8  ;;  %v2702_v7 = vld [vmem:[#allocation19 + $0x388] sm:$0xff]  ;;  %v2701_v8 = vld [vmem:[#allocation19 + $0x380] sm:$0xff] }
 0x6d0   :  { %2506 = vmatpush2.msra.mxu0 %v1849_v19  ;;  %2786 = vmatpush2.msra.mxu1 %v2627_v37  ;;  %v1984_v19 = vrot.slane %v5179_v47, %v4898_v1  ;;  %v2085_v37 = vpop.f32.mrf.mxu1 }
 0x6d1   :  { %3804 = vmatmul.mubr.msk.f32.vlgmr.msra.gmra.mxu0 %vm5126_vm0, %v4655_v23  ;;  %2787 = vmatprep.subr.mxu1 %v2626_v21  ;;  %v2678_v23 = vld [vmem:[#allocation19 + $0x2c8] sm:$0xff] }
 0x6d2   :  { %2788 = vmatpush2.msra.mxu1 %v2625_v9  ;;  %2800 = vmatprep.subr.mxu0 %v2684_v27  ;;  %v2700_v9 = vld [vmem:[#allocation19 + $0x378] sm:$0xff]  ;;  %v2697_v27 = vld [vmem:[#allocation19 + $0x360] sm:$0xff] }
 0x6d3   :  { %2789 = vmatprep.subr.mxu1 %v2624_v10  ;;  %2801 = vmatpush1.msra.mxu0 %v2683_v42  ;;  %v1988_v10 = vrot.slane %v5179_v47, %v4901_v3  ;;  %v2084_v42 = vadd.f32 %v2083_v4, %v1984_v19 }
 0x6d4   :  { %2790 = vmatpush2.msra.mxu1 %v2623_v12  ;;  %2802 = vmatprep.subr.mxu0 %v2682_v28  ;;  %v2699_v12 = vld [vmem:[#allocation19 + $0x370] sm:$0xff] }
 0x6d5   :  { %2791 = vmatprep.subr.mxu1 %v2622_v24  ;;  %2803 = vmatpush1.msra.mxu0 %v2681_v29  ;;  %v2696_v29 = vld [vmem:[#allocation19 + $0x358] sm:$0xff] }
 0x6d6   :  { %2792 = vmatpush2.msra.mxu1 %v2621_v26  ;;  %2804 = vmatprep.subr.mxu0 %v2680_v30  ;;  %v2698_v26 = vld [vmem:[#allocation19 + $0x368] sm:$0xff]  ;;  %v2086_v30 = vadd.f32 %v2085_v37, %v1988_v10 }
 0x6d7   :  { %2805 = vmatpush1.msra.mxu0 %v2679_v31  ;;  %v2695_v31 = vld [vmem:[#allocation19 + $0x350] sm:$0xff] }
 0x6d8   :  { %2806 = vmatprep.subr.mxu0 %v2678_v23 }
 0x6d9   :  { %2807 = vmatpush1.msra.mxu0 %v2677_v25 }
 0x6da   :  { %2808 = vmatprep.subr.mxu0 %v2676_v32 }
 0x6db   :  { %2809 = vmatpush1.msra.mxu0 %v2675_v33 }
 0x6dc   :  { %2810 = vmatprep.subr.mxu0 %v2674_v34 }
 0x6dd   :  { %2811 = vmatpush1.msra.mxu0 %v2673_v35 }
 0x6de   :  { %2812 = vmatprep.subr.mxu0 %v2672_v36 }
 0x6df   :  { %2813 = vmatpush1.msra.mxu0 %v2671_v38 }
 0x6e0   :  { %2814 = vmatprep.subr.mxu0 %v2670_v39 }
 0x6e1   :  { %2815 = vmatpush1.msra.mxu0 %v2669_v40  ;;  %v2694_v40 = vld [vmem:[#allocation19 + $0x348] sm:$0xff] }
 0x6e2   :  { %2816 = vmatprep.subr.mxu0 %v2668_v41  ;;  %v2693_v41 = vld [vmem:[#allocation19 + $0x340] sm:$0xff] }
 0x6e3   :  { %2817 = vmatpush1.msra.mxu0 %v2667_v43 }
 0x6e4   :  { %2818 = vmatprep.subr.mxu0 %v2666_v44  ;;  %v2692_v44 = vld [vmem:[#allocation19 + $0x338] sm:$0xff] }
 0x6e5   :  { %2819 = vmatpush1.msra.mxu0 %v2665_v45 }
 0x6e6   :  { %2820 = vmatprep.subr.mxu0 %v2664_v46  ;;  %v2691_v46 = vld [vmem:[#allocation19 + $0x330] sm:$0xff] }
 0x6e7   :  { %2821 = vmatpush1.msra.mxu0 %v2663_v48  ;;  %v2690_v48 = vld [vmem:[#allocation19 + $0x328] sm:$0xff] }
 0x6e8   :  { %2822 = vmatprep.subr.mxu0 %v2662_v17  ;;  %v2689_v17 = vld [vmem:[#allocation19 + $0x320] sm:$0xff] }
 0x6e9   :  { %2823 = vmatpush1.msra.mxu0 %v2661_v20  ;;  %v2688_v20 = vld [vmem:[#allocation19 + $0x318] sm:$0xff] }
 0x6ea   :  { %2824 = vmatprep.subr.mxu0 %v2660_v22  ;;  %v2154_v21 = vpop.f32.mrf.mxu0  ;;  %v2687_v22 = vld [vmem:[#allocation19 + $0x310] sm:$0xff] }
 0x6eb   :  { %2825 = vmatpush1.msra.mxu0 %v2659_v18  ;;  %v2155_v23 = vadd.f32 %v2154_v21, %v2084_v42  ;;  %v2686_v18 = vld [vmem:[#allocation19 + $0x308] sm:$0xff] }
 0x6ec   :  { %2826 = vmatprep.subr.mxu0 %v2658_v49  ;;  %v2156_v28 = vpop.f32.mrf.mxu0  ;;  %v2685_v49 = vld [vmem:[#allocation19 + $0x300] sm:$0xff] }
 0x6ed   :  { %2827 = vmatpush1.msra.mxu0 %v2657_v14  ;;  %v2157_v32 = vadd.f32 %v2156_v28, %v2086_v30  ;;  %v2904_v14 = vld [vmem:[%s5748_s15 + $0xf8] sm:$0xff]  ;;  %v2898_v28 = vld [vmem:[%s5748_s15 + $0xc8] sm:$0xff]  ;;  %v2897_v30 = vld [vmem:[%s5748_s15 + $0xc0] sm:$0xff] }
 0x6ee   :  { %2828 = vmatprep.subr.mxu0 %v2656_v15  ;;  %v2888_v15 = vld [vmem:[%s5748_s15 + $0x78] sm:$0xff]  ;;  %3907 = vmatprep.subr.mxu1 %v2904_v14 }
 0x6ef   :  { %2829 = vmatpush1.msra.mxu0 %v2655_v50  ;;  %v2225_v24 = vpop.f32.mrf.mxu1  ;;  %v2903_v50 = vld [vmem:[%s5748_s15 + $0xf0] sm:$0xff] }
 0x6f0   :  { %2830 = vmatprep.subr.mxu0 %v2654_v51  ;;  %v2226_v33 = vadd.f32 %v2225_v24, %v2155_v23  ;;  %v2887_v51 = vld [vmem:[%s5748_s15 + $0x70] sm:$0xff]  ;;  %v2896_v23 = vld [vmem:[%s5748_s15 + $0xb8] sm:$0xff] }
 0x6f1   :  { %2831 = vmatpush1.msra.mxu0 %v2653_v52  ;;  %v2227_v25 = vpop.f32.mrf.mxu1  ;;  %v2902_v52 = vld [vmem:[%s5748_s15 + $0xe8] sm:$0xff] }
 0x6f2   :  { %2832 = vmatprep.subr.mxu0 %v2716_v11  ;;  %v2228_v35 = vadd.f32 %v2227_v25, %v2157_v32  ;;  %v2886_v11 = vld [vmem:[%s5748_s15 + $0x68] sm:$0xff]  ;;  %v2880_v25 = vld [vmem:[%s5748_s15 + $0x38] sm:$0xff]  ;;  %v2895_v32 = vld [vmem:[%s5748_s15 + $0xb0] sm:$0xff] }
 0x6f3   :  { %2833 = vmatpush2.msra.mxu0 %v2715_v53  ;;  %v2901_v53 = vld [vmem:[%s5748_s15 + $0xe0] sm:$0xff] }
 0x6f4   :  { %2834 = vmatprep.subr.mxu0 %v2714_v54  ;;  %v2885_v54 = vld [vmem:[%s5748_s15 + $0x60] sm:$0xff] }
 0x6f5   :  { %2835 = vmatpush2.msra.mxu0 %v2713_v55  ;;  %v2900_v55 = vld [vmem:[%s5748_s15 + $0xd8] sm:$0xff] }
 0x6f6   :  { %2836 = vmatprep.subr.mxu0 %v2712_v56  ;;  %v2884_v56 = vld [vmem:[%s5748_s15 + $0x58] sm:$0xff] }
 0x6f7   :  { %2837 = vmatpush2.msra.mxu0 %v2711_v57  ;;  %v2899_v57 = vld [vmem:[%s5748_s15 + $0xd0] sm:$0xff] }
 0x6f8   :  { %2838 = vmatprep.subr.mxu0 %v2710_v58  ;;  %v2883_v58 = vld [vmem:[%s5748_s15 + $0x50] sm:$0xff] }
 0x6f9   :  { %2839 = vmatpush2.msra.mxu0 %v2709_v59  ;;  %v1991_v59 = vsub.s32 2, %v4895_v63 }
 0x6fa   :  { %2840 = vmatprep.subr.mxu0 %v2708_v60  ;;  %v1995_v60 = vsub.s32 3, %v4895_v63 }
 0x6fb   :  { %2841 = vmatpush2.msra.mxu0 %v2707_v62 }
 0x6fc   :  { %2842 = vmatprep.subr.mxu0 %v2706_v2  ;;  %v1992_v2 = vrot.slane %v5179_v47, %v1991_v59 }
 0x6fd   :  { %2843 = vmatpush2.msra.mxu0 %v2705_v16  ;;  %v1996_v16 = vrot.slane %v5179_v47, %v1995_v60 }
 0x6fe   :  { %2844 = vmatprep.subr.mxu0 %v2704_v5 }
 0x6ff   :  { %2845 = vmatpush2.msra.mxu0 %v2703_v6 }
 0x700   :  { %2846 = vmatprep.subr.mxu0 %v2702_v7 }
 0x701   :  { %2847 = vmatpush2.msra.mxu0 %v2701_v8 }
 0x702   :  { %2848 = vmatprep.subr.mxu0 %v2700_v9 }
 0x703   :  { %2849 = vmatpush2.msra.mxu0 %v2699_v12 }
 0x704   :  { %2850 = vmatprep.subr.mxu0 %v2698_v26 }
 0x705   :  { %2851 = vmatpush2.msra.mxu0 %v2697_v27 }
 0x706   :  { %2852 = vmatprep.subr.mxu0 %v2696_v29  ;;  %v2882_v29 = vld [vmem:[%s5748_s15 + $0x48] sm:$0xff] }
 0x707   :  { %2853 = vmatpush2.msra.mxu0 %v2695_v31  ;;  %v2881_v31 = vld [vmem:[%s5748_s15 + $0x40] sm:$0xff] }
 0x708   :  { %2854 = vmatprep.subr.mxu0 %v2694_v40  ;;  %v2877_v40 = vld [vmem:[%s5748_s15 + $0x20] sm:$0xff] }
 0x709   :  { %2855 = vmatpush2.msra.mxu0 %v2693_v41  ;;  %v2892_v41 = vld [vmem:[%s5748_s15 + $0x98] sm:$0xff] }
 0x70a   :  { %2856 = vmatprep.subr.mxu0 %v2692_v44  ;;  %v2876_v44 = vld [vmem:[%s5748_s15 + $0x18] sm:$0xff] }
 0x70b   :  { %2857 = vmatpush2.msra.mxu0 %v2691_v46  ;;  %v2891_v46 = vld [vmem:[%s5748_s15 + $0x90] sm:$0xff] }
 0x70c   :  { %2858 = vmatprep.subr.mxu0 %v2690_v48  ;;  %v2875_v48 = vld [vmem:[%s5748_s15 + $0x10] sm:$0xff] }
 0x70d   :  { %2859 = vmatpush2.msra.mxu0 %v2689_v17  ;;  %v2890_v17 = vld [vmem:[%s5748_s15 + $0x88] sm:$0xff] }
 0x70e   :  { %v2296_v34 = vpop.f32.mrf.mxu0  ;;  %2860 = vmatprep.subr.mxu0 %v2688_v20  ;;  %v2874_v20 = vld [vmem:[%s5748_s15 + $0x8] sm:$0xff] }
 0x70f   :  { %v5185_v36 = vadd.f32 %v2296_v34, %v2226_v33  ;;  %2861 = vmatpush2.msra.mxu0 %v2687_v22  ;;  %v2879_v33 = vld [vmem:[%s5748_s15 + $0x30] sm:$0xff]  ;;  %v2894_v34 = vld [vmem:[%s5748_s15 + $0xa8] sm:$0xff]  ;;  %v2889_v22 = vld [vmem:[%s5748_s15 + $0x80] sm:$0xff] }
 0x710   :  { %v2298_v38 = vpop.f32.mrf.mxu0  ;;  %2862 = vmatprep.subr.mxu0 %v2686_v18  ;;  %v2873_v18 = vld [vmem:[%s5748_s15] sm:$0xff] }
 0x711   :  { %v5187_v39 = vadd.f32 %v2298_v38, %v2228_v35  ;;  %v2585_v45 = vmax.f32 %v5185_v36, 0.0  ;;  %2863 = vmatpush2.msra.mxu0 %v2685_v49  ;;  %v2878_v35 = vld [vmem:[%s5748_s15 + $0x28] sm:$0xff]  ;;  %v2893_v38 = vld [vmem:[%s5748_s15 + $0xa0] sm:$0xff] }
 0x712   :  { %v2717_v49 = vld [vmem:[#allocation20] sm:$0x3] }
 0x713   :  { %v2586_v43 = vmax.f32 %v5187_v39, 0.0  ;;  %v3295_v39 = vld [vmem:[#allocation22 + $0x8] sm:$0xff] }
 0x715   :  { %2793 = vmatprep.mubr.f32.mxu1 %v2586_v43 }
 0x716   :  { %2794 = vmatmul.mubr.f32.vlgmr.msra.gmra.mxu1 %v2585_v45 }
 0x717   :  { %3908 = vmatpush3.msra.mxu1 %v2888_v15  ;;  %v2722_v15 = vrot.slane %v2717_v49, %v4898_v1 }
 0x718   :  { %3909 = vmatprep.subr.mxu1 %v2903_v50  ;;  %v2726_v50 = vrot.slane %v2717_v49, %v4901_v3  ;;  %v4267_v49 = vld [vmem:[%s5766_s4 + $0xe0] sm:$0xff] }
 0x719   :  { %3910 = vmatpush3.msra.mxu1 %v2887_v51 }
 0x71a   :  { %3911 = vmatprep.subr.mxu1 %v2902_v52 }
 0x71b   :  { %3912 = vmatpush3.msra.mxu1 %v2886_v11 }
 0x71c   :  { %3913 = vmatprep.subr.mxu1 %v2901_v53 }
 0x71d   :  { %3914 = vmatpush3.msra.mxu1 %v2885_v54 }
 0x71e   :  { %3915 = vmatprep.subr.mxu1 %v2900_v55 }
 0x71f   :  { %3916 = vmatpush3.msra.mxu1 %v2884_v56 }
 0x720   :  { %3917 = vmatprep.subr.mxu1 %v2899_v57 }
 0x721   :  { %3918 = vmatpush3.msra.mxu1 %v2883_v58 }
 0x722   :  { %3919 = vmatprep.subr.mxu1 %v2898_v28 }
 0x723   :  { %3920 = vmatpush3.msra.mxu1 %v2882_v29  ;;  %v1034_v29 = vld [vmem:[%s5766_s4 + $0x1f8] sm:$0xff] }
 0x724   :  { %3921 = vmatprep.subr.mxu1 %v2897_v30  ;;  %v4658_v30 = vmov 0  }
 0x725   :  { %3922 = vmatpush3.msra.mxu1 %v2881_v31  ;;  %4230 = vset.pattern.permute.xlu1 %v4658_v30  ;;  %v5504_v30 = vld [vmem:[%s5766_s4 + $0x20] sm:$0xff] }
 0x726   :  { %3923 = vmatprep.subr.mxu1 %v2896_v23 }
 0x727   :  { %3924 = vmatpush3.msra.mxu1 %v2880_v25 }
 0x728   :  { %3925 = vmatprep.subr.mxu1 %v2895_v32 }
 0x729   :  { %3926 = vmatpush3.msra.mxu1 %v2879_v33  ;;  %v1018_v33 = vld [vmem:[%s5766_s4 + $0x178] sm:$0xff] }
 0x72a   :  { %3927 = vmatprep.subr.mxu1 %v2894_v34  ;;  %v1033_v34 = vld [vmem:[%s5766_s4 + $0x1f0] sm:$0xff] }
 0x72b   :  { %3928 = vmatpush3.msra.mxu1 %v2878_v35  ;;  %v1017_v35 = vld [vmem:[%s5766_s4 + $0x170] sm:$0xff] }
 0x72c   :  { %3929 = vmatprep.subr.mxu1 %v2893_v38  ;;  %v5339_v38 = vld [vmem:[%s5766_s4 + $0x78] sm:$0xff] }
 0x72d   :  { %3930 = vmatpush3.msra.mxu1 %v2877_v40  ;;  %v1032_v40 = vld [vmem:[%s5766_s4 + $0x1e8] sm:$0xff] }
 0x72e   :  { %3931 = vmatprep.subr.mxu1 %v2892_v41  ;;  %v4263_v41 = vld [vmem:[%s5766_s4 + $0xf0] sm:$0xff] }
 0x72f   :  { %3932 = vmatpush3.msra.mxu1 %v2876_v44  ;;  %v1016_v44 = vld [vmem:[%s5766_s4 + $0x168] sm:$0xff] }
 0x730   :  { %3933 = vmatprep.subr.mxu1 %v2891_v46  ;;  %v5354_v46 = vld [vmem:[%s5766_s4 + $0x70] sm:$0xff] }
 0x731   :  { %3934 = vmatpush3.msra.mxu1 %v2875_v48  ;;  %v1031_v48 = vld [vmem:[%s5766_s4 + $0x1e0] sm:$0xff] }
 0x732   :  { %v2438_v4 = vpop.f32.mrf.mxu1  ;;  %3935 = vmatprep.subr.mxu1 %v2890_v17  ;;  %v4265_v17 = vld [vmem:[%s5766_s4 + $0xe8] sm:$0xff] }
 0x733   :  { %3936 = vmatpush3.msra.mxu1 %v2874_v20  ;;  %v1015_v20 = vld [vmem:[%s5766_s4 + $0x160] sm:$0xff] }
 0x734   :  { %v2440_v8 = vpop.f32.mrf.mxu1  ;;  %3937 = vmatprep.subr.mxu1 %v2889_v22  ;;  %v5369_v22 = vld [vmem:[%s5766_s4 + $0x68] sm:$0xff] }
 0x735   :  { %3938 = vmatpush3.msra.mxu1 %v2873_v18  ;;  %v1030_v18 = vld [vmem:[%s5766_s4 + $0x1d8] sm:$0xff] }
 0x750   :  { %v2367_v62 = vpop.f32.mrf.mxu0 }
 0x751   :  { %v2368_v6 = vadd.f32 %v2367_v62, %v1992_v2  ;;  %v3276_v62 = vld [vmem:[%s5781_s30] sm:$0xff]  ;;  %v4657_v2 = vmov 1  }
 0x752   :  { %v2369_v5 = vpop.f32.mrf.mxu0  ;;  %4229 = vset.pattern.permute.xlu0 %v4657_v2  ;;  %v5444_v2 = vld [vmem:[%s5766_s4 + $0x40] sm:$0xff] }
 0x753   :  { %v2370_v7 = vadd.f32 %v2369_v5, %v1996_v16  ;;  %v2439_v19 = vadd.f32 %v2438_v4, %v2368_v6  ;;  %3284 = vperm.xlu0 %4229, %v3276_v62  }
 0x755   :  { %v2441_v10 = vadd.f32 %v2440_v8, %v2370_v7  ;;  %v968_v8 = vld [vmem:[#allocation8 + $0x28] sm:$0xff] }
 0x756   :  { %v2580_v37 = vpop.f32.mrf.mxu1  ;;  %3018 = vmatprep.subr.mxu1 %v968_v8  ;;  %v4279_v8 = vld [vmem:[%s5766_s4 + $0xb0] sm:$0xff] }
 0x758   :  { %v2582_v26 = vpop.f32.mrf.mxu1 }
 0x791   :  { %v2509_v21 = vpop.f32.mrf.mxu0 }
 0x792   :  { %v2510_v9 = vadd.f32 %v2509_v21, %v2439_v19  ;;  %v970_v19 = vld [vmem:[#allocation8 + $0x38] sm:$0xff]  ;;  %v969_v21 = vld [vmem:[#allocation8 + $0x30] sm:$0xff] }
 0x793   :  { %v2511_v12 = vpop.f32.mrf.mxu0  ;;  %3089 = vmatprep.subr.mxu0 %v970_v19  ;;  %v1008_v19 = vld [vmem:[%s5766_s4 + $0x128] sm:$0xff] }
 0x794   :  { %v2512_v24 = vadd.f32 %v2511_v12, %v2441_v10  ;;  %v5235_v27 = vadd.f32 %v2580_v37, %v2510_v9  ;;  %v967_v37 = vld [vmem:[#allocation8 + $0x20] sm:$0xff]  ;;  %v966_v9 = vld [vmem:[#allocation8 + $0x18] sm:$0xff]  ;;  %v965_v10 = vld [vmem:[#allocation8 + $0x10] sm:$0xff] }
 0x795   :  { %v4259_v12 = vld [vmem:[#allocation8 + $0x8] sm:$0xff] }
 0x796   :  { %v5237_v63 = vadd.f32 %v2582_v26, %v2512_v24  ;;  %v2587_v47 = vmax.f32 %v5235_v27, 0.0  ;;  %v5314_v24 = vld [vmem:[#allocation8] sm:$0xff]  ;;  %v4261_v26 = vld [vmem:[%s5766_s4 + $0xf8] sm:$0xff] }
 0x797   :  { %v3409_v27 = vld [vmem:[%s5751_s18 + $0x70] sm:$0xff] }
 0x798   :  { %v2588_v42 = vmax.f32 %v5237_v63, 0.0  ;;  %v3408_v63 = vld [vmem:[%s5751_s18 + $0x68] sm:$0xff] }
 0x79a   :  { %2864 = vmatprep.mubr.f32.mxu0 %v2588_v42 }
 0x79b   :  { %2865 = vmatmul.mubr.f32.vlgmr.msra.gmra.mxu0 %v2587_v47 }
 0x79c   :  { %3125 = vmatprep.mubr.f32.mxu0 %v4654_v0  ;;  %3090 = vmatpush1.msra.mxu0 %v969_v21  ;;  %v1023_v21 = vld [vmem:[%s5766_s4 + $0x1a0] sm:$0xff] }
 0x79d   :  { %3091 = vmatprep.subr.mxu0 %v966_v9  ;;  %v4281_v9 = vld [vmem:[%s5766_s4 + $0xa8] sm:$0xff] }
 0x79e   :  { %3092 = vmatpush1.msra.mxu0 %v965_v10  ;;  %v1007_v10 = vld [vmem:[%s5766_s4 + $0x120] sm:$0xff] }
 0x79f   :  { %3942 = vmatprep.subr.mxu0 %v4261_v26  ;;  %v1022_v26 = vld [vmem:[%s5766_s4 + $0x198] sm:$0xff] }
 0x7ce   :  { %v3285_v28 = vpop.permute.xlu0 %3284 }
 0x7cf   :  { %vm3286_vm7 = vcmp.eq.s32.totalorder %v3285_v28, %v4847_v13  ;;  %v4283_v28 = vld [vmem:[%s5766_s4 + $0xa0] sm:$0xff] }
 0x7d0   :  { %v3812_v31 = vsel %vm3286_vm7, 1.0, %v4654_v0 }
 0x7d6   :  { %v2795_v14 = vpop.f32.mrf.mxu1 }
 0x7d7   :  { %v2796_v52 = vadd.f32 %v2795_v14, %v2722_v15  ;;  %v1014_v14 = vld [vmem:[%s5766_s4 + $0x158] sm:$0xff]  ;;  %v5384_v15 = vld [vmem:[%s5766_s4 + $0x60] sm:$0xff] }
 0x7d8   :  { %v2797_v51 = vpop.f32.mrf.mxu1 }
 0x7d9   :  { %v2798_v53 = vadd.f32 %v2797_v51, %v2726_v50  ;;  %v1029_v50 = vld [vmem:[%s5766_s4 + $0x1d0] sm:$0xff]  ;;  %v4269_v51 = vld [vmem:[%s5766_s4 + $0xd8] sm:$0xff] }
 0x85b   :  { %v2866_v11 = vpop.f32.mrf.mxu0 }
 0x85c   :  { %v2867_v54 = vadd.f32 %v2866_v11, %v2796_v52  ;;  %v1013_v52 = vld [vmem:[%s5766_s4 + $0x150] sm:$0xff]  ;;  %v5399_v11 = vld [vmem:[%s5766_s4 + $0x58] sm:$0xff] }
 0x85d   :  { %v2868_v55 = vpop.f32.mrf.mxu0 }
 0x85e   :  { %v2869_v56 = vadd.f32 %v2868_v55, %v2798_v53  ;;  %v1028_v53 = vld [vmem:[%s5766_s4 + $0x1c8] sm:$0xff] }
 0x85f   :  { %v1012_v55 = vld [vmem:[%s5766_s4 + $0x148] sm:$0xff] }
 0x860   :  { %4237 = vtanh.f32 %v2869_v56  ;;  %v5414_v56 = vld [vmem:[%s5766_s4 + $0x50] sm:$0xff] }
 0x861   :  { %4239 = vtanh.f32 %v2867_v54  ;;  %v4271_v54 = vld [vmem:[%s5766_s4 + $0xd0] sm:$0xff] }
 0x86d   :  { %v4238_v57 = vpop.eup %4237 }
 0x86e   :  { %v4240_v58 = vpop.eup %4239  ;;  %2969 = vmatprep.mubr.f32.mxu1 %v4238_v57  ;;  %v1027_v57 = vld [vmem:[%s5766_s4 + $0x1c0] sm:$0xff] }
 0x86f   :  { %2970 = vmatmul.mubr.f32.vlgmr.msra.gmra.mxu1 %v4240_v58  ;;  %v4273_v58 = vld [vmem:[%s5766_s4 + $0xc8] sm:$0xff] }
 0x870   :  { %3054 = vmatprep.mubr.f32.mxu1 %v4654_v0  ;;  %3019 = vmatpush1.msra.mxu1 %v967_v37  ;;  %v5474_v37 = vld [vmem:[%s5766_s4 + $0x30] sm:$0xff] }
 0x871   :  { %3020 = vmatprep.subr.mxu1 %v4259_v12  ;;  %v5489_v12 = vld [vmem:[%s5766_s4 + $0x28] sm:$0xff] }
 0x872   :  { %3021 = vmatpush1.msra.mxu1 %v5314_v24 }
 0x873   :  { %3977 = vmatprep.subr.mxu1 %v1034_v29  ;;  %v1006_v29 = vld [vmem:[%s5766_s4 + $0x118] sm:$0xff] }
 0x92f   :  { %v3939_v59 = vpop.f32.mrf.mxu1 }
 0x931   :  { %v3940_v60 = vpop.f32.mrf.mxu1 }
 0x932   :  { %v3941_v1 = vadd.f32 %v3940_v60, %v3939_v59  ;;  %v1011_v59 = vld [vmem:[%s5766_s4 + $0x140] sm:$0xff]  ;;  %v5429_v60 = vld [vmem:[%s5766_s4 + $0x48] sm:$0xff] }
 0x934   :  { %v2976_v3 = vsel %vm2975_vm6, %v3941_v1, -inf }
 0x935   :  { %2977 = vmax.xlane.f32.xlu1 %v2976_v3  ;;  %v4275_v3 = vld [vmem:[%s5766_s4 + $0xc0] sm:$0xff] }
 0x9be   :  { %v2978_v16 = vpop.xlane.xlu1 %2977 }
 0x9bf   :  { %v2979_v4 = vsub.f32 %v3941_v1, %v2978_v16  ;;  %v1026_v1 = vld [vmem:[%s5766_s4 + $0x1b8] sm:$0xff]  ;;  %v1025_v16 = vld [vmem:[%s5766_s4 + $0x1b0] sm:$0xff] }
 0x9c1   :  { %v2980_v5 = vmul.f32 1.442695, %v2979_v4  ;;  %v4277_v4 = vld [vmem:[%s5766_s4 + $0xb8] sm:$0xff] }
 0x9c3   :  { %4241 = vpow2.f32 %v2980_v5  ;;  %v1009_v5 = vld [vmem:[%s5766_s4 + $0x130] sm:$0xff] }
 0x9d0   :  { %v4242_v6 = vpop.eup %4241 }
 0x9d1   :  { %v2982_v7 = vsel %vm2975_vm6, %v4242_v6, 0.0 }
 0x9d2   :  { %2983 = vadd.xlane.f32.xlu1 %v2982_v7  ;;  %v1024_v7 = vld [vmem:[%s5766_s4 + $0x1a8] sm:$0xff] }
 0x9e3   :  { %3278 = vperm.xlu1 %4230, %v3276_v62   ;;  %v1010_v62 = vld [vmem:[%s5766_s4 + $0x138] sm:$0xff] }
 0x9e7   :  { %3290 = vrot.lane.b32.xlu1 %v3812_v31, %s4659_s23  ;;  %v1021_v31 = vld [vmem:[%s5766_s4 + $0x190] sm:$0xff] }
 0xa5b   :  { %v2984_v23 = vpop.xlane.xlu1 %2983 }
 0xa5c   :  { %4243 = vrcp.f32 %v2984_v23  ;;  %v4285_v23 = vld [vmem:[%s5766_s4 + $0x98] sm:$0xff] }
 0xa69   :  { %v4244_v25 = vpop.eup %4243 }
 0xa6a   :  { %v2986_v32 = vmul.f32 %v4244_v25, %v4242_v6  ;;  %v5459_v6 = vld [vmem:[%s5766_s4 + $0x38] sm:$0xff] }
 0xa6b   :  { %v5516_v25 = vld [vmem:[%s5766_s4 + $0x18] sm:$0xff] }
 0xa6c   :  { %3809 = vmatmul.mubr.msk.f32.vlgmr.msra.gmra.mxu1 %vm2975_vm6, %v2986_v32  ;;  %3810 = vmatmul.mubr.msk.f32.vlgmr.msra.gmra.mxu0 %vm2975_vm6, %v2986_v32  ;;  %v4287_v32 = vld [vmem:[%s5766_s4 + $0x90] sm:$0xff] }
 0xa6d   :  { %3978 = vmatpush3.msra.mxu1 %v1018_v33  ;;  %3943 = vmatpush3.msra.mxu0 %v5339_v38  ;;  %v5525_v33 = vld [vmem:[%s5766_s4 + $0x10] sm:$0xff] }
 0xa6e   :  { %3979 = vmatprep.subr.mxu1 %v1033_v34  ;;  %3944 = vmatprep.subr.mxu0 %v4263_v41  ;;  %v4289_v34 = vld [vmem:[%s5766_s4 + $0x88] sm:$0xff]  ;;  %v5543_v41 = vld [vmem:[%s5766_s4] sm:$0xff] }
 0xa6f   :  { %3980 = vmatpush3.msra.mxu1 %v1017_v35  ;;  %3945 = vmatpush3.msra.mxu0 %v5354_v46  ;;  %v5534_v35 = vld [vmem:[%s5766_s4 + $0x8] sm:$0xff] }
 0xa70   :  { %3981 = vmatprep.subr.mxu1 %v1032_v40  ;;  %3946 = vmatprep.subr.mxu0 %v4265_v17  ;;  %v4291_v40 = vld [vmem:[%s5766_s4 + $0x80] sm:$0xff]  ;;  %v1004_v17 = vld [vmem:[%s5766_s4 + $0x108] sm:$0xff] }
 0xa71   :  { %3982 = vmatpush3.msra.mxu1 %v1016_v44  ;;  %3947 = vmatpush3.msra.mxu0 %v5369_v22  ;;  %v1005_v44 = vld [vmem:[%s5766_s4 + $0x110] sm:$0xff] }
 0xa72   :  { %3983 = vmatprep.subr.mxu1 %v1031_v48  ;;  %3948 = vmatprep.subr.mxu0 %v4267_v49  ;;  %v1020_v48 = vld [vmem:[%s5766_s4 + $0x188] sm:$0xff]  ;;  %v3279_v49 = vpop.permute.xlu1 %3278 }
 0xa73   :  { %3984 = vmatpush3.msra.mxu1 %v1015_v20  ;;  %3949 = vmatpush3.msra.mxu0 %v5384_v15  ;;  %v1019_v20 = vld [vmem:[%s5766_s4 + $0x180] sm:$0xff]  ;;  %vm3280_vm9 = vcmp.eq.s32.totalorder %v3279_v49, %v4847_v13  ;;  %v3294_v13 = vld [vmem:[#allocation22] sm:$0xff] }
 0xa74   :  { %3985 = vmatprep.subr.mxu1 %v1030_v18  ;;  %3950 = vmatprep.subr.mxu0 %v4269_v51  ;;  %v1003_v18 = vld [vmem:[%s5766_s4 + $0x100] sm:$0xff] }
 0xa75   :  { %3986 = vmatpush3.msra.mxu1 %v1014_v14  ;;  %3951 = vmatpush3.msra.mxu0 %v5399_v11 }
 0xa76   :  { %3987 = vmatprep.subr.mxu1 %v1029_v50  ;;  %3952 = vmatprep.subr.mxu0 %v4271_v54 }
 0xa77   :  { %3988 = vmatpush3.msra.mxu1 %v1013_v52  ;;  %3953 = vmatpush3.msra.mxu0 %v5414_v56 }
 0xa78   :  { %3989 = vmatprep.subr.mxu1 %v1028_v53  ;;  %3954 = vmatprep.subr.mxu0 %v4273_v58  ;;  %v3296_v58 = vld [vmem:[#allocation22 + $0x10] sm:$0x3f] }
 0xa79   :  { %3990 = vmatpush3.msra.mxu1 %v1012_v55  ;;  %3955 = vmatpush3.msra.mxu0 %v5429_v60 }
 0xa7a   :  { %3991 = vmatprep.subr.mxu1 %v1027_v57  ;;  %3956 = vmatprep.subr.mxu0 %v4275_v3  ;;  %v3404_v3 = vld [vmem:[%s5751_s18 + $0x48] sm:$0xff] }
 0xa7b   :  { %3992 = vmatpush3.msra.mxu1 %v1011_v59  ;;  %3957 = vmatpush3.msra.mxu0 %v5444_v2  ;;  %v3811_v59 = vsel %vm3280_vm9, 1.0, %v4654_v0 }
 0xa7c   :  { %3993 = vmatprep.subr.mxu1 %v1026_v1  ;;  %3958 = vmatprep.subr.mxu0 %v4277_v4  ;;  %v3405_v1 = vld [vmem:[%s5751_s18 + $0x50] sm:$0xff] }
 0xa7d   :  { %3994 = vmatpush3.msra.mxu1 %v1010_v62  ;;  %3959 = vmatpush3.msra.mxu0 %v5459_v6  ;;  %v3403_v62 = vld [vmem:[%s5751_s18 + $0x40] sm:$0xff]  ;;  %v3401_v4 = vld [vmem:[%s5751_s18 + $0x30] sm:$0xff] }
 0xa7e   :  { %3995 = vmatprep.subr.mxu1 %v1025_v16  ;;  %3960 = vmatprep.subr.mxu0 %v4279_v8  ;;  %v3402_v16 = vld [vmem:[%s5751_s18 + $0x38] sm:$0xff] }
 0xa7f   :  { %3996 = vmatpush3.msra.mxu1 %v1009_v5  ;;  %3961 = vmatpush3.msra.mxu0 %v5474_v37  ;;  %v3400_v5 = vld [vmem:[%s5751_s18 + $0x28] sm:$0xff]  ;;  %v3398_v8 = vld [vmem:[%s5751_s18 + $0x18] sm:$0xff] }
 0xa80   :  { %3997 = vmatprep.subr.mxu1 %v1024_v7  ;;  %3962 = vmatprep.subr.mxu0 %v4281_v9  ;;  %v3399_v7 = vld [vmem:[%s5751_s18 + $0x20] sm:$0xff] }
 0xa81   :  { %3998 = vmatpush3.msra.mxu1 %v1008_v19  ;;  %3963 = vmatpush3.msra.mxu0 %v5489_v12  ;;  %v3397_v19 = vld [vmem:[%s5751_s18 + $0x10] sm:$0xff]  ;;  %v3395_v9 = vld [vmem:[%s5751_s18] sm:$0xff] }
 0xa82   :  { %3999 = vmatprep.subr.mxu1 %v1023_v21  ;;  %3964 = vmatprep.subr.mxu0 %v4283_v28  ;;  %v3396_v21 = vld [vmem:[%s5751_s18 + $0x8] sm:$0xff] }
 0xa83   :  { %4000 = vmatpush3.msra.mxu1 %v1007_v10  ;;  %3965 = vmatpush3.msra.mxu0 %v5504_v30 }
 0xa84   :  { %4001 = vmatprep.subr.mxu1 %v1022_v26  ;;  %3966 = vmatprep.subr.mxu0 %v4285_v23 }
 0xa85   :  { %4002 = vmatpush3.msra.mxu1 %v1006_v29  ;;  %3967 = vmatpush3.msra.mxu0 %v5516_v25 }
 0xa86   :  { %4003 = vmatprep.subr.mxu1 %v1021_v31  ;;  %3968 = vmatprep.subr.mxu0 %v4287_v32  ;;  %v3813_v32 = vld [vmem:[#allocation23] ss:$0 sm:$0xff] }
 0xa87   :  { %3969 = vmatpush3.msra.mxu0 %v5525_v33  ;;  %4004 = vmatpush3.msra.mxu1 %v1005_v44 }
 0xa88   :  { %3970 = vmatprep.subr.mxu0 %v4289_v34  ;;  %4005 = vmatprep.subr.mxu1 %v1020_v48 }
 0xa89   :  { %3971 = vmatpush3.msra.mxu0 %v5534_v35  ;;  %4006 = vmatpush3.msra.mxu1 %v1004_v17 }
 0xa8a   :  { %3972 = vmatprep.subr.mxu0 %v4291_v40  ;;  %4007 = vmatprep.subr.mxu1 %v1019_v20 }
 0xa8b   :  { %3973 = vmatpush3.msra.mxu0 %v5543_v41  ;;  %4008 = vmatpush3.msra.mxu1 %v1003_v18 }
 0xa8c   :  { %4105 = vmatprep.subr.mxu0 %v4654_v0  ;;  %4096 = vmatprep.subr.mxu1 %v4654_v0 }
 0xb2c   :  { %v3056_v14 = vpop.f32.mrf.mxu1  ;;  %v3127_v50 = vpop.f32.mrf.mxu0 }
 0xb2d   :  { %v3132_v55 = vmul.f32 %v3056_v14, %v2585_v45  ;;  %v3134_v57 = vmul.f32 %v3127_v50, %v2587_v47  ;;  %v3410_v45 = vld [vmem:[%s5751_s18 + $0x78] sm:$0xff] }
 0xb2e   :  { %v3058_v51 = vpop.f32.mrf.mxu1  ;;  %v3129_v52 = vpop.f32.mrf.mxu0  ;;  %v3406_v47 = vld [vmem:[%s5751_s18 + $0x58] sm:$0xff] }
 0xb2f   :  { %v3133_v53 = vmul.f32 %v3058_v51, %v2586_v43  ;;  %v3135_v54 = vmul.f32 %v3129_v52, %v2588_v42  ;;  %v3291_v43 = vpop.permute.xlu1 %3290  ;;  %v3407_v42 = vld [vmem:[%s5751_s18 + $0x60] sm:$0xff] }
 0xb30   :  { %v3293_v36 = vsel %vm282_vm1, %v3811_v59, %v3291_v43  ;;  %vm3391_vm1 = vcmask 261120  }
 0xb31   :  { %3200 = vmatprep.mubr.f32.mxu0 %v3133_v53  ;;  %3270 = vmatprep.mubr.f32.mxu1 %v3135_v54 }
 0xb32   :  { %3201 = vmatmul.mubr.f32.vlgmr.msra.gmra.mxu0 %v3132_v55  ;;  %3271 = vmatmul.mubr.f32.vlgmr.msra.gmra.mxu1 %v3134_v57 }
 0xb33   :  { %4097 = vmatpush3.msk.msra.mxu1 %vm3308_vm10, %v3296_v58  ;;  %4102 = vmatprep.mubr.msk.f32.mxu1 %vm4656_vm8, %v4654_v0 }
 0xb34   :  { %4098 = vmatprep.subr.mxu1 %v4654_v0  ;;  %4137 = vmatprep.mubr.msk.f32.mxu0 %vm4656_vm8, %v4654_v0 }
 0xb35   :  { %4099 = vmatpush3.msra.mxu1 %v3295_v39  ;;  %4106 = vmatpush3.msra.mxu0 %v3410_v45 }
 0xb36   :  { %4100 = vmatprep.subr.mxu1 %v4654_v0  ;;  %4107 = vmatprep.subr.mxu0 %v4654_v0 }
 0xb37   :  { %4101 = vmatpush3.msra.mxu1 %v3294_v13  ;;  %4108 = vmatpush3.msra.mxu0 %v3409_v27 }
 0xb38   :  { %4103 = vmatmul.mubr.msk.f32.vlgmr.msra.gmra.mxu1 %vm3304_vm11, %v3293_v36  ;;  %4140 = vmatprep.subr.mxu1 %v4654_v0 }
 0xb39   :  { %4156 = vmatprep.mubr.msk.f32.mxu1 %vm4656_vm8, %v4654_v0  ;;  %4109 = vmatprep.subr.mxu0 %v4654_v0 }
 0xb3a   :  { %4110 = vmatpush3.msra.mxu0 %v3408_v63 }
 0xb3b   :  { %4111 = vmatprep.subr.mxu0 %v4654_v0 }
 0xb3c   :  { %4112 = vmatpush3.msra.mxu0 %v3407_v42 }
 0xb3d   :  { %4113 = vmatprep.subr.mxu0 %v4654_v0 }
 0xb3e   :  { %4114 = vmatpush3.msra.mxu0 %v3406_v47 }
 0xb3f   :  { %4115 = vmatprep.subr.mxu0 %v4654_v0 }
 0xb40   :  { %4116 = vmatpush3.msra.mxu0 %v3405_v1 }
 0xb41   :  { %4117 = vmatprep.subr.mxu0 %v4654_v0 }
 0xb42   :  { %4118 = vmatpush3.msra.mxu0 %v3404_v3 }
 0xb43   :  { %4119 = vmatprep.subr.mxu0 %v4654_v0 }
 0xb44   :  { %4120 = vmatpush3.msra.mxu0 %v3403_v62 }
 0xb45   :  { %4121 = vmatprep.subr.mxu0 %v4654_v0 }
 0xb46   :  { %4122 = vmatpush3.msra.mxu0 %v3402_v16 }
 0xb47   :  { %4123 = vmatprep.subr.mxu0 %v4654_v0 }
 0xb48   :  { %4124 = vmatpush3.msra.mxu0 %v3401_v4 }
 0xb49   :  { %4125 = vmatprep.subr.mxu0 %v4654_v0 }
 0xb4a   :  { %4126 = vmatpush3.msra.mxu0 %v3400_v5 }
 0xb4b   :  { %4127 = vmatprep.subr.mxu0 %v4654_v0 }
 0xb4c   :  { %4128 = vmatpush3.msra.mxu0 %v3399_v7 }
 0xb4d   :  { %4129 = vmatprep.subr.mxu0 %v4654_v0 }
 0xb4e   :  { %4130 = vmatpush3.msra.mxu0 %v3398_v8 }
 0xb4f   :  { %4131 = vmatprep.subr.mxu0 %v4654_v0 }
 0xb50   :  { %4132 = vmatpush3.msra.mxu0 %v3397_v19 }
 0xb51   :  { %4133 = vmatprep.subr.mxu0 %v4654_v0 }
 0xb52   :  { %4134 = vmatpush3.msra.mxu0 %v3396_v21 }
 0xb53   :  { %4135 = vmatprep.subr.mxu0 %v4654_v0 }
 0xb54   :  { %4136 = vmatpush3.msra.mxu0 %v3395_v9 }
 0xb55   :  { %4164 = vmatprep.subr.mxu0 %v4654_v0 }
 0xbf2   :  { %v3974_v10 = vpop.f32.mrf.mxu0  ;;  %v4009_v26 = vpop.f32.mrf.mxu1 }
 0xbf4   :  { %v3975_v28 = vpop.f32.mrf.mxu0  ;;  %v4010_v29 = vpop.f32.mrf.mxu1 }
 0xbf5   :  { %v3976_v31 = vadd.f32 %v3975_v28, %v3974_v10  ;;  %v4011_v23 = vadd.f32 %v4010_v29, %v4009_v26 }
 0xbf7   :  { %v3273_v34 = vadd.f32 %v4011_v23, %v3976_v31 }
 0xbf8   :  { %v3378_v40 = vpop.f32.mrf.mxu1 }
 0xbf9   :  { %v3379_v44 = vadd.f32 %v3813_v32, %v3378_v40  ;;  %3384 = vrot.lane.b32.xlu1 %v3273_v34, %s4634_s5 }
 0xbfa   :  { %v4104_v48 = vpop.f32.mrf.mxu1 }
 0xbfb   :  { %v3382_v17 = vmax.f32 %v3379_v44, 0.0 }
 0xbfd   :  { %3388 = vrot.lane.b32.xlu1 %v3382_v17, %s4643_s9 }
 0xc6b   :  { %v3385_v20 = vpop.permute.xlu1 %3384 }
 0xc6c   :  { %v3392_v18 = vsel %vm3391_vm1, %v5174_v61, %v3385_v20  ;;  %v3496_v61 = vld [vmem:[%s5753_s20 + $0x38] sm:$0xff] }
 0xc6d   :  { %4141 = vmatpush3.msra.mxu1 %v3496_v61 }
 0xc6e   :  { %4142 = vmatprep.subr.mxu1 %v4654_v0 }
 0xc6f   :  { %v3389_v49 = vpop.permute.xlu1 %3388 }
 0xc70   :  { %v5652_v14 = vsel %vm3393_vm12, %v3392_v18, %v3389_v49 }
 0xc71   :  { %4138 = vmatmul.mubr.f32.vlgmr.msra.gmra.mxu0 %v5652_v14 }
 0xc72   :  { %4165 = vmatpush3.msra.mxu0 %v5339_v38  ;;  %4196 = vmatprep.mubr.msk.f32.mxu0 %vm4656_vm8, %v4654_v0  ;;  %v3495_v38 = vld [vmem:[%s5753_s20 + $0x30] sm:$0xff] }
 0xc73   :  { %4166 = vmatprep.subr.mxu0 %v4654_v0  ;;  %4143 = vmatpush3.msra.mxu1 %v3495_v38 }
 0xc74   :  { %4167 = vmatpush3.msra.mxu0 %v5354_v46  ;;  %v3494_v46 = vld [vmem:[%s5753_s20 + $0x28] sm:$0xff]  ;;  %4144 = vmatprep.subr.mxu1 %v4654_v0 }
 0xc75   :  { %4168 = vmatprep.subr.mxu0 %v4654_v0  ;;  %4145 = vmatpush3.msra.mxu1 %v3494_v46 }
 0xc76   :  { %4169 = vmatpush3.msra.mxu0 %v5369_v22  ;;  %v3493_v22 = vld [vmem:[%s5753_s20 + $0x20] sm:$0xff]  ;;  %4146 = vmatprep.subr.mxu1 %v4654_v0 }
 0xc77   :  { %4170 = vmatprep.subr.mxu0 %v4654_v0  ;;  %4147 = vmatpush3.msra.mxu1 %v3493_v22 }
 0xc78   :  { %4171 = vmatpush3.msra.mxu0 %v5384_v15  ;;  %v3492_v15 = vld [vmem:[%s5753_s20 + $0x18] sm:$0xff]  ;;  %4148 = vmatprep.subr.mxu1 %v4654_v0 }
 0xc79   :  { %4172 = vmatprep.subr.mxu0 %v4654_v0  ;;  %4149 = vmatpush3.msra.mxu1 %v3492_v15 }
 0xc7a   :  { %4173 = vmatpush3.msra.mxu0 %v5399_v11  ;;  %v3491_v11 = vld [vmem:[%s5753_s20 + $0x10] sm:$0xff]  ;;  %4150 = vmatprep.subr.mxu1 %v4654_v0 }
 0xc7b   :  { %4174 = vmatprep.subr.mxu0 %v4654_v0  ;;  %4151 = vmatpush3.msra.mxu1 %v3491_v11 }
 0xc7c   :  { %4175 = vmatpush3.msra.mxu0 %v5414_v56  ;;  %v3490_v56 = vld [vmem:[%s5753_s20 + $0x8] sm:$0xff]  ;;  %4152 = vmatprep.subr.mxu1 %v4654_v0 }
 0xc7d   :  { %4176 = vmatprep.subr.mxu0 %v4654_v0  ;;  %4153 = vmatpush3.msra.mxu1 %v3490_v56 }
 0xc7e   :  { %4177 = vmatpush3.msra.mxu0 %v5429_v60  ;;  %v3489_v60 = vld [vmem:[%s5753_s20] sm:$0xff]  ;;  %4154 = vmatprep.subr.mxu1 %v4654_v0  ;;  %s4660_s20 = smov [#allocation26]  }
 0xc7f   :  { %4178 = vmatprep.subr.mxu0 %v4654_v0  ;;  %4155 = vmatpush3.msra.mxu1 %v3489_v60  ;;  %s3735_s15 = sshll.u32 %s4660_s20, 4  ;;  %s3736_s15 = int_to_ptr.vmem [resolvable:$true] %s3735_s15 }
 0xc80   :  { %4179 = vmatpush3.msra.mxu0 %v5444_v2  ;;  %4159 = vmatprep.subr.mxu1 %v4654_v0  ;;  %v3816_v2 = vld [vmem:[#allocation25] ss:$0 sm:$0xff]  ;;  %s4593_s11 = scalar_lea.vmem %s3736_s15, 128  ;;  %p4598_p6 = scmp.lt.s32.totalorder %s3736_s15, %s3736_s15 }
 0xc81   :  { %4180 = vmatprep.subr.mxu0 %v4654_v0  ;;  %p4594_p5 = scmp.ne.s32.totalorder %s3736_s15, %s4593_s11  ;;  %p4599_p7 = scmp.lt.s32.totalorder %s4593_s11, %s4593_s11 }
 0xc82   :  { %4181 = vmatpush3.msra.mxu0 %v5459_v6 }
 0xc83   :  { %4182 = vmatprep.subr.mxu0 %v4654_v0  ;;  %p4600_p8 = por %p4599_p7, %p4598_p6 }
 0xc84   :  { %4183 = vmatpush3.msra.mxu0 %v5474_v37 }
 0xc85   :  { %4184 = vmatprep.subr.mxu0 %v4654_v0  ;;  %p4601_p9 = pnand %p4600_p8, %p4594_p5 }
 0xc86   :  { %4185 = vmatpush3.msra.mxu0 %v5489_v12 }
 0xc87   :  { %4186 = vmatprep.subr.mxu0 %v4654_v0 }
 0xc88   :  { %4187 = vmatpush3.msra.mxu0 %v5504_v30 }
 0xc89   :  { %4188 = vmatprep.subr.mxu0 %v4654_v0 }
 0xc8a   :  { %4189 = vmatpush3.msra.mxu0 %v5516_v25 }
 0xc8b   :  { %4190 = vmatprep.subr.mxu0 %v4654_v0 }
 0xc8c   :  { %4191 = vmatpush3.msra.mxu0 %v5525_v33 }
 0xc8d   :  { %4192 = vmatprep.subr.mxu0 %v4654_v0 }
 0xc8e   :  { %4193 = vmatpush3.msra.mxu0 %v5534_v35 }
 0xc8f   :  { %4194 = vmatprep.subr.mxu0 %v4654_v0 }
 0xc90   :  { %4195 = vmatpush3.msra.mxu0 %v5543_v41 }
 0xd31   :  { %v3484_v6 = vpop.f32.mrf.mxu0 }
 0xd32   :  { %v3485_v37 = vadd.f32 %v3816_v2, %v3484_v6 }
 0xd33   :  { %v4139_v12 = vpop.f32.mrf.mxu0 }
 0xd34   :  { %4245 = vtanh.f32 %v3485_v37 }
 0xd41   :  { %v4246_v30 = vpop.eup %4245 }
 0xd42   :  { %4157 = vmatmul.mubr.msk.f32.vlgmr.msra.gmra.mxu1 %vm3393_vm12, %v4246_v30 }
 0xd43   :  { %4160 = vmatpush3.msk.msra.mxu1 %vm604_vm2, %v5314_v24  ;;  %4161 = vmatprep.mubr.msk.f32.mxu1 %vm4656_vm8, %v4654_v0 }
 0xe02   :  { %v3566_v25 = vpop.f32.mrf.mxu1 }
 0xe03   :  { %v3570_v33 = vsel %vm2001_vm4, %v3566_v25, -inf }
 0xe04   :  { %3571 = vmax.xlane.f32.xlu1 %v3570_v33  ;;  %v4158_v35 = vpop.f32.mrf.mxu1 }
 0xe8d   :  { %v3572_v41 = vpop.xlane.xlu1 %3571 }
 0xe8e   :  { %v3573_v50 = vsub.f32 %v3566_v25, %v3572_v41 }
 0xe90   :  { %v3574_v51 = vmul.f32 1.442695, %v3573_v50 }
 0xe92   :  { %4247 = vpow2.f32 %v3574_v51 }
 0xe9f   :  { %v4248_v52 = vpop.eup %4247 }
 0xea0   :  { %v3576_v53 = vsel %vm2001_vm4, %v4248_v52, 0.0 }
 0xea1   :  { %3577 = vadd.xlane.f32.xlu0 %v3576_v53 }
 0xf2a   :  { %v3578_v54 = vpop.xlane.xlu0 %3577 }
 0xf2b   :  { %4249 = vrcp.f32 %v3578_v54 }
 0xf38   :  { %v4250_v55 = vpop.eup %4249 }
 0xf39   :  { %v3580_v24 = vmul.f32 %v4250_v55, %v4248_v52 }
 0xf3b   :  { %4162 = vmatmul.mubr.msk.f32.vlgmr.msra.gmra.mxu1 %vm2001_vm4, %v3580_v24 }
 0xffb   :  { %v3653_v0 = vpop.f32.mrf.mxu1 }
 0xffc   :  { %v3657_v57 = vmul.f32 %v3653_v0, %v5652_v14 }
 0xffd   :  { %v4163_v58 = vpop.f32.mrf.mxu1 }
 0xffe   :  { %4197 = vmatmul.mubr.f32.vlgmr.msra.gmra.mxu0 %v3657_v57 }
0x10be   :  { %v3724_v59 = vpop.f32.mrf.mxu0 }
0x10bf   :  { %3728 = vst.msk [vmem:[#allocation26] sm:$0xff] %vm3391_vm1, %v3724_v59 }
0x10c0   :  { %v4198_v39 = vpop.f32.mrf.mxu0 }
0x10c1   :  { %4604 = shalt.err (!%p4601_p9)
}
0x10c2   :  { %3738 = dma.vmem_to_hbm [thread:$0]  %s3736_s15, 128, %s5754_s21, [#allocation4]  }
0x10c3   :  { %4629 = dma.done.wait [#allocation4], 128  }
0x10c4   :  { %4630 = vsyncadd [#allocation4], 4294967168 }
0x10c5   :  { %3742 = vsyncpa [#allocation3], 1 }
0x10c6   :  { %3743 = vsyncpa [#allocation6], 1 }
0x10c7   :  { %3744 = vsyncpa [#allocation9], 1 }
0x10c8   :  { %3745 = vsyncpa [#allocation12], 1 }
0x10c9   :  { %3746 = vsyncpa [#allocation15], 1 }
0x10ca   :  { %3747 = vsyncpa [#allocation18], 1 }
0x10cb   :  { %3748 = vsyncpa [#allocation21], 1 }
0x10cc   :  { %3749 = vsyncpa [#allocation24], 1 }
0x10cd   :  { %3750 = vsyncpa [#allocation4], 1 }

</bundles_post_ra>
